<compile_context>
chip_gen: v5e
topology: v5e:2x2
jax: 0.10.0
libtpu: 0.0.40
codegen_flags: <defaults>
</compile_context>

<pallas_src>
import functools

import jax
import jax.numpy as jnp
from jax.experimental import pallas as pl
from jax.experimental.pallas import tpu as pltpu

LANE = 128          # vreg lane width: pad all feature dims to a multiple
TILE_NODES = 256    # node tile for both the row axis and the contraction axis


def _round_up(v, m):
    return ((v + m - 1) // m) * m


def _pad2(m, rows, cols):
    return jnp.pad(m, ((0, rows - m.shape[0]), (0, cols - m.shape[1])))


def gin_layer_kernel(eps_ref, a_ref, x_ref, w1_ref, b1_ref, w2_ref, b2_ref,
                     o_ref, acc_ref, *, relu_out: bool, log_softmax: bool,
                     out_valid: int):
    """One fused GINConv layer at grid point (row-tile i, contraction-tile k).

    acc = sum_k A[i,k] @ x[k]  +  (1 + eps) * x[i]        (f32 accumulator)
    h   = relu(acc @ W1 + b1) @ W2 + b2
    h   = relu(h)                         if relu_out     (relu(relu(.)) folds)
    h   = log_softmax(h[:, :out_valid])   if log_softmax  (padded cols masked)
    """
    i = pl.program_id(0)
    k = pl.program_id(1)
    nk = pl.num_programs(1)

    @pl.when(k == 0)
    def _():
        acc_ref[...] = jnp.zeros_like(acc_ref)

    # Neighbor aggregation: streamed bf16 A tile @ x K-slab on the MXU.
    acc_ref[...] += jnp.dot(a_ref[...], x_ref[...],
                            preferred_element_type=jnp.float32)

    # Self term: tile_m == tile_k, so at k == i the streamed x block is exactly
    # the row block of this output tile.  Added once per row tile.
    @pl.when(k == i)
    def _():
        acc_ref[...] += (1.0 + eps_ref[0]) * x_ref[...].astype(jnp.float32)

    @pl.when(k == nk - 1)
    def _():
        h = acc_ref[...]
        # MLP layer 1 + ReLU (bf16 matmul, f32 accumulate / elementwise).
        h = jnp.dot(h.astype(jnp.bfloat16), w1_ref[...],
                    preferred_element_type=jnp.float32) + b1_ref[...]
        h = jnp.maximum(h, 0.0)
        # MLP layer 2.
        h = jnp.dot(h.astype(jnp.bfloat16), w2_ref[...],
                    preferred_element_type=jnp.float32) + b2_ref[...]
        if relu_out:
            # Sequential's trailing ReLU + outer F.relu: relu(relu(x)) == relu(x).
            h = jnp.maximum(h, 0.0)
        if log_softmax:
            # Mask lane-padded columns so they don't perturb the normalization.
            col = jax.lax.broadcasted_iota(jnp.int32, h.shape, 1)
            h = jnp.where(col < out_valid, h, -1e30)
            m = jnp.max(h, axis=1, keepdims=True)
            s = h - m
            lse = jnp.log(jnp.sum(jnp.exp(s), axis=1, keepdims=True))
            h = s - lse
        o_ref[...] = h.astype(o_ref.dtype)


def gin_layer(eps, a, x, w1, b1, w2, b2, *, relu_out, log_softmax, out_valid,
              tile):
    """One GINConv layer.  a:[Np,Np] bf16, x:[Np,Fin] bf16, padded weights."""
    n_pad = a.shape[0]
    f_in = x.shape[1]
    hid = w1.shape[1]
    f_out = w2.shape[1]
    grid = (n_pad // tile, n_pad // tile)

    kernel = functools.partial(gin_layer_kernel, relu_out=relu_out,
                               log_softmax=log_softmax, out_valid=out_valid)
    out_dtype = jnp.float32 if log_softmax else jnp.bfloat16

    return pl.pallas_call(
        kernel,
        out_shape=jax.ShapeDtypeStruct((n_pad, f_out), out_dtype),
        grid_spec=pltpu.PrefetchScalarGridSpec(
            num_scalar_prefetch=1,                                     # eps
            grid=grid,
            in_specs=[
                pl.BlockSpec((tile, tile), lambda i, k, eps: (i, k)),   # A
                pl.BlockSpec((tile, f_in), lambda i, k, eps: (k, 0)),   # x
                pl.BlockSpec((f_in, hid), lambda i, k, eps: (0, 0)),    # W1
                pl.BlockSpec((1, hid), lambda i, k, eps: (0, 0)),       # b1
                pl.BlockSpec((hid, f_out), lambda i, k, eps: (0, 0)),   # W2
                pl.BlockSpec((1, f_out), lambda i, k, eps: (0, 0)),     # b2
            ],
            out_specs=pl.BlockSpec((tile, f_out), lambda i, k, eps: (i, 0)),
            scratch_shapes=[pltpu.VMEM((tile, f_in), jnp.float32)],
        ),
        compiler_params=pltpu.CompilerParams(
            dimension_semantics=("parallel", "arbitrary"),
            vmem_limit_bytes=32 * 1024 * 1024,
        ),
    )(eps, a, x, w1, b1, w2, b2)


def build_adjacency(edge_index, num_nodes, tile=TILE_NODES):
    """Dense padded adjacency A[dst, src] in bf16.

    Built once outside the layer loop (hoists the XLA scatter + N^2
    materialization out of the per-layer hot path).  Edge-count entries are
    small integers, exact in bf16.  Padded rows/cols stay zero.
    """
    n_pad = _round_up(max(num_nodes, tile), tile)
    src, dst = edge_index[0], edge_index[1]
    a = jnp.zeros((n_pad, n_pad), jnp.float32).at[dst, src].add(1.0)
    return a.astype(jnp.bfloat16)


def init_params(key, in_channels, hidden_channels, out_channels, num_layers):
    """Deterministic parameter init mirroring the module's __init__ shapes."""
    params = []
    for i in range(num_layers):
        d_in = in_channels if i == 0 else hidden_channels
        d_out = out_channels if i == num_layers - 1 else hidden_channels
        key, k1, k2, k3, k4 = jax.random.split(key, 5)
        w1 = jax.random.normal(k1, (d_in, hidden_channels), jnp.float32) * 0.1
        b1 = jax.random.normal(k2, (hidden_channels,), jnp.float32) * 0.01
        w2 = jax.random.normal(k3, (hidden_channels, d_out), jnp.float32) * 0.1
        b2 = jax.random.normal(k4, (d_out,), jnp.float32) * 0.01
        eps = jnp.zeros((1,), jnp.float32)  # GINConv(train_eps=True): eps = 0
        params.append((eps, w1, b1, w2, b2))
    return params


def gin_model_forward(x, a, params, tile=TILE_NODES):
    """Full GINModel forward (inference).  `a` comes from build_adjacency."""
    n, f_in = x.shape
    n_pad = a.shape[0]
    out_channels = params[-1][3].shape[1]   # w2 of the last layer

    # Lane/tile padding of activations (zero pad => no aggregation pollution).
    h = _pad2(x, n_pad, _round_up(f_in, LANE)).astype(jnp.bfloat16)

    num_layers = len(params)
    for li, (eps, w1, b1, w2, b2) in enumerate(params):
        last = li == num_layers - 1
        d_in, hid = w1.shape
        d_out = w2.shape[1]
        d_in_p = _round_up(d_in, LANE)
        hid_p = _round_up(hid, LANE)
        d_out_p = _round_up(d_out, LANE)
        w1p = _pad2(w1, d_in_p, hid_p).astype(jnp.bfloat16)
        b1p = _pad2(b1.reshape(1, -1), 1, hid_p)               # f32
        w2p = _pad2(w2, hid_p, d_out_p).astype(jnp.bfloat16)
        b2p = _pad2(b2.reshape(1, -1), 1, d_out_p)             # f32
        h = gin_layer(eps, a, h, w1p, b1p, w2p, b2p,
                      relu_out=not last, log_softmax=last,
                      out_valid=d_out, tile=tile)
        # F.dropout(..., training=False) is the identity in inference.
    return h[:n, :out_channels].astype(jnp.float32)


if __name__ == "__main__":
    key = jax.random.PRNGKey(0)

    num_nodes = 32
    in_channels = 16
    hidden_channels = 32
    out_channels = 8
    num_layers = 2
    num_edges = 64

    key, kx, ks, kd = jax.random.split(key, 4)
    x = jax.random.normal(kx, (num_nodes, in_channels), jnp.float32)
    edge_index = jnp.stack([
        jax.random.randint(ks, (num_edges,), 0, num_nodes),
        jax.random.randint(kd, (num_edges,), 0, num_nodes),
    ]).astype(jnp.int32)

    params = init_params(key, in_channels, hidden_channels, out_channels,
                         num_layers)

    a = build_adjacency(edge_index, num_nodes)   # built once, bf16, padded
    fwd = jax.jit(gin_model_forward)
    out = jax.block_until_ready(fwd(x, a, params))

    assert out.shape == (num_nodes, out_channels)
    # Sanity: log_softmax rows sum to ~1 in probability space.
    assert jnp.allclose(jnp.sum(jnp.exp(out), axis=1), 1.0, atol=1e-3)

    print("KERNEL_OK")
</pallas_src>

<mosaic_0001>
module attributes {stable_mosaic.version = 11 : i64} {
  func.func @gin_layer_kernel(%arg0: i32, %arg1: i32, %arg2: memref<1xf32, #tpu.memory_space<smem>>, %arg3: memref<256x256xbf16, #tpu.memory_space<vmem>>, %arg4: memref<256x128xbf16, #tpu.memory_space<vmem>>, %arg5: memref<128x128xbf16, #tpu.memory_space<vmem>>, %arg6: memref<1x128xf32, #tpu.memory_space<vmem>>, %arg7: memref<128x128xbf16, #tpu.memory_space<vmem>>, %arg8: memref<1x128xf32, #tpu.memory_space<vmem>>, %arg9: memref<256x128xbf16, #tpu.memory_space<vmem>>, %arg10: memref<256x128xf32, #tpu.memory_space<vmem>>) attributes {dimension_semantics = [#tpu.dimension_semantics<parallel>, #tpu.dimension_semantics<arbitrary>], iteration_bounds = array<i64: 1, 1>, scalar_prefetch = 1 : i64, scratch_operands = 1 : i64, tpu.core_type = #tpu.core_type<tc>, window_params = [{transform_indices = @transform_0, window_bounds = array<i64: 256, 256>}, {transform_indices = @transform_1, window_bounds = array<i64: 256, 128>}, {pipeline_mode = #tpu.pipeline_mode<synchronous>, transform_indices = @transform_2, window_bounds = array<i64: 128, 128>}, {pipeline_mode = #tpu.pipeline_mode<synchronous>, transform_indices = @transform_3, window_bounds = array<i64: 1, 128>}, {pipeline_mode = #tpu.pipeline_mode<synchronous>, transform_indices = @transform_4, window_bounds = array<i64: 128, 128>}, {pipeline_mode = #tpu.pipeline_mode<synchronous>, transform_indices = @transform_5, window_bounds = array<i64: 1, 128>}, {transform_indices = @transform_6, window_bounds = array<i64: 256, 128>}]} {
    %c0_i32 = arith.constant 0 : i32
    %0 = arith.cmpi eq, %arg1, %c0_i32 : i32
    %1 = arith.extui %0 : i1 to i32
    %c0_i32_0 = arith.constant 0 : i32
    %2 = arith.cmpi ne, %1, %c0_i32_0 : i32
    scf.if %2 {
      %cst_11 = arith.constant 0.000000e+00 : f32
      %15 = vector.broadcast %cst_11 : f32 to vector<256x128xf32>
      %c0_12 = arith.constant 0 : index
      %c0_13 = arith.constant 0 : index
      %16 = vector.load %arg10[%c0_12, %c0_13] : memref<256x128xf32, #tpu.memory_space<vmem>>, vector<256x128xf32>
      tpu.vector_store %arg10[%c0_12, %c0_13], %15 {strides = array<i32>} : memref<256x128xf32, #tpu.memory_space<vmem>>, vector<256x128xf32>,
    } else {
    }
    %c0 = arith.constant 0 : index
    %c0_1 = arith.constant 0 : index
    %3 = vector.load %arg10[%c0, %c0_1] : memref<256x128xf32, #tpu.memory_space<vmem>>, vector<256x128xf32>
    %c0_2 = arith.constant 0 : index
    %c0_3 = arith.constant 0 : index
    %4 = vector.load %arg3[%c0_2, %c0_3] : memref<256x256xbf16, #tpu.memory_space<vmem>>, vector<256x256xbf16>
    %c0_4 = arith.constant 0 : index
    %c0_5 = arith.constant 0 : index
    %5 = vector.load %arg4[%c0_4, %c0_5] : memref<256x128xbf16, #tpu.memory_space<vmem>>, vector<256x128xbf16>
    %cst = arith.constant dense<0.000000e+00> : vector<256x128xf32>
    %6 = tpu.matmul %4, %5, %cst {dimension_numbers = #tpu.dot_dimension_numbers<[1], [0], [0], [1], [0, 0, 1, 1], [], []>} : vector<256x256xbf16>, vector<256x128xbf16>, vector<256x128xf32> -> vector<256x128xf32>
    %7 = arith.addf %3, %6 : vector<256x128xf32>
    %c0_6 = arith.constant 0 : index
    %c0_7 = arith.constant 0 : index
    %8 = vector.load %arg10[%c0_6, %c0_7] : memref<256x128xf32, #tpu.memory_space<vmem>>, vector<256x128xf32>
    tpu.vector_store %arg10[%c0_6, %c0_7], %7 {strides = array<i32>} : memref<256x128xf32, #tpu.memory_space<vmem>>, vector<256x128xf32>,
    %9 = arith.cmpi eq, %arg1, %arg0 : i32
    %10 = arith.extui %9 : i1 to i32
    %c0_i32_8 = arith.constant 0 : i32
    %11 = arith.cmpi ne, %10, %c0_i32_8 : i32
    scf.if %11 {
      %c0_11 = arith.constant 0 : index
      %c0_12 = arith.constant 0 : index
      %15 = vector.load %arg10[%c0_11, %c0_12] : memref<256x128xf32, #tpu.memory_space<vmem>>, vector<256x128xf32>
      %c0_13 = arith.constant 0 : index
      %16 = memref.load %arg2[%c0_13] : memref<1xf32, #tpu.memory_space<smem>>
      %cst_14 = arith.constant 1.000000e+00 : f32
      %17 = arith.addf %cst_14, %16 : f32
      %c0_15 = arith.constant 0 : index
      %c0_16 = arith.constant 0 : index
      %18 = vector.load %arg4[%c0_15, %c0_16] : memref<256x128xbf16, #tpu.memory_space<vmem>>, vector<256x128xbf16>
      %19 = arith.extf %18 : vector<256x128xbf16> to vector<256x128xf32>
      %20 = vector.broadcast %17 : f32 to vector<256x128xf32>
      %21 = arith.mulf %20, %19 : vector<256x128xf32>
      %22 = arith.addf %15, %21 : vector<256x128xf32>
      %c0_17 = arith.constant 0 : index
      %c0_18 = arith.constant 0 : index
      %23 = vector.load %arg10[%c0_17, %c0_18] : memref<256x128xf32, #tpu.memory_space<vmem>>, vector<256x128xf32>
      tpu.vector_store %arg10[%c0_17, %c0_18], %22 {strides = array<i32>} : memref<256x128xf32, #tpu.memory_space<vmem>>, vector<256x128xf32>,
    } else {
    }
    %c0_i32_9 = arith.constant 0 : i32
    %12 = arith.cmpi eq, %arg1, %c0_i32_9 : i32
    %13 = arith.extui %12 : i1 to i32
    %c0_i32_10 = arith.constant 0 : i32
    %14 = arith.cmpi ne, %13, %c0_i32_10 : i32
    scf.if %14 {
      %c0_11 = arith.constant 0 : index
      %c0_12 = arith.constant 0 : index
      %15 = vector.load %arg10[%c0_11, %c0_12] : memref<256x128xf32, #tpu.memory_space<vmem>>, vector<256x128xf32>
      %16 = arith.truncf %15 : vector<256x128xf32> to vector<256x128xbf16>
      %c0_13 = arith.constant 0 : index
      %c0_14 = arith.constant 0 : index
      %17 = vector.load %arg5[%c0_13, %c0_14] : memref<128x128xbf16, #tpu.memory_space<vmem>>, vector<128x128xbf16>
      %cst_15 = arith.constant dense<0.000000e+00> : vector<256x128xf32>
      %18 = tpu.matmul %16, %17, %cst_15 {dimension_numbers = #tpu.dot_dimension_numbers<[1], [0], [0], [1], [0, 0, 1, 1], [], []>} : vector<256x128xbf16>, vector<128x128xbf16>, vector<256x128xf32> -> vector<256x128xf32>
      %c0_16 = arith.constant 0 : index
      %c0_17 = arith.constant 0 : index
      %19 = vector.load %arg6[%c0_16, %c0_17] : memref<1x128xf32, #tpu.memory_space<vmem>>, vector<1x128xf32>
      %20 = vector.broadcast %19 : vector<1x128xf32> to vector<256x128xf32>
      %21 = arith.addf %18, %20 : vector<256x128xf32>
      %cst_18 = arith.constant 0.000000e+00 : f32
      %22 = vector.broadcast %cst_18 : f32 to vector<256x128xf32>
      %23 = arith.maximumf %21, %22 : vector<256x128xf32>
      %24 = arith.truncf %23 : vector<256x128xf32> to vector<256x128xbf16>
      %c0_19 = arith.constant 0 : index
      %c0_20 = arith.constant 0 : index
      %25 = vector.load %arg7[%c0_19, %c0_20] : memref<128x128xbf16, #tpu.memory_space<vmem>>, vector<128x128xbf16>
      %cst_21 = arith.constant dense<0.000000e+00> : vector<256x128xf32>
      %26 = tpu.matmul %24, %25, %cst_21 {dimension_numbers = #tpu.dot_dimension_numbers<[1], [0], [0], [1], [0, 0, 1, 1], [], []>} : vector<256x128xbf16>, vector<128x128xbf16>, vector<256x128xf32> -> vector<256x128xf32>
      %c0_22 = arith.constant 0 : index
      %c0_23 = arith.constant 0 : index
      %27 = vector.load %arg8[%c0_22, %c0_23] : memref<1x128xf32, #tpu.memory_space<vmem>>, vector<1x128xf32>
      %28 = vector.broadcast %27 : vector<1x128xf32> to vector<256x128xf32>
      %29 = arith.addf %26, %28 : vector<256x128xf32>
      %cst_24 = arith.constant 0.000000e+00 : f32
      %30 = vector.broadcast %cst_24 : f32 to vector<256x128xf32>
      %31 = arith.maximumf %29, %30 : vector<256x128xf32>
      %32 = arith.truncf %31 : vector<256x128xf32> to vector<256x128xbf16>
      %c0_25 = arith.constant 0 : index
      %c0_26 = arith.constant 0 : index
      %33 = vector.load %arg9[%c0_25, %c0_26] : memref<256x128xbf16, #tpu.memory_space<vmem>>, vector<256x128xbf16>
      tpu.vector_store %arg9[%c0_25, %c0_26], %32 {strides = array<i32>} : memref<256x128xbf16, #tpu.memory_space<vmem>>, vector<256x128xbf16>,
    } else {
    }
    return
  }
  func.func @transform_0(%arg0: i32, %arg1: i32, %arg2: memref<1xf32, #tpu.memory_space<smem>>) -> (i32, i32) {
    %c0_i32 = arith.constant 0 : i32
    return %arg0, %arg1 : i32, i32
  }
  func.func @transform_1(%arg0: i32, %arg1: i32, %arg2: memref<1xf32, #tpu.memory_space<smem>>) -> (i32, i32) {
    %c0_i32 = arith.constant 0 : i32
    %c0_i32_0 = arith.constant 0 : i32
    return %arg1, %c0_i32 : i32, i32
  }
  func.func @transform_2(%arg0: i32, %arg1: i32, %arg2: memref<1xf32, #tpu.memory_space<smem>>) -> (i32, i32) {
    %c0_i32 = arith.constant 0 : i32
    %c0_i32_0 = arith.constant 0 : i32
    %c0_i32_1 = arith.constant 0 : i32
    return %c0_i32, %c0_i32_0 : i32, i32
  }
  func.func @transform_3(%arg0: i32, %arg1: i32, %arg2: memref<1xf32, #tpu.memory_space<smem>>) -> (i32, i32) {
    %c0_i32 = arith.constant 0 : i32
    %c0_i32_0 = arith.constant 0 : i32
    %c0_i32_1 = arith.constant 0 : i32
    return %c0_i32, %c0_i32_0 : i32, i32
  }
  func.func @transform_4(%arg0: i32, %arg1: i32, %arg2: memref<1xf32, #tpu.memory_space<smem>>) -> (i32, i32) {
    %c0_i32 = arith.constant 0 : i32
    %c0_i32_0 = arith.constant 0 : i32
    %c0_i32_1 = arith.constant 0 : i32
    return %c0_i32, %c0_i32_0 : i32, i32
  }
  func.func @transform_5(%arg0: i32, %arg1: i32, %arg2: memref<1xf32, #tpu.memory_space<smem>>) -> (i32, i32) {
    %c0_i32 = arith.constant 0 : i32
    %c0_i32_0 = arith.constant 0 : i32
    %c0_i32_1 = arith.constant 0 : i32
    return %c0_i32, %c0_i32_0 : i32, i32
  }
  func.func @transform_6(%arg0: i32, %arg1: i32, %arg2: memref<1xf32, #tpu.memory_space<smem>>) -> (i32, i32) {
    %c0_i32 = arith.constant 0 : i32
    %c0_i32_0 = arith.constant 0 : i32
    return %arg0, %c0_i32 : i32, i32
  }
}

module attributes {stable_mosaic.version = 11 : i64} {
  func.func @gin_layer_kernel(%arg0: i32, %arg1: i32, %arg2: memref<1xf32, #tpu.memory_space<smem>>, %arg3: memref<256x256xbf16, #tpu.memory_space<vmem>>, %arg4: memref<256x128xbf16, #tpu.memory_space<vmem>>, %arg5: memref<128x128xbf16, #tpu.memory_space<vmem>>, %arg6: memref<1x128xf32, #tpu.memory_space<vmem>>, %arg7: memref<128x128xbf16, #tpu.memory_space<vmem>>, %arg8: memref<1x128xf32, #tpu.memory_space<vmem>>, %arg9: memref<256x128xf32, #tpu.memory_space<vmem>>, %arg10: memref<256x128xf32, #tpu.memory_space<vmem>>) attributes {dimension_semantics = [#tpu.dimension_semantics<parallel>, #tpu.dimension_semantics<arbitrary>], iteration_bounds = array<i64: 1, 1>, scalar_prefetch = 1 : i64, scratch_operands = 1 : i64, tpu.core_type = #tpu.core_type<tc>, window_params = [{transform_indices = @transform_0, window_bounds = array<i64: 256, 256>}, {transform_indices = @transform_1, window_bounds = array<i64: 256, 128>}, {pipeline_mode = #tpu.pipeline_mode<synchronous>, transform_indices = @transform_2, window_bounds = array<i64: 128, 128>}, {pipeline_mode = #tpu.pipeline_mode<synchronous>, transform_indices = @transform_3, window_bounds = array<i64: 1, 128>}, {pipeline_mode = #tpu.pipeline_mode<synchronous>, transform_indices = @transform_4, window_bounds = array<i64: 128, 128>}, {pipeline_mode = #tpu.pipeline_mode<synchronous>, transform_indices = @transform_5, window_bounds = array<i64: 1, 128>}, {transform_indices = @transform_6, window_bounds = array<i64: 256, 128>}]} {
    %c0_i32 = arith.constant 0 : i32
    %0 = arith.cmpi eq, %arg1, %c0_i32 : i32
    %1 = arith.extui %0 : i1 to i32
    %c0_i32_0 = arith.constant 0 : i32
    %2 = arith.cmpi ne, %1, %c0_i32_0 : i32
    scf.if %2 {
      %cst_11 = arith.constant 0.000000e+00 : f32
      %15 = vector.broadcast %cst_11 : f32 to vector<256x128xf32>
      %c0_12 = arith.constant 0 : index
      %c0_13 = arith.constant 0 : index
      %16 = vector.load %arg10[%c0_12, %c0_13] : memref<256x128xf32, #tpu.memory_space<vmem>>, vector<256x128xf32>
      tpu.vector_store %arg10[%c0_12, %c0_13], %15 {strides = array<i32>} : memref<256x128xf32, #tpu.memory_space<vmem>>, vector<256x128xf32>,
    } else {
    }
    %c0 = arith.constant 0 : index
    %c0_1 = arith.constant 0 : index
    %3 = vector.load %arg10[%c0, %c0_1] : memref<256x128xf32, #tpu.memory_space<vmem>>, vector<256x128xf32>
    %c0_2 = arith.constant 0 : index
    %c0_3 = arith.constant 0 : index
    %4 = vector.load %arg3[%c0_2, %c0_3] : memref<256x256xbf16, #tpu.memory_space<vmem>>, vector<256x256xbf16>
    %c0_4 = arith.constant 0 : index
    %c0_5 = arith.constant 0 : index
    %5 = vector.load %arg4[%c0_4, %c0_5] : memref<256x128xbf16, #tpu.memory_space<vmem>>, vector<256x128xbf16>
    %cst = arith.constant dense<0.000000e+00> : vector<256x128xf32>
    %6 = tpu.matmul %4, %5, %cst {dimension_numbers = #tpu.dot_dimension_numbers<[1], [0], [0], [1], [0, 0, 1, 1], [], []>} : vector<256x256xbf16>, vector<256x128xbf16>, vector<256x128xf32> -> vector<256x128xf32>
    %7 = arith.addf %3, %6 : vector<256x128xf32>
    %c0_6 = arith.constant 0 : index
    %c0_7 = arith.constant 0 : index
    %8 = vector.load %arg10[%c0_6, %c0_7] : memref<256x128xf32, #tpu.memory_space<vmem>>, vector<256x128xf32>
    tpu.vector_store %arg10[%c0_6, %c0_7], %7 {strides = array<i32>} : memref<256x128xf32, #tpu.memory_space<vmem>>, vector<256x128xf32>,
    %9 = arith.cmpi eq, %arg1, %arg0 : i32
    %10 = arith.extui %9 : i1 to i32
    %c0_i32_8 = arith.constant 0 : i32
    %11 = arith.cmpi ne, %10, %c0_i32_8 : i32
    scf.if %11 {
      %c0_11 = arith.constant 0 : index
      %c0_12 = arith.constant 0 : index
      %15 = vector.load %arg10[%c0_11, %c0_12] : memref<256x128xf32, #tpu.memory_space<vmem>>, vector<256x128xf32>
      %c0_13 = arith.constant 0 : index
      %16 = memref.load %arg2[%c0_13] : memref<1xf32, #tpu.memory_space<smem>>
      %cst_14 = arith.constant 1.000000e+00 : f32
      %17 = arith.addf %cst_14, %16 : f32
      %c0_15 = arith.constant 0 : index
      %c0_16 = arith.constant 0 : index
      %18 = vector.load %arg4[%c0_15, %c0_16] : memref<256x128xbf16, #tpu.memory_space<vmem>>, vector<256x128xbf16>
      %19 = arith.extf %18 : vector<256x128xbf16> to vector<256x128xf32>
      %20 = vector.broadcast %17 : f32 to vector<256x128xf32>
      %21 = arith.mulf %20, %19 : vector<256x128xf32>
      %22 = arith.addf %15, %21 : vector<256x128xf32>
      %c0_17 = arith.constant 0 : index
      %c0_18 = arith.constant 0 : index
      %23 = vector.load %arg10[%c0_17, %c0_18] : memref<256x128xf32, #tpu.memory_space<vmem>>, vector<256x128xf32>
      tpu.vector_store %arg10[%c0_17, %c0_18], %22 {strides = array<i32>} : memref<256x128xf32, #tpu.memory_space<vmem>>, vector<256x128xf32>,
    } else {
    }
    %c0_i32_9 = arith.constant 0 : i32
    %12 = arith.cmpi eq, %arg1, %c0_i32_9 : i32
    %13 = arith.extui %12 : i1 to i32
    %c0_i32_10 = arith.constant 0 : i32
    %14 = arith.cmpi ne, %13, %c0_i32_10 : i32
    scf.if %14 {
      %c0_11 = arith.constant 0 : index
      %c0_12 = arith.constant 0 : index
      %15 = vector.load %arg10[%c0_11, %c0_12] : memref<256x128xf32, #tpu.memory_space<vmem>>, vector<256x128xf32>
      %16 = arith.truncf %15 : vector<256x128xf32> to vector<256x128xbf16>
      %c0_13 = arith.constant 0 : index
      %c0_14 = arith.constant 0 : index
      %17 = vector.load %arg5[%c0_13, %c0_14] : memref<128x128xbf16, #tpu.memory_space<vmem>>, vector<128x128xbf16>
      %cst_15 = arith.constant dense<0.000000e+00> : vector<256x128xf32>
      %18 = tpu.matmul %16, %17, %cst_15 {dimension_numbers = #tpu.dot_dimension_numbers<[1], [0], [0], [1], [0, 0, 1, 1], [], []>} : vector<256x128xbf16>, vector<128x128xbf16>, vector<256x128xf32> -> vector<256x128xf32>
      %c0_16 = arith.constant 0 : index
      %c0_17 = arith.constant 0 : index
      %19 = vector.load %arg6[%c0_16, %c0_17] : memref<1x128xf32, #tpu.memory_space<vmem>>, vector<1x128xf32>
      %20 = vector.broadcast %19 : vector<1x128xf32> to vector<256x128xf32>
      %21 = arith.addf %18, %20 : vector<256x128xf32>
      %cst_18 = arith.constant 0.000000e+00 : f32
      %22 = vector.broadcast %cst_18 : f32 to vector<256x128xf32>
      %23 = arith.maximumf %21, %22 : vector<256x128xf32>
      %24 = arith.truncf %23 : vector<256x128xf32> to vector<256x128xbf16>
      %c0_19 = arith.constant 0 : index
      %c0_20 = arith.constant 0 : index
      %25 = vector.load %arg7[%c0_19, %c0_20] : memref<128x128xbf16, #tpu.memory_space<vmem>>, vector<128x128xbf16>
      %cst_21 = arith.constant dense<0.000000e+00> : vector<256x128xf32>
      %26 = tpu.matmul %24, %25, %cst_21 {dimension_numbers = #tpu.dot_dimension_numbers<[1], [0], [0], [1], [0, 0, 1, 1], [], []>} : vector<256x128xbf16>, vector<128x128xbf16>, vector<256x128xf32> -> vector<256x128xf32>
      %c0_22 = arith.constant 0 : index
      %c0_23 = arith.constant 0 : index
      %27 = vector.load %arg8[%c0_22, %c0_23] : memref<1x128xf32, #tpu.memory_space<vmem>>, vector<1x128xf32>
      %28 = vector.broadcast %27 : vector<1x128xf32> to vector<256x128xf32>
      %29 = arith.addf %26, %28 : vector<256x128xf32>
      %30 = tpu.iota {dimensions = array<i32: 1>} : vector<256x128xi32>
      %c8_i32 = arith.constant 8 : i32
      %31 = vector.broadcast %c8_i32 : i32 to vector<256x128xi32>
      %32 = arith.cmpi slt, %30, %31 : vector<256x128xi32>
      %cst_24 = arith.constant -1.000000e+30 : f32
      %33 = vector.broadcast %cst_24 : f32 to vector<256x128xf32>
      %34 = arith.select %32, %29, %33 : vector<256x128xi1>, vector<256x128xf32>
      %cst_25 = arith.constant dense<0xFF800000> : vector<256xf32>
      %35 = vector.multi_reduction <maximumf>, %34, %cst_25 [1] : vector<256x128xf32> to vector<256xf32>
      %36 = vector.shape_cast %35 : vector<256xf32> to vector<256x1xf32>
      %37 = vector.broadcast %36 : vector<256x1xf32> to vector<256x128xf32>
      %38 = arith.subf %34, %37 : vector<256x128xf32>
      %39 = math.exp %38 : vector<256x128xf32>
      %cst_26 = arith.constant dense<0.000000e+00> : vector<256xf32>
      %40 = vector.multi_reduction <add>, %39, %cst_26 [1] : vector<256x128xf32> to vector<256xf32>
      %41 = vector.shape_cast %40 : vector<256xf32> to vector<256x1xf32>
      %42 = math.log %41 : vector<256x1xf32>
      %43 = vector.broadcast %42 : vector<256x1xf32> to vector<256x128xf32>
      %44 = arith.subf %38, %43 : vector<256x128xf32>
      %c0_27 = arith.constant 0 : index
      %c0_28 = arith.constant 0 : index
      %45 = vector.load %arg9[%c0_27, %c0_28] : memref<256x128xf32, #tpu.memory_space<vmem>>, vector<256x128xf32>
      tpu.vector_store %arg9[%c0_27, %c0_28], %44 {strides = array<i32>} : memref<256x128xf32, #tpu.memory_space<vmem>>, vector<256x128xf32>,
    } else {
    }
    return
  }
  func.func @transform_0(%arg0: i32, %arg1: i32, %arg2: memref<1xf32, #tpu.memory_space<smem>>) -> (i32, i32) {
    %c0_i32 = arith.constant 0 : i32
    return %arg0, %arg1 : i32, i32
  }
  func.func @transform_1(%arg0: i32, %arg1: i32, %arg2: memref<1xf32, #tpu.memory_space<smem>>) -> (i32, i32) {
    %c0_i32 = arith.constant 0 : i32
    %c0_i32_0 = arith.constant 0 : i32
    return %arg1, %c0_i32 : i32, i32
  }
  func.func @transform_2(%arg0: i32, %arg1: i32, %arg2: memref<1xf32, #tpu.memory_space<smem>>) -> (i32, i32) {
    %c0_i32 = arith.constant 0 : i32
    %c0_i32_0 = arith.constant 0 : i32
    %c0_i32_1 = arith.constant 0 : i32
    return %c0_i32, %c0_i32_0 : i32, i32
  }
  func.func @transform_3(%arg0: i32, %arg1: i32, %arg2: memref<1xf32, #tpu.memory_space<smem>>) -> (i32, i32) {
    %c0_i32 = arith.constant 0 : i32
    %c0_i32_0 = arith.constant 0 : i32
    %c0_i32_1 = arith.constant 0 : i32
    return %c0_i32, %c0_i32_0 : i32, i32
  }
  func.func @transform_4(%arg0: i32, %arg1: i32, %arg2: memref<1xf32, #tpu.memory_space<smem>>) -> (i32, i32) {
    %c0_i32 = arith.constant 0 : i32
    %c0_i32_0 = arith.constant 0 : i32
    %c0_i32_1 = arith.constant 0 : i32
    return %c0_i32, %c0_i32_0 : i32, i32
  }
  func.func @transform_5(%arg0: i32, %arg1: i32, %arg2: memref<1xf32, #tpu.memory_space<smem>>) -> (i32, i32) {
    %c0_i32 = arith.constant 0 : i32
    %c0_i32_0 = arith.constant 0 : i32
    %c0_i32_1 = arith.constant 0 : i32
    return %c0_i32, %c0_i32_0 : i32, i32
  }
  func.func @transform_6(%arg0: i32, %arg1: i32, %arg2: memref<1xf32, #tpu.memory_space<smem>>) -> (i32, i32) {
    %c0_i32 = arith.constant 0 : i32
    %c0_i32_0 = arith.constant 0 : i32
    return %arg0, %c0_i32 : i32, i32
  }
}

</mosaic_0001>

<bundles_post_ra>
// kernel: gin_model_forward.2
= control target key start
LH: loop header
LB: loop body
LE: loop exit
PB: predicated region body
PF: predicated region fallthrough
CT: control target
= control target key end

     0   :  { %13 = vsyncpa [#allocation6], 0  ;;  %s1909_s27 = smov [#allocation5]   ;;  %s1910_s29 = smov 128   ;;  %s2258_s0 = inlined_call_operand.<no memory space> [shape: f32[1], index: 0, kind: input, shape index: {}]   ;;  %s2259_s1 = inlined_call_operand.hbm [shape: bf16[256,256], index: 1, kind: input, shape index: {}]   ;;  %s2260_s2 = inlined_call_operand.vmem [shape: bf16[256,128], index: 2, kind: input, shape index: {}]   ;;  %s2261_s3 = inlined_call_operand.vmem [shape: bf16[128,128], index: 3, kind: input, shape index: {}]   ;;  %s2262_s4 = inlined_call_operand.vmem [shape: f32[1,128], index: 4, kind: input, shape index: {}]   ;;  %s2263_s5 = inlined_call_operand.vmem [shape: bf16[128,128], index: 5, kind: input, shape index: {}]   ;;  %s2264_s6 = inlined_call_operand.vmem [shape: f32[1,128], index: 6, kind: input, shape index: {}]   ;;  %s2265_s7 = inlined_call_operand.vmem [shape: bf16[256,128], index: 7, kind: output, shape index: {}]  }
   0x1   :  { %s18_s26 = sshll.u32 %s2259_s1, 4  ;;  %s20_s28 = sshll.u32 %s1909_s27, 4  ;;  %s19_s26 = int_to_ptr.hbm [resolvable:$true] %s18_s26  ;;  %s21_s28 = int_to_ptr.vmem [resolvable:$true] %s20_s28 }
   0x2   :  { %s1911_s30 = smov 8  }
   0x3   :  { %26 = dma.hbm_to_vmem [thread:$0]  %s19_s26, 4096, %s21_s28, [#allocation6], %s1910_s29, %s1910_s29, %s1911_s30  }
   0x4   :  { %1907 = dma.done.wait [#allocation6], 4096  }
   0x5   :  { %1908 = vsyncadd [#allocation6], 4294963200  ;;  %v1679_v0 = vld [vmem:[%s2260_s2 + $0x38] sm:$0xff]  ;;  %v1678_v2 = vld [vmem:[%s2260_s2 + $0x30] sm:$0xff] }
   0x6   :  { %v1687_v1 = vld [vmem:[%s2260_s2 + $0x78] sm:$0xff]  ;;  %429 = vmatpush.bf16.msra.mxu0 %v1679_v0  ;;  %v1686_v3 = vld [vmem:[%s2260_s2 + $0x70] sm:$0xff]  ;;  %v1677_v4 = vld [vmem:[%s2260_s2 + $0x28] sm:$0xff] }
   0x7   :  { %518 = vmatpush.bf16.msra.mxu1 %v1687_v1  ;;  %v1685_v5 = vld [vmem:[%s2260_s2 + $0x68] sm:$0xff]  ;;  %v1676_v6 = vld [vmem:[%s2260_s2 + $0x20] sm:$0xff]  ;;  %v1675_v8 = vld [vmem:[%s2260_s2 + $0x18] sm:$0xff] }
   0x8   :  { %v1684_v7 = vld [vmem:[%s2260_s2 + $0x60] sm:$0xff]  ;;  %v1683_v9 = vld [vmem:[%s2260_s2 + $0x58] sm:$0xff]  ;;  %v1674_v10 = vld [vmem:[%s2260_s2 + $0x10] sm:$0xff] }
   0x9   :  { %v1682_v11 = vld [vmem:[%s2260_s2 + $0x50] sm:$0xff]  ;;  %v1673_v12 = vld [vmem:[%s2260_s2 + $0x8] sm:$0xff]  ;;  %v1672_v14 = vld [vmem:[%s2260_s2] sm:$0xff] }
   0xa   :  { %430 = vmatpush.bf16.msra.mxu0 %v1678_v2  ;;  %v1681_v13 = vld [vmem:[%s2260_s2 + $0x48] sm:$0xff]  ;;  %v1680_v15 = vld [vmem:[%s2260_s2 + $0x40] sm:$0xff]  ;;  %v1394_v22 = vld [vmem:[#allocation5 + $0x10] sm:$0xf] }
   0xb   :  { %519 = vmatpush.bf16.msra.mxu1 %v1686_v3  ;;  %v1386_v16 = vld [vmem:[#allocation5] sm:$0xf]  ;;  %v1641_v17 = vld [vmem:[#allocation5 + $0x4] sm:$0xf0]  ;;  %v1640_v18 = vld [vmem:[#allocation5 + $0x4] sm:$0xf] }
   0xc   :  { %v1388_v19 = vld [vmem:[#allocation5 + $0x8] sm:$0xf0]  ;;  %v1387_v20 = vor.u32 %v1641_v17, %v1386_v16  ;;  %v1643_v23 = vld [vmem:[#allocation5 + $0x14] sm:$0xf0]  ;;  %v1642_v24 = vld [vmem:[#allocation5 + $0x14] sm:$0xf] }
   0xd   :  { %v1391_v21 = vor.u32 %v1640_v18, %v1388_v19  ;;  %v1396_v25 = vld [vmem:[#allocation5 + $0x18] sm:$0xf0]  ;;  %v1395_v26 = vor.u32 %v1643_v23, %v1394_v22  ;;  %v1402_v28 = vld [vmem:[#allocation5 + $0x20] sm:$0xf]  ;;  %v1645_v29 = vld [vmem:[#allocation5 + $0x24] sm:$0xf0] }
   0xe   :  { %431 = vmatpush.bf16.msra.mxu0 %v1677_v4  ;;  %v1399_v27 = vor.u32 %v1642_v24, %v1396_v25  ;;  %v1644_v30 = vld [vmem:[#allocation5 + $0x24] sm:$0xf]  ;;  %v1404_v31 = vld [vmem:[#allocation5 + $0x28] sm:$0xf0]  ;;  %v1403_v32 = vor.u32 %v1645_v29, %v1402_v28  ;;  %v1410_v34 = vld [vmem:[#allocation5 + $0x30] sm:$0xf] }
   0xf   :  { %520 = vmatpush.bf16.msra.mxu1 %v1685_v5  ;;  %v1407_v33 = vor.u32 %v1644_v30, %v1404_v31  ;;  %v1647_v35 = vld [vmem:[#allocation5 + $0x34] sm:$0xf0]  ;;  %v1646_v36 = vld [vmem:[#allocation5 + $0x34] sm:$0xf]  ;;  %v1412_v37 = vld [vmem:[#allocation5 + $0x38] sm:$0xf0] }
  0x10   :  { %v1411_v38 = vor.u32 %v1647_v35, %v1410_v34  ;;  %v1415_v39 = vor.u32 %v1646_v36, %v1412_v37  ;;  %v1418_v40 = vld [vmem:[#allocation5 + $0x40] sm:$0xf]  ;;  %v1649_v41 = vld [vmem:[#allocation5 + $0x44] sm:$0xf0]  ;;  %v1648_v42 = vld [vmem:[#allocation5 + $0x44] sm:$0xf] }
  0x11   :  { %v1420_v43 = vld [vmem:[#allocation5 + $0x48] sm:$0xf0]  ;;  %v1419_v44 = vor.u32 %v1649_v41, %v1418_v40  ;;  %v1695_v46 = vld [vmem:[%s2261_s3 + $0x38] sm:$0xff]  ;;  %v1426_v47 = vld [vmem:[#allocation5 + $0x50] sm:$0xf] }
  0x12   :  { %432 = vmatpush.bf16.msra.mxu0 %v1676_v6  ;;  %v1423_v45 = vor.u32 %v1648_v42, %v1420_v43  ;;  %989 = vmatpush.bf16.msra.mxu2 %v1695_v46  ;;  %v1651_v48 = vld [vmem:[#allocation5 + $0x54] sm:$0xf0]  ;;  %v1650_v49 = vld [vmem:[#allocation5 + $0x54] sm:$0xf]  ;;  %v1428_v50 = vld [vmem:[#allocation5 + $0x58] sm:$0xf0] }
  0x13   :  { %521 = vmatpush.bf16.msra.mxu1 %v1684_v7  ;;  %v1427_v51 = vor.u32 %v1651_v48, %v1426_v47  ;;  %v1431_v52 = vor.u32 %v1650_v49, %v1428_v50  ;;  %v1694_v53 = vld [vmem:[%s2261_s3 + $0x30] sm:$0xff]  ;;  %v1693_v54 = vld [vmem:[%s2261_s3 + $0x28] sm:$0xff]  ;;  %v1692_v55 = vld [vmem:[%s2261_s3 + $0x20] sm:$0xff] }
  0x14   :  { %v1434_v56 = vld [vmem:[#allocation5 + $0x60] sm:$0xf]  ;;  %v1653_v57 = vld [vmem:[#allocation5 + $0x64] sm:$0xf0]  ;;  %v1652_v58 = vld [vmem:[#allocation5 + $0x64] sm:$0xf] }
  0x15   :  { %v1436_v59 = vld [vmem:[#allocation5 + $0x68] sm:$0xf0]  ;;  %v1691_v60 = vld [vmem:[%s2261_s3 + $0x18] sm:$0xff]  ;;  %v1435_v61 = vor.u32 %v1653_v57, %v1434_v56  ;;  %v1690_v63 = vld [vmem:[%s2261_s3 + $0x10] sm:$0xff] }
  0x16   :  { %433 = vmatpush.bf16.msra.mxu0 %v1675_v8  ;;  %990 = vmatpush.bf16.msra.mxu2 %v1694_v53  ;;  %v1439_v62 = vor.u32 %v1652_v58, %v1436_v59  ;;  %v1689_v0 = vld [vmem:[%s2261_s3 + $0x8] sm:$0xff]  ;;  %v1688_v1 = vld [vmem:[%s2261_s3] sm:$0xff]  ;;  %v1442_v2 = vld [vmem:[#allocation5 + $0x70] sm:$0xf]  ;;  %s708_s3 = sadd.f32 1.0, %s2258_s0 }
  0x17   :  { %522 = vmatpush.bf16.msra.mxu1 %v1683_v9  ;;  %v1655_v3 = vld [vmem:[#allocation5 + $0x74] sm:$0xf0]  ;;  %v1654_v4 = vld [vmem:[#allocation5 + $0x74] sm:$0xf]  ;;  %v1444_v5 = vld [vmem:[#allocation5 + $0x78] sm:$0xf0] }
  0x18   :  { %v1443_v6 = vor.u32 %v1655_v3, %v1442_v2  ;;  %v1447_v7 = vor.u32 %v1654_v4, %v1444_v5  ;;  %v1450_v8 = vld [vmem:[#allocation5 + $0x80] sm:$0xf]  ;;  %v1657_v9 = vld [vmem:[#allocation5 + $0x84] sm:$0xf0]  ;;  %v2033_v19 = vstv %s708_s3  ;;  %v1458_v28 = vld [vmem:[#allocation5 + $0x90] sm:$0xf] }
  0x19   :  { %v1705_v16 = vld [vmem:[%s2260_s2] sm:$0xff]   ;;  %v1659_v29 = vld [vmem:[#allocation5 + $0x94] sm:$0xf0]  ;;  %v1658_v30 = vld [vmem:[#allocation5 + $0x94] sm:$0xf] }
  0x1a   :  { %434 = vmatpush.bf16.msra.mxu0 %v1674_v10  ;;  %991 = vmatpush.bf16.msra.mxu2 %v1693_v54  ;;  %v1656_v10 = vld [vmem:[#allocation5 + $0x84] sm:$0xf]  ;;  %v1706_v17 = vunpack.c.l.bf16 %v1705_v16  ;;  %v1707_v18 = vunpack.c.h.bf16 %v1705_v16  ;;  %v1460_v31 = vld [vmem:[#allocation5 + $0x98] sm:$0xf0]  ;;  %v1848_v37 = vld [vmem:[%s2260_s2 + $0x8] sm:$0xff]  }
  0x1b   :  { %523 = vmatpush.bf16.msra.mxu1 %v1682_v11  ;;  %v1452_v11 = vld [vmem:[#allocation5 + $0x88] sm:$0xf0]  ;;  %v1463_v34 = vor.u32 %v1658_v30, %v1460_v31  ;;  %v1466_v48 = vld [vmem:[#allocation5 + $0xa0] sm:$0xf]  ;;  %v1661_v49 = vld [vmem:[#allocation5 + $0xa4] sm:$0xf0] }
  0x1c   :  { %v775_v22 = vmul.f32 %v1707_v18, %v2033_v19  ;;  %v1660_v50 = vld [vmem:[#allocation5 + $0xa4] sm:$0xf]  ;;  %v1467_v53 = vor.u32 %v1661_v49, %v1466_v48  ;;  %v1849_v57 = vld [vmem:[%s2260_s2 + $0x10] sm:$0xff]   ;;  %v1663_v5 = vld [vmem:[#allocation5 + $0xb4] sm:$0xf0] }
  0x1d   :  { %v1714_v58 = vunpack.c.l.bf16 %v1849_v57  ;;  %v1715_v59 = vunpack.c.h.bf16 %v1849_v57  ;;  %v1474_v4 = vld [vmem:[#allocation5 + $0xb0] sm:$0xf]  ;;  %v1492_v48 = vld [vmem:[#allocation5 + $0xd8] sm:$0xf0] }
  0x1e   :  { %435 = vmatpush.bf16.msra.mxu0 %v1673_v12  ;;  %992 = vmatpush.bf16.msra.mxu2 %v1692_v55  ;;  %v1451_v12 = vor.u32 %v1657_v9, %v1450_v8  ;;  %v1475_v9 = vor.u32 %v1663_v5, %v1474_v4  ;;  %v1500_v4 = vld [vmem:[#allocation5 + $0xe8] sm:$0xf0] }
  0x1f   :  { %524 = vmatpush.bf16.msra.mxu1 %v1681_v13  ;;  %v1455_v13 = vor.u32 %v1656_v10, %v1452_v11 }
  0x22   :  { %436 = vmatpush.bf16.msra.mxu0 %v1672_v14  ;;  %993 = vmatpush.bf16.msra.mxu2 %v1691_v60 }
  0x23   :  { %525 = vmatpush.bf16.msra.mxu1 %v1680_v15 }
  0x25   :  { %437 = vmatmul.bf16.vlgmr.msra.gmra.mxu0 %v1387_v20 }
  0x26   :  { %526 = vmatmul.bf16.vlgmr.msra.gmra.mxu1 %v1391_v21  ;;  %994 = vmatpush.bf16.msra.mxu2 %v1690_v63  ;;  %v774_v21 = vmul.f32 %v1706_v17, %v2033_v19 }
  0x2a   :  { %995 = vmatpush.bf16.msra.mxu2 %v1689_v0 }
  0x2e   :  { %996 = vmatpush.bf16.msra.mxu2 %v1688_v1 }
  0x35   :  { %442 = vmatmul.bf16.gmra.mxu0 %v1395_v26 }
  0x36   :  { %531 = vmatmul.bf16.gmra.mxu1 %v1399_v27 }
  0x45   :  { %447 = vmatmul.bf16.gmra.mxu0 %v1403_v32 }
  0x46   :  { %536 = vmatmul.bf16.gmra.mxu1 %v1407_v33  ;;  %v1459_v33 = vor.u32 %v1659_v29, %v1458_v28  ;;  %v1484_v28 = vld [vmem:[#allocation5 + $0xc8] sm:$0xf0] }
  0x55   :  { %452 = vmatmul.bf16.gmra.mxu0 %v1411_v38  ;;  %v1710_v38 = vunpack.c.l.bf16 %v1848_v37 }
  0x56   :  { %541 = vmatmul.bf16.gmra.mxu1 %v1415_v39  ;;  %v1711_v39 = vunpack.c.h.bf16 %v1848_v37 }
  0x57   :  { %v776_v41 = vmul.f32 %v1710_v38, %v2033_v19 }
  0x58   :  { %v777_v42 = vmul.f32 %v1711_v39, %v2033_v19 }
  0x65   :  { %457 = vmatmul.bf16.gmra.mxu0 %v1419_v44 }
  0x66   :  { %546 = vmatmul.bf16.gmra.mxu1 %v1423_v45 }
  0x75   :  { %462 = vmatmul.bf16.gmra.mxu0 %v1427_v51  ;;  %v1468_v51 = vld [vmem:[#allocation5 + $0xa8] sm:$0xf0] }
  0x76   :  { %551 = vmatmul.bf16.gmra.mxu1 %v1431_v52  ;;  %v1471_v54 = vor.u32 %v1660_v50, %v1468_v51 }
  0x85   :  { %467 = vmatmul.bf16.gmra.mxu0 %v1435_v61  ;;  %v778_v61 = vmul.f32 %v1714_v58, %v2033_v19 }
  0x86   :  { %556 = vmatmul.bf16.gmra.mxu1 %v1439_v62  ;;  %v779_v62 = vmul.f32 %v1715_v59, %v2033_v19 }
  0x95   :  { %472 = vmatmul.bf16.gmra.mxu0 %v1443_v6  ;;  %v1662_v6 = vld [vmem:[#allocation5 + $0xb4] sm:$0xf] }
  0x96   :  { %561 = vmatmul.bf16.gmra.mxu1 %v1447_v7  ;;  %v1476_v7 = vld [vmem:[#allocation5 + $0xb8] sm:$0xf0] }
  0x97   :  { %v1479_v10 = vor.u32 %v1662_v6, %v1476_v7 }
  0xa2   :  { %v438_v14 = vpop.f32.mrf.mxu0 }
  0xa3   :  { %v527_v15 = vpop.f32.mrf.mxu1 }
  0xa4   :  { %v528_v20 = vadd.f32 %v527_v15, %v438_v14 }
  0xa5   :  { %477 = vmatmul.bf16.gmra.mxu0 %v1451_v12 }
  0xa6   :  { %566 = vmatmul.bf16.gmra.mxu1 %v1455_v13  ;;  %v806_v26 = vadd.f32 %v774_v21, %v528_v20  ;;  %v1850_v13 = vld [vmem:[%s2260_s2 + $0x18] sm:$0xff]  }
  0xa7   :  { %v1718_v14 = vunpack.c.l.bf16 %v1850_v13  ;;  %v1719_v15 = vunpack.c.h.bf16 %v1850_v13 }
  0xa9   :  { %v780_v17 = vmul.f32 %v1718_v14, %v2033_v19  ;;  %v781_v18 = vmul.f32 %v1719_v15, %v2033_v19  ;;  %v1702_v14 = vld [vmem:[%s2263_s5 + $0x30] sm:$0xff] }
  0xaa   :  { %v440_v23 = vpop.f32.mrf.mxu0 }
  0xab   :  { %v529_v24 = vpop.f32.mrf.mxu1 }
  0xac   :  { %v530_v25 = vadd.f32 %v529_v24, %v440_v23 }
  0xae   :  { %v807_v27 = vadd.f32 %v775_v22, %v530_v25  ;;  %v1482_v25 = vld [vmem:[#allocation5 + $0xc0] sm:$0xf] }
  0xb0   :  { %v905_v32 = vpack.c.bf16 %v807_v27, %v806_v26  ;;  %v1665_v26 = vld [vmem:[#allocation5 + $0xc4] sm:$0xf0]  ;;  %v1664_v27 = vld [vmem:[#allocation5 + $0xc4] sm:$0xf] }
  0xb1   :  { %v1483_v30 = vor.u32 %v1665_v26, %v1482_v25  ;;  %v1487_v31 = vor.u32 %v1664_v27, %v1484_v28  ;;  %v1506_v25 = vld [vmem:[#allocation5 + $0xf0] sm:$0xf]  ;;  %v1700_v26 = vld [vmem:[%s2263_s5 + $0x20] sm:$0xff]  ;;  %v1671_v27 = vld [vmem:[#allocation5 + $0xf4] sm:$0xf0] }
  0xb2   :  { %997 = vmatmul.bf16.vlgmr.msra.gmra.mxu2 %v905_v32  ;;  %v443_v35 = vpop.f32.mrf.mxu0  ;;  %v1670_v28 = vld [vmem:[#allocation5 + $0xf4] sm:$0xf] }
  0xb3   :  { %v532_v36 = vpop.f32.mrf.mxu1 }
  0xb4   :  { %v533_v40 = vadd.f32 %v532_v36, %v443_v35 }
  0xb5   :  { %482 = vmatmul.bf16.gmra.mxu0 %v1459_v33 }
  0xb6   :  { %571 = vmatmul.bf16.gmra.mxu1 %v1463_v34  ;;  %v808_v46 = vadd.f32 %v776_v41, %v533_v40  ;;  %v1851_v34 = vld [vmem:[%s2260_s2 + $0x20] sm:$0xff]  }
  0xb7   :  { %v1722_v35 = vunpack.c.l.bf16 %v1851_v34  ;;  %v1723_v36 = vunpack.c.h.bf16 %v1851_v34 }
  0xb9   :  { %v782_v38 = vmul.f32 %v1722_v35, %v2033_v19  ;;  %v783_v39 = vmul.f32 %v1723_v36, %v2033_v19  ;;  %v1854_v35 = vld [vmem:[%s2260_s2 + $0x38] sm:$0xff]  }
  0xba   :  { %v445_v43 = vpop.f32.mrf.mxu0  ;;  %v1699_v36 = vld [vmem:[%s2263_s5 + $0x18] sm:$0xff] }
  0xbb   :  { %v534_v44 = vpop.f32.mrf.mxu1 }
  0xbc   :  { %v535_v45 = vadd.f32 %v534_v44, %v445_v43 }
  0xbe   :  { %v809_v47 = vadd.f32 %v777_v42, %v535_v45  ;;  %v1490_v45 = vld [vmem:[#allocation5 + $0xd0] sm:$0xf] }
  0xc0   :  { %v906_v52 = vpack.c.bf16 %v809_v47, %v808_v46  ;;  %v1667_v46 = vld [vmem:[#allocation5 + $0xd4] sm:$0xf0]  ;;  %v1666_v47 = vld [vmem:[#allocation5 + $0xd4] sm:$0xf] }
  0xc1   :  { %v1491_v50 = vor.u32 %v1667_v46, %v1490_v45  ;;  %v1495_v51 = vor.u32 %v1666_v47, %v1492_v48  ;;  %v1697_v45 = vld [vmem:[%s2263_s5 + $0x8] sm:$0xff] }
  0xc2   :  { %1002 = vmatmul.bf16.gmra.mxu2 %v906_v52  ;;  %v448_v55 = vpop.f32.mrf.mxu0 }
  0xc3   :  { %v537_v56 = vpop.f32.mrf.mxu1 }
  0xc4   :  { %v538_v60 = vadd.f32 %v537_v56, %v448_v55 }
  0xc5   :  { %487 = vmatmul.bf16.gmra.mxu0 %v1467_v53 }
  0xc6   :  { %576 = vmatmul.bf16.gmra.mxu1 %v1471_v54  ;;  %v810_v2 = vadd.f32 %v778_v61, %v538_v60  ;;  %v1852_v54 = vld [vmem:[%s2260_s2 + $0x28] sm:$0xff]  }
  0xc7   :  { %v1726_v55 = vunpack.c.l.bf16 %v1852_v54  ;;  %v1727_v56 = vunpack.c.h.bf16 %v1852_v54 }
  0xc9   :  { %v784_v58 = vmul.f32 %v1726_v55, %v2033_v19  ;;  %v785_v59 = vmul.f32 %v1727_v56, %v2033_v19 }
  0xca   :  { %v450_v63 = vpop.f32.mrf.mxu0 }
  0xcb   :  { %v539_v0 = vpop.f32.mrf.mxu1 }
  0xcc   :  { %v540_v1 = vadd.f32 %v539_v0, %v450_v63 }
  0xce   :  { %v811_v3 = vadd.f32 %v779_v62, %v540_v1  ;;  %v1498_v1 = vld [vmem:[#allocation5 + $0xe0] sm:$0xf] }
  0xd0   :  { %v907_v8 = vpack.c.bf16 %v811_v3, %v810_v2  ;;  %v1669_v2 = vld [vmem:[#allocation5 + $0xe4] sm:$0xf0]  ;;  %v1668_v3 = vld [vmem:[#allocation5 + $0xe4] sm:$0xf] }
  0xd1   :  { %v1499_v6 = vor.u32 %v1669_v2, %v1498_v1  ;;  %v1503_v7 = vor.u32 %v1668_v3, %v1500_v4  ;;  %v1856_v3 = vld [vmem:[%s2260_s2 + $0x48] sm:$0xff]  }
  0xd2   :  { %1007 = vmatmul.bf16.gmra.mxu2 %v907_v8  ;;  %v453_v11 = vpop.f32.mrf.mxu0 }
  0xd3   :  { %v542_v12 = vpop.f32.mrf.mxu1 }
  0xd4   :  { %v543_v16 = vadd.f32 %v542_v12, %v453_v11  ;;  %v1703_v11 = vld [vmem:[%s2263_s5 + $0x38] sm:$0xff] }
  0xd5   :  { %492 = vmatmul.bf16.gmra.mxu0 %v1475_v9  ;;  %1194 = vmatpush.bf16.msra.mxu3 %v1703_v11 }
  0xd6   :  { %581 = vmatmul.bf16.gmra.mxu1 %v1479_v10  ;;  %v812_v23 = vadd.f32 %v780_v17, %v543_v16  ;;  %v1853_v10 = vld [vmem:[%s2260_s2 + $0x30] sm:$0xff]  }
  0xd7   :  { %v1730_v12 = vunpack.c.l.bf16 %v1853_v10  ;;  %v1731_v13 = vunpack.c.h.bf16 %v1853_v10 }
  0xd9   :  { %1195 = vmatpush.bf16.msra.mxu3 %v1702_v14  ;;  %v786_v16 = vmul.f32 %v1730_v12, %v2033_v19  ;;  %v787_v17 = vmul.f32 %v1731_v13, %v2033_v19 }
  0xda   :  { %v455_v20 = vpop.f32.mrf.mxu0 }
  0xdb   :  { %v544_v21 = vpop.f32.mrf.mxu1 }
  0xdc   :  { %v545_v22 = vadd.f32 %v544_v21, %v455_v20  ;;  %v1701_v21 = vld [vmem:[%s2263_s5 + $0x28] sm:$0xff] }
  0xdd   :  { %1196 = vmatpush.bf16.msra.mxu3 %v1701_v21 }
  0xde   :  { %v813_v24 = vadd.f32 %v781_v18, %v545_v22 }
  0xe0   :  { %v908_v29 = vpack.c.bf16 %v813_v24, %v812_v23 }
  0xe1   :  { %1197 = vmatpush.bf16.msra.mxu3 %v1700_v26  ;;  %v1857_v26 = vld [vmem:[%s2260_s2 + $0x50] sm:$0xff]  }
  0xe2   :  { %1012 = vmatmul.bf16.gmra.mxu2 %v908_v29  ;;  %v458_v32 = vpop.f32.mrf.mxu0  ;;  %v1508_v29 = vld [vmem:[#allocation5 + $0xf8] sm:$0xf0] }
  0xe3   :  { %v547_v33 = vpop.f32.mrf.mxu1 }
  0xe4   :  { %v548_v37 = vadd.f32 %v547_v33, %v458_v32  ;;  %v1511_v32 = vor.u32 %v1670_v28, %v1508_v29  ;;  %v1746_v28 = vunpack.c.l.bf16 %v1857_v26  ;;  %v1747_v29 = vunpack.c.h.bf16 %v1857_v26 }
  0xe5   :  { %497 = vmatmul.bf16.gmra.mxu0 %v1483_v30  ;;  %1198 = vmatpush.bf16.msra.mxu3 %v1699_v36 }
  0xe6   :  { %586 = vmatmul.bf16.gmra.mxu1 %v1487_v31  ;;  %v814_v43 = vadd.f32 %v782_v38, %v548_v37  ;;  %v1507_v31 = vor.u32 %v1671_v27, %v1506_v25  ;;  %v1734_v37 = vunpack.c.l.bf16 %v1854_v35  ;;  %v1735_v38 = vunpack.c.h.bf16 %v1854_v35 }
  0xea   :  { %v460_v40 = vpop.f32.mrf.mxu0 }
  0xeb   :  { %v549_v41 = vpop.f32.mrf.mxu1 }
  0xec   :  { %v550_v42 = vadd.f32 %v549_v41, %v460_v40  ;;  %v788_v41 = vmul.f32 %v1734_v37, %v2033_v19 }
  0xee   :  { %v815_v44 = vadd.f32 %v783_v39, %v550_v42  ;;  %v1698_v39 = vld [vmem:[%s2263_s5 + $0x10] sm:$0xff]  ;;  %v789_v42 = vmul.f32 %v1735_v38, %v2033_v19 }
  0xef   :  { %1199 = vmatpush.bf16.msra.mxu3 %v1698_v39 }
  0xf0   :  { %v909_v49 = vpack.c.bf16 %v815_v44, %v814_v43 }
  0xf2   :  { %1017 = vmatmul.bf16.gmra.mxu2 %v909_v49  ;;  %v463_v52 = vpop.f32.mrf.mxu0  ;;  %v1696_v49 = vld [vmem:[%s2263_s5] sm:$0xff] }
  0xf3   :  { %v552_v53 = vpop.f32.mrf.mxu1  ;;  %1200 = vmatpush.bf16.msra.mxu3 %v1697_v45 }
  0xf4   :  { %v553_v57 = vadd.f32 %v552_v53, %v463_v52  ;;  %v1855_v53 = vld [vmem:[%s2260_s2 + $0x40] sm:$0xff]  }
  0xf5   :  { %502 = vmatmul.bf16.gmra.mxu0 %v1491_v50  ;;  %v1738_v54 = vunpack.c.l.bf16 %v1855_v53  ;;  %v1739_v55 = vunpack.c.h.bf16 %v1855_v53 }
  0xf6   :  { %591 = vmatmul.bf16.gmra.mxu1 %v1495_v51  ;;  %v816_v63 = vadd.f32 %v784_v58, %v553_v57 }
  0xf7   :  { %1201 = vmatpush.bf16.msra.mxu3 %v1696_v49  ;;  %v790_v57 = vmul.f32 %v1738_v54, %v2033_v19  ;;  %v791_v58 = vmul.f32 %v1739_v55, %v2033_v19 }
  0xfa   :  { %v465_v60 = vpop.f32.mrf.mxu0 }
  0xfb   :  { %v554_v61 = vpop.f32.mrf.mxu1 }
  0xfc   :  { %v555_v62 = vadd.f32 %v554_v61, %v465_v60 }
  0xfe   :  { %v817_v0 = vadd.f32 %v785_v59, %v555_v62 }
 0x100   :  { %v910_v5 = vpack.c.bf16 %v817_v0, %v816_v63 }
 0x102   :  { %1022 = vmatmul.bf16.gmra.mxu2 %v910_v5  ;;  %v468_v8 = vpop.f32.mrf.mxu0  ;;  %v1742_v5 = vunpack.c.l.bf16 %v1856_v3 }
 0x103   :  { %v557_v9 = vpop.f32.mrf.mxu1 }
 0x104   :  { %v558_v15 = vadd.f32 %v557_v9, %v468_v8  ;;  %v792_v9 = vmul.f32 %v1742_v5, %v2033_v19 }
 0x105   :  { %507 = vmatmul.bf16.gmra.mxu0 %v1499_v6  ;;  %v1743_v6 = vunpack.c.h.bf16 %v1856_v3 }
 0x106   :  { %596 = vmatmul.bf16.gmra.mxu1 %v1503_v7  ;;  %v818_v23 = vadd.f32 %v786_v16, %v558_v15  ;;  %v2107_v7 = vld [vmem:[%s2262_s4] ss:$0 sm:$0xff] }
 0x107   :  { %v793_v10 = vmul.f32 %v1743_v6, %v2033_v19 }
 0x10a   :  { %v470_v18 = vpop.f32.mrf.mxu0 }
 0x10b   :  { %v559_v20 = vpop.f32.mrf.mxu1 }
 0x10c   :  { %v560_v22 = vadd.f32 %v559_v20, %v470_v18 }
 0x10e   :  { %v819_v24 = vadd.f32 %v787_v17, %v560_v22 }
 0x110   :  { %v911_v30 = vpack.c.bf16 %v819_v24, %v818_v23 }
 0x112   :  { %1027 = vmatmul.bf16.gmra.mxu2 %v911_v30  ;;  %v473_v33 = vpop.f32.mrf.mxu0 }
 0x113   :  { %v562_v34 = vpop.f32.mrf.mxu1 }
 0x114   :  { %v563_v40 = vadd.f32 %v562_v34, %v473_v33 }
 0x115   :  { %512 = vmatmul.bf16.gmra.mxu0 %v1507_v31  ;;  %v794_v31 = vmul.f32 %v1746_v28, %v2033_v19 }
 0x116   :  { %601 = vmatmul.bf16.gmra.mxu1 %v1511_v32  ;;  %v820_v47 = vadd.f32 %v788_v41, %v563_v40  ;;  %v795_v32 = vmul.f32 %v1747_v29, %v2033_v19 }
 0x11a   :  { %v475_v43 = vpop.f32.mrf.mxu0 }
 0x11b   :  { %v564_v44 = vpop.f32.mrf.mxu1 }
 0x11c   :  { %v565_v46 = vadd.f32 %v564_v44, %v475_v43 }
 0x11e   :  { %v821_v48 = vadd.f32 %v789_v42, %v565_v46 }
 0x120   :  { %v912_v50 = vpack.c.bf16 %v821_v48, %v820_v47  ;;  %v1858_v47 = vld [vmem:[%s2260_s2 + $0x58] sm:$0xff]  }
 0x121   :  { %v1750_v49 = vunpack.c.l.bf16 %v1858_v47 }
 0x122   :  { %1032 = vmatmul.bf16.gmra.mxu2 %v912_v50  ;;  %v478_v51 = vpop.f32.mrf.mxu0  ;;  %v1751_v50 = vunpack.c.h.bf16 %v1858_v47 }
 0x123   :  { %v567_v52 = vpop.f32.mrf.mxu1 }
 0x124   :  { %v568_v56 = vadd.f32 %v567_v52, %v478_v51  ;;  %v796_v52 = vmul.f32 %v1750_v49, %v2033_v19  ;;  %v797_v53 = vmul.f32 %v1751_v50, %v2033_v19 }
 0x126   :  { %v822_v62 = vadd.f32 %v790_v57, %v568_v56 }
 0x12a   :  { %v480_v59 = vpop.f32.mrf.mxu0 }
 0x12b   :  { %v569_v60 = vpop.f32.mrf.mxu1 }
 0x12c   :  { %v570_v61 = vadd.f32 %v569_v60, %v480_v59 }
 0x12e   :  { %v823_v63 = vadd.f32 %v791_v58, %v570_v61 }
 0x130   :  { %v913_v0 = vpack.c.bf16 %v823_v63, %v822_v62 }
 0x132   :  { %1037 = vmatmul.bf16.gmra.mxu2 %v913_v0  ;;  %v483_v1 = vpop.f32.mrf.mxu0 }
 0x133   :  { %v572_v2 = vpop.f32.mrf.mxu1 }
 0x134   :  { %v573_v8 = vadd.f32 %v572_v2, %v483_v1 }
 0x135   :  { %v998_v4 = vpop.f32.mrf.mxu2 }
 0x136   :  { %v999_v13 = vadd.f32 %v2107_v7, %v998_v4  ;;  %v824_v16 = vadd.f32 %v792_v9, %v573_v8  ;;  %v1859_v4 = vld [vmem:[%s2260_s2 + $0x60] sm:$0xff]  }
 0x137   :  { %v1754_v6 = vunpack.c.l.bf16 %v1859_v4  ;;  %v1755_v8 = vunpack.c.h.bf16 %v1859_v4 }
 0x138   :  { %v1078_v20 = vmax.f32 %v999_v13, 0.0 }
 0x13a   :  { %v485_v11 = vpop.f32.mrf.mxu0 }
 0x13b   :  { %v574_v12 = vpop.f32.mrf.mxu1 }
 0x13c   :  { %v575_v14 = vadd.f32 %v574_v12, %v485_v11  ;;  %v799_v11 = vmul.f32 %v1755_v8, %v2033_v19 }
 0x13d   :  { %v1000_v15 = vpop.f32.mrf.mxu2 }
 0x13e   :  { %v825_v17 = vadd.f32 %v793_v10, %v575_v14  ;;  %v1001_v18 = vadd.f32 %v2107_v7, %v1000_v15  ;;  %v798_v10 = vmul.f32 %v1754_v6, %v2033_v19 }
 0x140   :  { %v1079_v21 = vmax.f32 %v1001_v18, 0.0  ;;  %v914_v22 = vpack.c.bf16 %v825_v17, %v824_v16 }
 0x142   :  { %1042 = vmatmul.bf16.gmra.mxu2 %v914_v22  ;;  %v1110_v23 = vpack.c.bf16 %v1079_v21, %v1078_v20  ;;  %v488_v24 = vpop.f32.mrf.mxu0 }
 0x143   :  { %v577_v25 = vpop.f32.mrf.mxu1 }
 0x144   :  { %1202 = vmatmul.bf16.vlgmr.msra.gmra.mxu3 %v1110_v23  ;;  %v578_v30 = vadd.f32 %v577_v25, %v488_v24 }
 0x145   :  { %v1003_v27 = vpop.f32.mrf.mxu2 }
 0x146   :  { %v1004_v35 = vadd.f32 %v2107_v7, %v1003_v27  ;;  %v826_v38 = vadd.f32 %v794_v31, %v578_v30  ;;  %v1860_v27 = vld [vmem:[%s2260_s2 + $0x68] sm:$0xff]  }
 0x147   :  { %v1758_v29 = vunpack.c.l.bf16 %v1860_v27  ;;  %v1759_v30 = vunpack.c.h.bf16 %v1860_v27 }
 0x148   :  { %v1080_v41 = vmax.f32 %v1004_v35, 0.0 }
 0x14a   :  { %v490_v33 = vpop.f32.mrf.mxu0 }
 0x14b   :  { %v579_v34 = vpop.f32.mrf.mxu1 }
 0x14c   :  { %v580_v36 = vadd.f32 %v579_v34, %v490_v33  ;;  %v801_v33 = vmul.f32 %v1759_v30, %v2033_v19 }
 0x14d   :  { %v1005_v37 = vpop.f32.mrf.mxu2 }
 0x14e   :  { %v827_v39 = vadd.f32 %v795_v32, %v580_v36  ;;  %v1006_v40 = vadd.f32 %v2107_v7, %v1005_v37  ;;  %v800_v32 = vmul.f32 %v1758_v29, %v2033_v19 }
 0x150   :  { %v1081_v42 = vmax.f32 %v1006_v40, 0.0  ;;  %v915_v43 = vpack.c.bf16 %v827_v39, %v826_v38 }
 0x152   :  { %1047 = vmatmul.bf16.gmra.mxu2 %v915_v43  ;;  %v1111_v44 = vpack.c.bf16 %v1081_v42, %v1080_v41  ;;  %v493_v45 = vpop.f32.mrf.mxu0 }
 0x153   :  { %v582_v46 = vpop.f32.mrf.mxu1 }
 0x154   :  { %1207 = vmatmul.bf16.gmra.mxu3 %v1111_v44  ;;  %v583_v51 = vadd.f32 %v582_v46, %v493_v45 }
 0x155   :  { %v1008_v48 = vpop.f32.mrf.mxu2 }
 0x156   :  { %v1009_v56 = vadd.f32 %v2107_v7, %v1008_v48  ;;  %v828_v59 = vadd.f32 %v796_v52, %v583_v51  ;;  %v1861_v48 = vld [vmem:[%s2260_s2 + $0x70] sm:$0xff]  }
 0x157   :  { %v1762_v50 = vunpack.c.l.bf16 %v1861_v48  ;;  %v1763_v51 = vunpack.c.h.bf16 %v1861_v48 }
 0x158   :  { %v1082_v62 = vmax.f32 %v1009_v56, 0.0 }
 0x15a   :  { %v495_v54 = vpop.f32.mrf.mxu0 }
 0x15b   :  { %v584_v55 = vpop.f32.mrf.mxu1 }
 0x15c   :  { %v585_v57 = vadd.f32 %v584_v55, %v495_v54  ;;  %v803_v54 = vmul.f32 %v1763_v51, %v2033_v19 }
 0x15d   :  { %v1010_v58 = vpop.f32.mrf.mxu2 }
 0x15e   :  { %v829_v60 = vadd.f32 %v797_v53, %v585_v57  ;;  %v1011_v61 = vadd.f32 %v2107_v7, %v1010_v58  ;;  %v802_v53 = vmul.f32 %v1762_v50, %v2033_v19 }
 0x160   :  { %v1083_v63 = vmax.f32 %v1011_v61, 0.0  ;;  %v916_v0 = vpack.c.bf16 %v829_v60, %v828_v59 }
 0x162   :  { %1052 = vmatmul.bf16.gmra.mxu2 %v916_v0  ;;  %v1112_v1 = vpack.c.bf16 %v1083_v63, %v1082_v62  ;;  %v498_v2 = vpop.f32.mrf.mxu0 }
 0x163   :  { %v587_v3 = vpop.f32.mrf.mxu1 }
 0x164   :  { %1212 = vmatmul.bf16.gmra.mxu3 %v1112_v1  ;;  %v588_v9 = vadd.f32 %v587_v3, %v498_v2 }
 0x165   :  { %v1013_v5 = vpop.f32.mrf.mxu2 }
 0x166   :  { %v1014_v14 = vadd.f32 %v2107_v7, %v1013_v5  ;;  %v830_v17 = vadd.f32 %v798_v10, %v588_v9  ;;  %v1862_v5 = vld [vmem:[%s2260_s2 + $0x78] sm:$0xff]  }
 0x167   :  { %v1766_v8 = vunpack.c.l.bf16 %v1862_v5  ;;  %v1767_v9 = vunpack.c.h.bf16 %v1862_v5 }
 0x168   :  { %v1084_v21 = vmax.f32 %v1014_v14, 0.0 }
 0x16a   :  { %v500_v12 = vpop.f32.mrf.mxu0 }
 0x16b   :  { %v589_v13 = vpop.f32.mrf.mxu1 }
 0x16c   :  { %v590_v15 = vadd.f32 %v589_v13, %v500_v12  ;;  %v805_v12 = vmul.f32 %v1767_v9, %v2033_v19 }
 0x16d   :  { %v1015_v16 = vpop.f32.mrf.mxu2 }
 0x16e   :  { %v831_v18 = vadd.f32 %v799_v11, %v590_v15  ;;  %v1016_v20 = vadd.f32 %v2107_v7, %v1015_v16  ;;  %v804_v11 = vmul.f32 %v1766_v8, %v2033_v19 }
 0x170   :  { %v1085_v22 = vmax.f32 %v1016_v20, 0.0  ;;  %v917_v23 = vpack.c.bf16 %v831_v18, %v830_v17 }
 0x172   :  { %1057 = vmatmul.bf16.gmra.mxu2 %v917_v23  ;;  %v1113_v24 = vpack.c.bf16 %v1085_v22, %v1084_v21  ;;  %v503_v25 = vpop.f32.mrf.mxu0 }
 0x173   :  { %v592_v26 = vpop.f32.mrf.mxu1 }
 0x174   :  { %1217 = vmatmul.bf16.gmra.mxu3 %v1113_v24  ;;  %v593_v31 = vadd.f32 %v592_v26, %v503_v25 }
 0x175   :  { %v1018_v28 = vpop.f32.mrf.mxu2 }
 0x176   :  { %v1019_v36 = vadd.f32 %v2107_v7, %v1018_v28  ;;  %v832_v39 = vadd.f32 %v800_v32, %v593_v31 }
 0x178   :  { %v1086_v42 = vmax.f32 %v1019_v36, 0.0 }
 0x17a   :  { %v505_v34 = vpop.f32.mrf.mxu0 }
 0x17b   :  { %v594_v35 = vpop.f32.mrf.mxu1 }
 0x17c   :  { %v595_v37 = vadd.f32 %v594_v35, %v505_v34 }
 0x17d   :  { %v1020_v38 = vpop.f32.mrf.mxu2 }
 0x17e   :  { %v833_v40 = vadd.f32 %v801_v33, %v595_v37  ;;  %v1021_v41 = vadd.f32 %v2107_v7, %v1020_v38 }
 0x180   :  { %v1087_v43 = vmax.f32 %v1021_v41, 0.0  ;;  %v918_v44 = vpack.c.bf16 %v833_v40, %v832_v39  ;;  %v2162_v41 = vld [vmem:[%s2264_s6] ss:$0 sm:$0xff] }
 0x182   :  { %1062 = vmatmul.bf16.gmra.mxu2 %v918_v44  ;;  %v1114_v45 = vpack.c.bf16 %v1087_v43, %v1086_v42  ;;  %v508_v46 = vpop.f32.mrf.mxu0 }
 0x183   :  { %v597_v47 = vpop.f32.mrf.mxu1 }
 0x184   :  { %1222 = vmatmul.bf16.gmra.mxu3 %v1114_v45  ;;  %v598_v52 = vadd.f32 %v597_v47, %v508_v46 }
 0x185   :  { %v1023_v49 = vpop.f32.mrf.mxu2 }
 0x186   :  { %v1024_v57 = vadd.f32 %v2107_v7, %v1023_v49  ;;  %v834_v60 = vadd.f32 %v802_v53, %v598_v52 }
 0x188   :  { %v1088_v63 = vmax.f32 %v1024_v57, 0.0 }
 0x18a   :  { %v510_v55 = vpop.f32.mrf.mxu0 }
 0x18b   :  { %v599_v56 = vpop.f32.mrf.mxu1 }
 0x18c   :  { %v600_v58 = vadd.f32 %v599_v56, %v510_v55 }
 0x18d   :  { %v1025_v59 = vpop.f32.mrf.mxu2 }
 0x18e   :  { %v835_v61 = vadd.f32 %v803_v54, %v600_v58  ;;  %v1026_v62 = vadd.f32 %v2107_v7, %v1025_v59 }
 0x190   :  { %v1089_v0 = vmax.f32 %v1026_v62, 0.0  ;;  %v919_v1 = vpack.c.bf16 %v835_v61, %v834_v60 }
 0x192   :  { %1067 = vmatmul.bf16.gmra.mxu2 %v919_v1  ;;  %v1115_v2 = vpack.c.bf16 %v1089_v0, %v1088_v63  ;;  %v513_v3 = vpop.f32.mrf.mxu0 }
 0x193   :  { %v602_v4 = vpop.f32.mrf.mxu1 }
 0x194   :  { %1227 = vmatmul.bf16.gmra.mxu3 %v1115_v2  ;;  %v603_v10 = vadd.f32 %v602_v4, %v513_v3 }
 0x195   :  { %v1028_v6 = vpop.f32.mrf.mxu2 }
 0x196   :  { %v1029_v15 = vadd.f32 %v2107_v7, %v1028_v6  ;;  %v836_v18 = vadd.f32 %v804_v11, %v603_v10 }
 0x198   :  { %v1090_v22 = vmax.f32 %v1029_v15, 0.0 }
 0x19a   :  { %v515_v13 = vpop.f32.mrf.mxu0 }
 0x19b   :  { %v604_v14 = vpop.f32.mrf.mxu1 }
 0x19c   :  { %v605_v16 = vadd.f32 %v604_v14, %v515_v13 }
 0x19d   :  { %v1030_v17 = vpop.f32.mrf.mxu2 }
 0x19e   :  { %v837_v20 = vadd.f32 %v805_v12, %v605_v16  ;;  %v1031_v21 = vadd.f32 %v2107_v7, %v1030_v17 }
 0x1a0   :  { %v1091_v23 = vmax.f32 %v1031_v21, 0.0  ;;  %v920_v24 = vpack.c.bf16 %v837_v20, %v836_v18 }
 0x1a2   :  { %1072 = vmatmul.bf16.gmra.mxu2 %v920_v24  ;;  %v1116_v25 = vpack.c.bf16 %v1091_v23, %v1090_v22 }
 0x1a4   :  { %1232 = vmatmul.bf16.gmra.mxu3 %v1116_v25 }
 0x1a5   :  { %v1033_v26 = vpop.f32.mrf.mxu2 }
 0x1a6   :  { %v1034_v27 = vadd.f32 %v2107_v7, %v1033_v26 }
 0x1a8   :  { %v1092_v29 = vmax.f32 %v1034_v27, 0.0 }
 0x1ad   :  { %v1035_v19 = vpop.f32.mrf.mxu2 }
 0x1ae   :  { %v1036_v28 = vadd.f32 %v2107_v7, %v1035_v19 }
 0x1b0   :  { %v1093_v30 = vmax.f32 %v1036_v28, 0.0 }
 0x1b2   :  { %v1117_v31 = vpack.c.bf16 %v1093_v30, %v1092_v29 }
 0x1b4   :  { %1237 = vmatmul.bf16.gmra.mxu3 %v1117_v31 }
 0x1b5   :  { %v1038_v32 = vpop.f32.mrf.mxu2 }
 0x1b6   :  { %v1039_v33 = vadd.f32 %v2107_v7, %v1038_v32 }
 0x1b8   :  { %v1094_v36 = vmax.f32 %v1039_v33, 0.0 }
 0x1bd   :  { %v1040_v34 = vpop.f32.mrf.mxu2 }
 0x1be   :  { %v1041_v35 = vadd.f32 %v2107_v7, %v1040_v34 }
 0x1c0   :  { %v1095_v37 = vmax.f32 %v1041_v35, 0.0 }
 0x1c2   :  { %v1118_v38 = vpack.c.bf16 %v1095_v37, %v1094_v36 }
 0x1c4   :  { %1242 = vmatmul.bf16.gmra.mxu3 %v1118_v38 }
 0x1c5   :  { %v1043_v39 = vpop.f32.mrf.mxu2 }
 0x1c6   :  { %v1044_v42 = vadd.f32 %v2107_v7, %v1043_v39 }
 0x1c7   :  { %v1203_v40 = vpop.f32.mrf.mxu3 }
 0x1c8   :  { %v1204_v44 = vadd.f32 %v2162_v41, %v1203_v40  ;;  %v1096_v47 = vmax.f32 %v1044_v42, 0.0 }
 0x1ca   :  { %v1283_v50 = vmax.f32 %v1204_v44, 0.0 }
 0x1cd   :  { %v1045_v43 = vpop.f32.mrf.mxu2 }
 0x1ce   :  { %v1046_v45 = vadd.f32 %v2107_v7, %v1045_v43 }
 0x1cf   :  { %v1205_v46 = vpop.f32.mrf.mxu3 }
 0x1d0   :  { %v1097_v48 = vmax.f32 %v1046_v45, 0.0  ;;  %v1206_v49 = vadd.f32 %v2162_v41, %v1205_v46 }
 0x1d2   :  { %v1284_v51 = vmax.f32 %v1206_v49, 0.0  ;;  %v1119_v52 = vpack.c.bf16 %v1097_v48, %v1096_v47 }
 0x1d4   :  { %v1771_v53 = vpack.c.bf16 %v1284_v51, %v1283_v50  ;;  %1247 = vmatmul.bf16.gmra.mxu3 %v1119_v52 }
 0x1d5   :  { %v1048_v54 = vpop.f32.mrf.mxu2 }
 0x1d6   :  { %1772 = vst [vmem:[%s2265_s7] sm:$0xff] %v1771_v53   ;;  %v1049_v56 = vadd.f32 %v2107_v7, %v1048_v54 }
 0x1d7   :  { %v1208_v55 = vpop.f32.mrf.mxu3 }
 0x1d8   :  { %v1209_v58 = vadd.f32 %v2162_v41, %v1208_v55  ;;  %v1098_v61 = vmax.f32 %v1049_v56, 0.0 }
 0x1da   :  { %v1285_v0 = vmax.f32 %v1209_v58, 0.0 }
 0x1dd   :  { %v1050_v57 = vpop.f32.mrf.mxu2 }
 0x1de   :  { %v1051_v59 = vadd.f32 %v2107_v7, %v1050_v57 }
 0x1df   :  { %v1210_v60 = vpop.f32.mrf.mxu3 }
 0x1e0   :  { %v1099_v62 = vmax.f32 %v1051_v59, 0.0  ;;  %v1211_v63 = vadd.f32 %v2162_v41, %v1210_v60 }
 0x1e2   :  { %v1286_v1 = vmax.f32 %v1211_v63, 0.0  ;;  %v1120_v2 = vpack.c.bf16 %v1099_v62, %v1098_v61 }
 0x1e4   :  { %v1776_v3 = vpack.c.bf16 %v1286_v1, %v1285_v0  ;;  %1252 = vmatmul.bf16.gmra.mxu3 %v1120_v2 }
 0x1e5   :  { %v1053_v4 = vpop.f32.mrf.mxu2 }
 0x1e6   :  { %1863 = vst [vmem:[%s2265_s7 + $0x8] sm:$0xff] %v1776_v3   ;;  %v1054_v6 = vadd.f32 %v2107_v7, %v1053_v4 }
 0x1e7   :  { %v1213_v5 = vpop.f32.mrf.mxu3 }
 0x1e8   :  { %v1214_v9 = vadd.f32 %v2162_v41, %v1213_v5  ;;  %v1100_v12 = vmax.f32 %v1054_v6, 0.0 }
 0x1ea   :  { %v1287_v15 = vmax.f32 %v1214_v9, 0.0 }
 0x1ed   :  { %v1055_v8 = vpop.f32.mrf.mxu2 }
 0x1ee   :  { %v1056_v10 = vadd.f32 %v2107_v7, %v1055_v8 }
 0x1ef   :  { %v1215_v11 = vpop.f32.mrf.mxu3 }
 0x1f0   :  { %v1101_v13 = vmax.f32 %v1056_v10, 0.0  ;;  %v1216_v14 = vadd.f32 %v2162_v41, %v1215_v11 }
 0x1f2   :  { %v1288_v16 = vmax.f32 %v1216_v14, 0.0  ;;  %v1121_v17 = vpack.c.bf16 %v1101_v13, %v1100_v12 }
 0x1f4   :  { %v1781_v18 = vpack.c.bf16 %v1288_v16, %v1287_v15  ;;  %1257 = vmatmul.bf16.gmra.mxu3 %v1121_v17 }
 0x1f5   :  { %v1058_v20 = vpop.f32.mrf.mxu2 }
 0x1f6   :  { %1864 = vst [vmem:[%s2265_s7 + $0x10] sm:$0xff] %v1781_v18   ;;  %v1059_v22 = vadd.f32 %v2107_v7, %v1058_v20 }
 0x1f7   :  { %v1218_v21 = vpop.f32.mrf.mxu3 }
 0x1f8   :  { %v1219_v24 = vadd.f32 %v2162_v41, %v1218_v21  ;;  %v1102_v27 = vmax.f32 %v1059_v22, 0.0 }
 0x1fa   :  { %v1289_v29 = vmax.f32 %v1219_v24, 0.0 }
 0x1fd   :  { %v1060_v23 = vpop.f32.mrf.mxu2 }
 0x1fe   :  { %v1061_v25 = vadd.f32 %v2107_v7, %v1060_v23 }
 0x1ff   :  { %v1220_v26 = vpop.f32.mrf.mxu3 }
 0x200   :  { %v1103_v19 = vmax.f32 %v1061_v25, 0.0  ;;  %v1221_v28 = vadd.f32 %v2162_v41, %v1220_v26 }
 0x202   :  { %v1122_v30 = vpack.c.bf16 %v1103_v19, %v1102_v27  ;;  %v1290_v31 = vmax.f32 %v1221_v28, 0.0 }
 0x204   :  { %v1786_v32 = vpack.c.bf16 %v1290_v31, %v1289_v29  ;;  %1262 = vmatmul.bf16.gmra.mxu3 %v1122_v30 }
 0x205   :  { %v1063_v33 = vpop.f32.mrf.mxu2 }
 0x206   :  { %1865 = vst [vmem:[%s2265_s7 + $0x18] sm:$0xff] %v1786_v32   ;;  %v1064_v35 = vadd.f32 %v2107_v7, %v1063_v33 }
 0x207   :  { %v1223_v34 = vpop.f32.mrf.mxu3 }
 0x208   :  { %v1224_v37 = vadd.f32 %v2162_v41, %v1223_v34  ;;  %v1104_v40 = vmax.f32 %v1064_v35, 0.0 }
 0x20a   :  { %v1291_v44 = vmax.f32 %v1224_v37, 0.0 }
 0x20d   :  { %v1065_v36 = vpop.f32.mrf.mxu2 }
 0x20e   :  { %v1066_v38 = vadd.f32 %v2107_v7, %v1065_v36 }
 0x20f   :  { %v1225_v39 = vpop.f32.mrf.mxu3 }
 0x210   :  { %v1105_v42 = vmax.f32 %v1066_v38, 0.0  ;;  %v1226_v43 = vadd.f32 %v2162_v41, %v1225_v39 }
 0x212   :  { %v1123_v45 = vpack.c.bf16 %v1105_v42, %v1104_v40  ;;  %v1292_v46 = vmax.f32 %v1226_v43, 0.0 }
 0x214   :  { %v1791_v47 = vpack.c.bf16 %v1292_v46, %v1291_v44  ;;  %1267 = vmatmul.bf16.gmra.mxu3 %v1123_v45 }
 0x215   :  { %v1068_v48 = vpop.f32.mrf.mxu2 }
 0x216   :  { %1866 = vst [vmem:[%s2265_s7 + $0x20] sm:$0xff] %v1791_v47   ;;  %v1069_v50 = vadd.f32 %v2107_v7, %v1068_v48 }
 0x217   :  { %v1228_v49 = vpop.f32.mrf.mxu3 }
 0x218   :  { %v1229_v52 = vadd.f32 %v2162_v41, %v1228_v49  ;;  %v1106_v55 = vmax.f32 %v1069_v50, 0.0 }
 0x21a   :  { %v1293_v58 = vmax.f32 %v1229_v52, 0.0 }
 0x21d   :  { %v1070_v51 = vpop.f32.mrf.mxu2 }
 0x21e   :  { %v1071_v53 = vadd.f32 %v2107_v7, %v1070_v51 }
 0x21f   :  { %v1230_v54 = vpop.f32.mrf.mxu3 }
 0x220   :  { %v1107_v56 = vmax.f32 %v1071_v53, 0.0  ;;  %v1231_v57 = vadd.f32 %v2162_v41, %v1230_v54 }
 0x222   :  { %v1124_v59 = vpack.c.bf16 %v1107_v56, %v1106_v55  ;;  %v1294_v60 = vmax.f32 %v1231_v57, 0.0 }
 0x224   :  { %v1796_v61 = vpack.c.bf16 %v1294_v60, %v1293_v58  ;;  %1272 = vmatmul.bf16.gmra.mxu3 %v1124_v59 }
 0x225   :  { %v1073_v62 = vpop.f32.mrf.mxu2 }
 0x226   :  { %1867 = vst [vmem:[%s2265_s7 + $0x28] sm:$0xff] %v1796_v61   ;;  %v1074_v0 = vadd.f32 %v2107_v7, %v1073_v62 }
 0x227   :  { %v1233_v63 = vpop.f32.mrf.mxu3 }
 0x228   :  { %v1234_v2 = vadd.f32 %v2162_v41, %v1233_v63  ;;  %v1108_v5 = vmax.f32 %v1074_v0, 0.0 }
 0x22a   :  { %v1295_v9 = vmax.f32 %v1234_v2, 0.0 }
 0x22d   :  { %v1075_v1 = vpop.f32.mrf.mxu2 }
 0x22e   :  { %v1076_v3 = vadd.f32 %v2107_v7, %v1075_v1 }
 0x22f   :  { %v1235_v4 = vpop.f32.mrf.mxu3 }
 0x230   :  { %v1109_v6 = vmax.f32 %v1076_v3, 0.0  ;;  %v1236_v8 = vadd.f32 %v2162_v41, %v1235_v4 }
 0x232   :  { %v1125_v10 = vpack.c.bf16 %v1109_v6, %v1108_v5  ;;  %v1296_v11 = vmax.f32 %v1236_v8, 0.0 }
 0x234   :  { %v1801_v12 = vpack.c.bf16 %v1296_v11, %v1295_v9  ;;  %1277 = vmatmul.bf16.gmra.mxu3 %v1125_v10 }
 0x236   :  { %1868 = vst [vmem:[%s2265_s7 + $0x30] sm:$0xff] %v1801_v12  }
 0x237   :  { %v1238_v13 = vpop.f32.mrf.mxu3 }
 0x238   :  { %v1239_v14 = vadd.f32 %v2162_v41, %v1238_v13 }
 0x23a   :  { %v1297_v16 = vmax.f32 %v1239_v14, 0.0 }
 0x23f   :  { %v1240_v15 = vpop.f32.mrf.mxu3 }
 0x240   :  { %v1241_v7 = vadd.f32 %v2162_v41, %v1240_v15 }
 0x242   :  { %v1298_v17 = vmax.f32 %v1241_v7, 0.0 }
 0x244   :  { %v1806_v18 = vpack.c.bf16 %v1298_v17, %v1297_v16 }
 0x246   :  { %1869 = vst [vmem:[%s2265_s7 + $0x38] sm:$0xff] %v1806_v18  }
 0x247   :  { %v1243_v20 = vpop.f32.mrf.mxu3 }
 0x248   :  { %v1244_v21 = vadd.f32 %v2162_v41, %v1243_v20 }
 0x24a   :  { %v1299_v24 = vmax.f32 %v1244_v21, 0.0 }
 0x24f   :  { %v1245_v22 = vpop.f32.mrf.mxu3 }
 0x250   :  { %v1246_v23 = vadd.f32 %v2162_v41, %v1245_v22 }
 0x252   :  { %v1300_v25 = vmax.f32 %v1246_v23, 0.0 }
 0x254   :  { %v1811_v26 = vpack.c.bf16 %v1300_v25, %v1299_v24 }
 0x256   :  { %1870 = vst [vmem:[%s2265_s7 + $0x40] sm:$0xff] %v1811_v26  }
 0x257   :  { %v1248_v27 = vpop.f32.mrf.mxu3 }
 0x258   :  { %v1249_v19 = vadd.f32 %v2162_v41, %v1248_v27 }
 0x25a   :  { %v1301_v30 = vmax.f32 %v1249_v19, 0.0 }
 0x25f   :  { %v1250_v28 = vpop.f32.mrf.mxu3 }
 0x260   :  { %v1251_v29 = vadd.f32 %v2162_v41, %v1250_v28 }
 0x262   :  { %v1302_v31 = vmax.f32 %v1251_v29, 0.0 }
 0x264   :  { %v1816_v32 = vpack.c.bf16 %v1302_v31, %v1301_v30 }
 0x266   :  { %1871 = vst [vmem:[%s2265_s7 + $0x48] sm:$0xff] %v1816_v32  }
 0x267   :  { %v1253_v33 = vpop.f32.mrf.mxu3 }
 0x268   :  { %v1254_v34 = vadd.f32 %v2162_v41, %v1253_v33 }
 0x26a   :  { %v1303_v37 = vmax.f32 %v1254_v34, 0.0 }
 0x26f   :  { %v1255_v35 = vpop.f32.mrf.mxu3 }
 0x270   :  { %v1256_v36 = vadd.f32 %v2162_v41, %v1255_v35 }
 0x272   :  { %v1304_v38 = vmax.f32 %v1256_v36, 0.0 }
 0x274   :  { %v1821_v39 = vpack.c.bf16 %v1304_v38, %v1303_v37 }
 0x276   :  { %1872 = vst [vmem:[%s2265_s7 + $0x50] sm:$0xff] %v1821_v39  }
 0x277   :  { %v1258_v40 = vpop.f32.mrf.mxu3 }
 0x278   :  { %v1259_v42 = vadd.f32 %v2162_v41, %v1258_v40 }
 0x27a   :  { %v1305_v45 = vmax.f32 %v1259_v42, 0.0 }
 0x27f   :  { %v1260_v43 = vpop.f32.mrf.mxu3 }
 0x280   :  { %v1261_v44 = vadd.f32 %v2162_v41, %v1260_v43 }
 0x282   :  { %v1306_v46 = vmax.f32 %v1261_v44, 0.0 }
 0x284   :  { %v1826_v47 = vpack.c.bf16 %v1306_v46, %v1305_v45 }
 0x286   :  { %1873 = vst [vmem:[%s2265_s7 + $0x58] sm:$0xff] %v1826_v47  }
 0x287   :  { %v1263_v48 = vpop.f32.mrf.mxu3 }
 0x288   :  { %v1264_v49 = vadd.f32 %v2162_v41, %v1263_v48 }
 0x28a   :  { %v1307_v52 = vmax.f32 %v1264_v49, 0.0 }
 0x28f   :  { %v1265_v50 = vpop.f32.mrf.mxu3 }
 0x290   :  { %v1266_v51 = vadd.f32 %v2162_v41, %v1265_v50 }
 0x292   :  { %v1308_v53 = vmax.f32 %v1266_v51, 0.0 }
 0x294   :  { %v1831_v54 = vpack.c.bf16 %v1308_v53, %v1307_v52 }
 0x296   :  { %1874 = vst [vmem:[%s2265_s7 + $0x60] sm:$0xff] %v1831_v54  }
 0x297   :  { %v1268_v55 = vpop.f32.mrf.mxu3 }
 0x298   :  { %v1269_v56 = vadd.f32 %v2162_v41, %v1268_v55 }
 0x29a   :  { %v1309_v59 = vmax.f32 %v1269_v56, 0.0 }
 0x29f   :  { %v1270_v57 = vpop.f32.mrf.mxu3 }
 0x2a0   :  { %v1271_v58 = vadd.f32 %v2162_v41, %v1270_v57 }
 0x2a2   :  { %v1310_v60 = vmax.f32 %v1271_v58, 0.0 }
 0x2a4   :  { %v1836_v61 = vpack.c.bf16 %v1310_v60, %v1309_v59 }
 0x2a6   :  { %1875 = vst [vmem:[%s2265_s7 + $0x68] sm:$0xff] %v1836_v61  }
 0x2a7   :  { %v1273_v62 = vpop.f32.mrf.mxu3 }
 0x2a8   :  { %v1274_v63 = vadd.f32 %v2162_v41, %v1273_v62 }
 0x2aa   :  { %v1311_v2 = vmax.f32 %v1274_v63, 0.0 }
 0x2af   :  { %v1275_v0 = vpop.f32.mrf.mxu3 }
 0x2b0   :  { %v1276_v1 = vadd.f32 %v2162_v41, %v1275_v0 }
 0x2b2   :  { %v1312_v3 = vmax.f32 %v1276_v1, 0.0 }
 0x2b4   :  { %v1841_v4 = vpack.c.bf16 %v1312_v3, %v1311_v2 }
 0x2b6   :  { %1876 = vst [vmem:[%s2265_s7 + $0x70] sm:$0xff] %v1841_v4  }
 0x2b7   :  { %v1278_v5 = vpop.f32.mrf.mxu3 }
 0x2b8   :  { %v1279_v6 = vadd.f32 %v2162_v41, %v1278_v5 }
 0x2ba   :  { %v1313_v10 = vmax.f32 %v1279_v6, 0.0 }
 0x2bf   :  { %v1280_v8 = vpop.f32.mrf.mxu3 }
 0x2c0   :  { %v1281_v9 = vadd.f32 %v2162_v41, %v1280_v8 }
 0x2c2   :  { %v1314_v11 = vmax.f32 %v1281_v9, 0.0 }
 0x2c4   :  { %v1846_v12 = vpack.c.bf16 %v1314_v11, %v1313_v10 }
 0x2c6   :  { %1877 = vst [vmem:[%s2265_s7 + $0x78] sm:$0xff] %v1846_v12  }
 0x2c7   :  { %1383 = vsyncpa [#allocation6], 1 }

// kernel: gin_model_forward.3
= control target key start
LH: loop header
LB: loop body
LE: loop exit
PB: predicated region body
PF: predicated region fallthrough
CT: control target
= control target key end

     0   :  { %13 = vsyncpa [#allocation6], 0  ;;  %s2233_s27 = smov [#allocation5]   ;;  %s2234_s29 = smov 128   ;;  %s2953_s0 = inlined_call_operand.<no memory space> [shape: f32[1], index: 0, kind: input, shape index: {}]   ;;  %s2954_s1 = inlined_call_operand.hbm [shape: bf16[256,256], index: 1, kind: input, shape index: {}]   ;;  %s2955_s2 = inlined_call_operand.vmem [shape: bf16[256,128], index: 2, kind: input, shape index: {}]   ;;  %s2956_s3 = inlined_call_operand.vmem [shape: bf16[128,128], index: 3, kind: input, shape index: {}]   ;;  %s2957_s4 = inlined_call_operand.vmem [shape: f32[1,128], index: 4, kind: input, shape index: {}]   ;;  %s2958_s5 = inlined_call_operand.vmem [shape: bf16[128,128], index: 5, kind: input, shape index: {}]   ;;  %s2959_s6 = inlined_call_operand.vmem [shape: f32[1,128], index: 6, kind: input, shape index: {}]   ;;  %s2960_s7 = inlined_call_operand.vmem [shape: f32[256,128], index: 7, kind: output, shape index: {}]  }
   0x1   :  { %s18_s26 = sshll.u32 %s2954_s1, 4  ;;  %s20_s28 = sshll.u32 %s2233_s27, 4  ;;  %s19_s26 = int_to_ptr.hbm [resolvable:$true] %s18_s26  ;;  %s21_s28 = int_to_ptr.vmem [resolvable:$true] %s20_s28 }
   0x2   :  { %s2235_s30 = smov 8  }
   0x3   :  { %26 = dma.hbm_to_vmem [thread:$0]  %s19_s26, 4096, %s21_s28, [#allocation6], %s2234_s29, %s2234_s29, %s2235_s30  }
   0x4   :  { %2231 = dma.done.wait [#allocation6], 4096  }
   0x5   :  { %2232 = vsyncadd [#allocation6], 4294963200  ;;  %v1970_v0 = vld [vmem:[%s2955_s2 + $0x38] sm:$0xff]  ;;  %v1969_v2 = vld [vmem:[%s2955_s2 + $0x30] sm:$0xff] }
   0x6   :  { %v1978_v1 = vld [vmem:[%s2955_s2 + $0x78] sm:$0xff]  ;;  %429 = vmatpush.bf16.msra.mxu0 %v1970_v0  ;;  %v1977_v3 = vld [vmem:[%s2955_s2 + $0x70] sm:$0xff]  ;;  %v1968_v4 = vld [vmem:[%s2955_s2 + $0x28] sm:$0xff] }
   0x7   :  { %518 = vmatpush.bf16.msra.mxu1 %v1978_v1  ;;  %v1976_v5 = vld [vmem:[%s2955_s2 + $0x68] sm:$0xff]  ;;  %v1967_v6 = vld [vmem:[%s2955_s2 + $0x20] sm:$0xff]  ;;  %v1966_v8 = vld [vmem:[%s2955_s2 + $0x18] sm:$0xff] }
   0x8   :  { %v1975_v7 = vld [vmem:[%s2955_s2 + $0x60] sm:$0xff]  ;;  %v1974_v9 = vld [vmem:[%s2955_s2 + $0x58] sm:$0xff]  ;;  %v1965_v10 = vld [vmem:[%s2955_s2 + $0x10] sm:$0xff] }
   0x9   :  { %v1973_v11 = vld [vmem:[%s2955_s2 + $0x50] sm:$0xff]  ;;  %v1964_v12 = vld [vmem:[%s2955_s2 + $0x8] sm:$0xff]  ;;  %v1963_v14 = vld [vmem:[%s2955_s2] sm:$0xff] }
   0xa   :  { %430 = vmatpush.bf16.msra.mxu0 %v1969_v2  ;;  %v1972_v13 = vld [vmem:[%s2955_s2 + $0x48] sm:$0xff]  ;;  %v1971_v15 = vld [vmem:[%s2955_s2 + $0x40] sm:$0xff]  ;;  %v1685_v22 = vld [vmem:[#allocation5 + $0x10] sm:$0xf] }
   0xb   :  { %519 = vmatpush.bf16.msra.mxu1 %v1977_v3  ;;  %v1677_v16 = vld [vmem:[#allocation5] sm:$0xf]  ;;  %v1932_v17 = vld [vmem:[#allocation5 + $0x4] sm:$0xf0]  ;;  %v1931_v18 = vld [vmem:[#allocation5 + $0x4] sm:$0xf] }
   0xc   :  { %v1679_v19 = vld [vmem:[#allocation5 + $0x8] sm:$0xf0]  ;;  %v1678_v20 = vor.u32 %v1932_v17, %v1677_v16  ;;  %v1934_v23 = vld [vmem:[#allocation5 + $0x14] sm:$0xf0]  ;;  %v1933_v24 = vld [vmem:[#allocation5 + $0x14] sm:$0xf] }
   0xd   :  { %v1682_v21 = vor.u32 %v1931_v18, %v1679_v19  ;;  %v1687_v25 = vld [vmem:[#allocation5 + $0x18] sm:$0xf0]  ;;  %v1686_v26 = vor.u32 %v1934_v23, %v1685_v22  ;;  %v1693_v28 = vld [vmem:[#allocation5 + $0x20] sm:$0xf]  ;;  %v1936_v29 = vld [vmem:[#allocation5 + $0x24] sm:$0xf0] }
   0xe   :  { %431 = vmatpush.bf16.msra.mxu0 %v1968_v4  ;;  %v1690_v27 = vor.u32 %v1933_v24, %v1687_v25  ;;  %v1935_v30 = vld [vmem:[#allocation5 + $0x24] sm:$0xf]  ;;  %v1695_v31 = vld [vmem:[#allocation5 + $0x28] sm:$0xf0]  ;;  %v1694_v32 = vor.u32 %v1936_v29, %v1693_v28  ;;  %v1701_v34 = vld [vmem:[#allocation5 + $0x30] sm:$0xf] }
   0xf   :  { %520 = vmatpush.bf16.msra.mxu1 %v1976_v5  ;;  %v1698_v33 = vor.u32 %v1935_v30, %v1695_v31  ;;  %v1938_v35 = vld [vmem:[#allocation5 + $0x34] sm:$0xf0]  ;;  %v1937_v36 = vld [vmem:[#allocation5 + $0x34] sm:$0xf]  ;;  %v1703_v37 = vld [vmem:[#allocation5 + $0x38] sm:$0xf0] }
  0x10   :  { %v1702_v38 = vor.u32 %v1938_v35, %v1701_v34  ;;  %v1706_v39 = vor.u32 %v1937_v36, %v1703_v37  ;;  %v1709_v40 = vld [vmem:[#allocation5 + $0x40] sm:$0xf]  ;;  %v1940_v41 = vld [vmem:[#allocation5 + $0x44] sm:$0xf0]  ;;  %v1939_v42 = vld [vmem:[#allocation5 + $0x44] sm:$0xf] }
  0x11   :  { %v1711_v43 = vld [vmem:[#allocation5 + $0x48] sm:$0xf0]  ;;  %v1710_v44 = vor.u32 %v1940_v41, %v1709_v40  ;;  %v1986_v46 = vld [vmem:[%s2956_s3 + $0x38] sm:$0xff]  ;;  %v1717_v47 = vld [vmem:[#allocation5 + $0x50] sm:$0xf] }
  0x12   :  { %432 = vmatpush.bf16.msra.mxu0 %v1967_v6  ;;  %v1714_v45 = vor.u32 %v1939_v42, %v1711_v43  ;;  %989 = vmatpush.bf16.msra.mxu2 %v1986_v46  ;;  %v1942_v48 = vld [vmem:[#allocation5 + $0x54] sm:$0xf0]  ;;  %v1941_v49 = vld [vmem:[#allocation5 + $0x54] sm:$0xf]  ;;  %v1719_v50 = vld [vmem:[#allocation5 + $0x58] sm:$0xf0] }
  0x13   :  { %521 = vmatpush.bf16.msra.mxu1 %v1975_v7  ;;  %v1718_v51 = vor.u32 %v1942_v48, %v1717_v47  ;;  %v1722_v52 = vor.u32 %v1941_v49, %v1719_v50  ;;  %v1985_v53 = vld [vmem:[%s2956_s3 + $0x30] sm:$0xff]  ;;  %v1984_v54 = vld [vmem:[%s2956_s3 + $0x28] sm:$0xff]  ;;  %v1983_v55 = vld [vmem:[%s2956_s3 + $0x20] sm:$0xff] }
  0x14   :  { %v1725_v56 = vld [vmem:[#allocation5 + $0x60] sm:$0xf]  ;;  %v1944_v57 = vld [vmem:[#allocation5 + $0x64] sm:$0xf0]  ;;  %v1943_v58 = vld [vmem:[#allocation5 + $0x64] sm:$0xf] }
  0x15   :  { %v1727_v59 = vld [vmem:[#allocation5 + $0x68] sm:$0xf0]  ;;  %v1982_v60 = vld [vmem:[%s2956_s3 + $0x18] sm:$0xff]  ;;  %v1726_v61 = vor.u32 %v1944_v57, %v1725_v56  ;;  %v1981_v63 = vld [vmem:[%s2956_s3 + $0x10] sm:$0xff] }
  0x16   :  { %433 = vmatpush.bf16.msra.mxu0 %v1966_v8  ;;  %990 = vmatpush.bf16.msra.mxu2 %v1985_v53  ;;  %v1730_v62 = vor.u32 %v1943_v58, %v1727_v59  ;;  %v1980_v0 = vld [vmem:[%s2956_s3 + $0x8] sm:$0xff]  ;;  %v1979_v1 = vld [vmem:[%s2956_s3] sm:$0xff]  ;;  %v1733_v2 = vld [vmem:[#allocation5 + $0x70] sm:$0xf]  ;;  %s708_s3 = sadd.f32 1.0, %s2953_s0 }
  0x17   :  { %522 = vmatpush.bf16.msra.mxu1 %v1974_v9  ;;  %v1946_v3 = vld [vmem:[#allocation5 + $0x74] sm:$0xf0]  ;;  %v1945_v4 = vld [vmem:[#allocation5 + $0x74] sm:$0xf]  ;;  %v1735_v5 = vld [vmem:[#allocation5 + $0x78] sm:$0xf0] }
  0x18   :  { %v1734_v6 = vor.u32 %v1946_v3, %v1733_v2  ;;  %v1738_v7 = vor.u32 %v1945_v4, %v1735_v5  ;;  %v1741_v8 = vld [vmem:[#allocation5 + $0x80] sm:$0xf]  ;;  %v1948_v9 = vld [vmem:[#allocation5 + $0x84] sm:$0xf0]  ;;  %v2357_v19 = vstv %s708_s3  ;;  %v1749_v28 = vld [vmem:[#allocation5 + $0x90] sm:$0xf] }
  0x19   :  { %v1996_v16 = vld [vmem:[%s2955_s2] sm:$0xff]   ;;  %v1950_v29 = vld [vmem:[#allocation5 + $0x94] sm:$0xf0]  ;;  %v1949_v30 = vld [vmem:[#allocation5 + $0x94] sm:$0xf] }
  0x1a   :  { %434 = vmatpush.bf16.msra.mxu0 %v1965_v10  ;;  %991 = vmatpush.bf16.msra.mxu2 %v1984_v54  ;;  %v1947_v10 = vld [vmem:[#allocation5 + $0x84] sm:$0xf]  ;;  %v1997_v17 = vunpack.c.l.bf16 %v1996_v16  ;;  %v1998_v18 = vunpack.c.h.bf16 %v1996_v16  ;;  %v1751_v31 = vld [vmem:[#allocation5 + $0x98] sm:$0xf0]  ;;  %v2059_v37 = vld [vmem:[%s2955_s2 + $0x8] sm:$0xff]  }
  0x1b   :  { %523 = vmatpush.bf16.msra.mxu1 %v1973_v11  ;;  %v1743_v11 = vld [vmem:[#allocation5 + $0x88] sm:$0xf0]  ;;  %v1754_v34 = vor.u32 %v1949_v30, %v1751_v31  ;;  %v1757_v48 = vld [vmem:[#allocation5 + $0xa0] sm:$0xf]  ;;  %v1952_v49 = vld [vmem:[#allocation5 + $0xa4] sm:$0xf0] }
  0x1c   :  { %v775_v22 = vmul.f32 %v1998_v18, %v2357_v19  ;;  %v1951_v50 = vld [vmem:[#allocation5 + $0xa4] sm:$0xf]  ;;  %v1758_v53 = vor.u32 %v1952_v49, %v1757_v48  ;;  %v2060_v57 = vld [vmem:[%s2955_s2 + $0x10] sm:$0xff]   ;;  %v1954_v5 = vld [vmem:[#allocation5 + $0xb4] sm:$0xf0] }
  0x1d   :  { %v2005_v58 = vunpack.c.l.bf16 %v2060_v57  ;;  %v2006_v59 = vunpack.c.h.bf16 %v2060_v57  ;;  %v1765_v4 = vld [vmem:[#allocation5 + $0xb0] sm:$0xf]  ;;  %v1783_v48 = vld [vmem:[#allocation5 + $0xd8] sm:$0xf0] }
  0x1e   :  { %435 = vmatpush.bf16.msra.mxu0 %v1964_v12  ;;  %992 = vmatpush.bf16.msra.mxu2 %v1983_v55  ;;  %v1742_v12 = vor.u32 %v1948_v9, %v1741_v8  ;;  %v1766_v9 = vor.u32 %v1954_v5, %v1765_v4  ;;  %v1791_v4 = vld [vmem:[#allocation5 + $0xe8] sm:$0xf0] }
  0x1f   :  { %524 = vmatpush.bf16.msra.mxu1 %v1972_v13  ;;  %v1746_v13 = vor.u32 %v1947_v10, %v1743_v11 }
  0x22   :  { %436 = vmatpush.bf16.msra.mxu0 %v1963_v14  ;;  %993 = vmatpush.bf16.msra.mxu2 %v1982_v60 }
  0x23   :  { %525 = vmatpush.bf16.msra.mxu1 %v1971_v15 }
  0x25   :  { %437 = vmatmul.bf16.vlgmr.msra.gmra.mxu0 %v1678_v20 }
  0x26   :  { %526 = vmatmul.bf16.vlgmr.msra.gmra.mxu1 %v1682_v21  ;;  %994 = vmatpush.bf16.msra.mxu2 %v1981_v63  ;;  %v774_v21 = vmul.f32 %v1997_v17, %v2357_v19 }
  0x2a   :  { %995 = vmatpush.bf16.msra.mxu2 %v1980_v0 }
  0x2e   :  { %996 = vmatpush.bf16.msra.mxu2 %v1979_v1 }
  0x35   :  { %442 = vmatmul.bf16.gmra.mxu0 %v1686_v26 }
  0x36   :  { %531 = vmatmul.bf16.gmra.mxu1 %v1690_v27 }
  0x45   :  { %447 = vmatmul.bf16.gmra.mxu0 %v1694_v32 }
  0x46   :  { %536 = vmatmul.bf16.gmra.mxu1 %v1698_v33  ;;  %v1750_v33 = vor.u32 %v1950_v29, %v1749_v28  ;;  %v1775_v28 = vld [vmem:[#allocation5 + $0xc8] sm:$0xf0] }
  0x55   :  { %452 = vmatmul.bf16.gmra.mxu0 %v1702_v38  ;;  %v2001_v38 = vunpack.c.l.bf16 %v2059_v37 }
  0x56   :  { %541 = vmatmul.bf16.gmra.mxu1 %v1706_v39  ;;  %v2002_v39 = vunpack.c.h.bf16 %v2059_v37 }
  0x57   :  { %v776_v41 = vmul.f32 %v2001_v38, %v2357_v19 }
  0x58   :  { %v777_v42 = vmul.f32 %v2002_v39, %v2357_v19 }
  0x65   :  { %457 = vmatmul.bf16.gmra.mxu0 %v1710_v44 }
  0x66   :  { %546 = vmatmul.bf16.gmra.mxu1 %v1714_v45 }
  0x75   :  { %462 = vmatmul.bf16.gmra.mxu0 %v1718_v51  ;;  %v1759_v51 = vld [vmem:[#allocation5 + $0xa8] sm:$0xf0] }
  0x76   :  { %551 = vmatmul.bf16.gmra.mxu1 %v1722_v52  ;;  %v1762_v54 = vor.u32 %v1951_v50, %v1759_v51 }
  0x85   :  { %467 = vmatmul.bf16.gmra.mxu0 %v1726_v61  ;;  %v778_v61 = vmul.f32 %v2005_v58, %v2357_v19 }
  0x86   :  { %556 = vmatmul.bf16.gmra.mxu1 %v1730_v62  ;;  %v779_v62 = vmul.f32 %v2006_v59, %v2357_v19 }
  0x95   :  { %472 = vmatmul.bf16.gmra.mxu0 %v1734_v6  ;;  %v1953_v6 = vld [vmem:[#allocation5 + $0xb4] sm:$0xf] }
  0x96   :  { %561 = vmatmul.bf16.gmra.mxu1 %v1738_v7  ;;  %v1767_v7 = vld [vmem:[#allocation5 + $0xb8] sm:$0xf0] }
  0x97   :  { %v1770_v10 = vor.u32 %v1953_v6, %v1767_v7 }
  0xa2   :  { %v438_v14 = vpop.f32.mrf.mxu0 }
  0xa3   :  { %v527_v15 = vpop.f32.mrf.mxu1 }
  0xa4   :  { %v528_v20 = vadd.f32 %v527_v15, %v438_v14 }
  0xa5   :  { %477 = vmatmul.bf16.gmra.mxu0 %v1742_v12 }
  0xa6   :  { %566 = vmatmul.bf16.gmra.mxu1 %v1746_v13  ;;  %v806_v26 = vadd.f32 %v774_v21, %v528_v20  ;;  %v2061_v13 = vld [vmem:[%s2955_s2 + $0x18] sm:$0xff]  }
  0xa7   :  { %v2009_v14 = vunpack.c.l.bf16 %v2061_v13  ;;  %v2010_v15 = vunpack.c.h.bf16 %v2061_v13 }
  0xa9   :  { %v780_v17 = vmul.f32 %v2009_v14, %v2357_v19  ;;  %v781_v18 = vmul.f32 %v2010_v15, %v2357_v19  ;;  %v1993_v14 = vld [vmem:[%s2958_s5 + $0x30] sm:$0xff] }
  0xaa   :  { %v440_v23 = vpop.f32.mrf.mxu0 }
  0xab   :  { %v529_v24 = vpop.f32.mrf.mxu1 }
  0xac   :  { %v530_v25 = vadd.f32 %v529_v24, %v440_v23 }
  0xae   :  { %v807_v27 = vadd.f32 %v775_v22, %v530_v25  ;;  %v1773_v25 = vld [vmem:[#allocation5 + $0xc0] sm:$0xf] }
  0xb0   :  { %v905_v32 = vpack.c.bf16 %v807_v27, %v806_v26  ;;  %v1956_v26 = vld [vmem:[#allocation5 + $0xc4] sm:$0xf0]  ;;  %v1955_v27 = vld [vmem:[#allocation5 + $0xc4] sm:$0xf] }
  0xb1   :  { %v1774_v30 = vor.u32 %v1956_v26, %v1773_v25  ;;  %v1778_v31 = vor.u32 %v1955_v27, %v1775_v28  ;;  %v1797_v25 = vld [vmem:[#allocation5 + $0xf0] sm:$0xf]  ;;  %v1991_v26 = vld [vmem:[%s2958_s5 + $0x20] sm:$0xff]  ;;  %v1962_v27 = vld [vmem:[#allocation5 + $0xf4] sm:$0xf0] }
  0xb2   :  { %997 = vmatmul.bf16.vlgmr.msra.gmra.mxu2 %v905_v32  ;;  %v443_v35 = vpop.f32.mrf.mxu0  ;;  %v1961_v28 = vld [vmem:[#allocation5 + $0xf4] sm:$0xf] }
  0xb3   :  { %v532_v36 = vpop.f32.mrf.mxu1 }
  0xb4   :  { %v533_v40 = vadd.f32 %v532_v36, %v443_v35 }
  0xb5   :  { %482 = vmatmul.bf16.gmra.mxu0 %v1750_v33 }
  0xb6   :  { %571 = vmatmul.bf16.gmra.mxu1 %v1754_v34  ;;  %v808_v46 = vadd.f32 %v776_v41, %v533_v40  ;;  %v2062_v34 = vld [vmem:[%s2955_s2 + $0x20] sm:$0xff]  }
  0xb7   :  { %v2013_v35 = vunpack.c.l.bf16 %v2062_v34  ;;  %v2014_v36 = vunpack.c.h.bf16 %v2062_v34 }
  0xb9   :  { %v782_v38 = vmul.f32 %v2013_v35, %v2357_v19  ;;  %v783_v39 = vmul.f32 %v2014_v36, %v2357_v19  ;;  %v2065_v35 = vld [vmem:[%s2955_s2 + $0x38] sm:$0xff]  }
  0xba   :  { %v445_v43 = vpop.f32.mrf.mxu0  ;;  %v1990_v36 = vld [vmem:[%s2958_s5 + $0x18] sm:$0xff] }
  0xbb   :  { %v534_v44 = vpop.f32.mrf.mxu1 }
  0xbc   :  { %v535_v45 = vadd.f32 %v534_v44, %v445_v43 }
  0xbe   :  { %v809_v47 = vadd.f32 %v777_v42, %v535_v45  ;;  %v1781_v45 = vld [vmem:[#allocation5 + $0xd0] sm:$0xf] }
  0xc0   :  { %v906_v52 = vpack.c.bf16 %v809_v47, %v808_v46  ;;  %v1958_v46 = vld [vmem:[#allocation5 + $0xd4] sm:$0xf0]  ;;  %v1957_v47 = vld [vmem:[#allocation5 + $0xd4] sm:$0xf] }
  0xc1   :  { %v1782_v50 = vor.u32 %v1958_v46, %v1781_v45  ;;  %v1786_v51 = vor.u32 %v1957_v47, %v1783_v48  ;;  %v1988_v45 = vld [vmem:[%s2958_s5 + $0x8] sm:$0xff] }
  0xc2   :  { %1002 = vmatmul.bf16.gmra.mxu2 %v906_v52  ;;  %v448_v55 = vpop.f32.mrf.mxu0 }
  0xc3   :  { %v537_v56 = vpop.f32.mrf.mxu1 }
  0xc4   :  { %v538_v60 = vadd.f32 %v537_v56, %v448_v55 }
  0xc5   :  { %487 = vmatmul.bf16.gmra.mxu0 %v1758_v53 }
  0xc6   :  { %576 = vmatmul.bf16.gmra.mxu1 %v1762_v54  ;;  %v810_v2 = vadd.f32 %v778_v61, %v538_v60  ;;  %v2063_v54 = vld [vmem:[%s2955_s2 + $0x28] sm:$0xff]  }
  0xc7   :  { %v2017_v55 = vunpack.c.l.bf16 %v2063_v54  ;;  %v2018_v56 = vunpack.c.h.bf16 %v2063_v54 }
  0xc9   :  { %v784_v58 = vmul.f32 %v2017_v55, %v2357_v19  ;;  %v785_v59 = vmul.f32 %v2018_v56, %v2357_v19 }
  0xca   :  { %v450_v63 = vpop.f32.mrf.mxu0 }
  0xcb   :  { %v539_v0 = vpop.f32.mrf.mxu1 }
  0xcc   :  { %v540_v1 = vadd.f32 %v539_v0, %v450_v63 }
  0xce   :  { %v811_v3 = vadd.f32 %v779_v62, %v540_v1  ;;  %v1789_v1 = vld [vmem:[#allocation5 + $0xe0] sm:$0xf] }
  0xd0   :  { %v907_v8 = vpack.c.bf16 %v811_v3, %v810_v2  ;;  %v1960_v2 = vld [vmem:[#allocation5 + $0xe4] sm:$0xf0]  ;;  %v1959_v3 = vld [vmem:[#allocation5 + $0xe4] sm:$0xf] }
  0xd1   :  { %v1790_v6 = vor.u32 %v1960_v2, %v1789_v1  ;;  %v1794_v7 = vor.u32 %v1959_v3, %v1791_v4  ;;  %v2067_v3 = vld [vmem:[%s2955_s2 + $0x48] sm:$0xff]  }
  0xd2   :  { %1007 = vmatmul.bf16.gmra.mxu2 %v907_v8  ;;  %v453_v11 = vpop.f32.mrf.mxu0 }
  0xd3   :  { %v542_v12 = vpop.f32.mrf.mxu1 }
  0xd4   :  { %v543_v16 = vadd.f32 %v542_v12, %v453_v11  ;;  %v1994_v11 = vld [vmem:[%s2958_s5 + $0x38] sm:$0xff] }
  0xd5   :  { %492 = vmatmul.bf16.gmra.mxu0 %v1766_v9  ;;  %1194 = vmatpush.bf16.msra.mxu3 %v1994_v11 }
  0xd6   :  { %581 = vmatmul.bf16.gmra.mxu1 %v1770_v10  ;;  %v812_v23 = vadd.f32 %v780_v17, %v543_v16  ;;  %v2064_v10 = vld [vmem:[%s2955_s2 + $0x30] sm:$0xff]  }
  0xd7   :  { %v2021_v12 = vunpack.c.l.bf16 %v2064_v10  ;;  %v2022_v13 = vunpack.c.h.bf16 %v2064_v10 }
  0xd9   :  { %1195 = vmatpush.bf16.msra.mxu3 %v1993_v14  ;;  %v786_v16 = vmul.f32 %v2021_v12, %v2357_v19  ;;  %v787_v17 = vmul.f32 %v2022_v13, %v2357_v19 }
  0xda   :  { %v455_v20 = vpop.f32.mrf.mxu0 }
  0xdb   :  { %v544_v21 = vpop.f32.mrf.mxu1 }
  0xdc   :  { %v545_v22 = vadd.f32 %v544_v21, %v455_v20  ;;  %v1992_v21 = vld [vmem:[%s2958_s5 + $0x28] sm:$0xff] }
  0xdd   :  { %1196 = vmatpush.bf16.msra.mxu3 %v1992_v21 }
  0xde   :  { %v813_v24 = vadd.f32 %v781_v18, %v545_v22 }
  0xe0   :  { %v908_v29 = vpack.c.bf16 %v813_v24, %v812_v23 }
  0xe1   :  { %1197 = vmatpush.bf16.msra.mxu3 %v1991_v26  ;;  %v2068_v26 = vld [vmem:[%s2955_s2 + $0x50] sm:$0xff]  }
  0xe2   :  { %1012 = vmatmul.bf16.gmra.mxu2 %v908_v29  ;;  %v458_v32 = vpop.f32.mrf.mxu0  ;;  %v1799_v29 = vld [vmem:[#allocation5 + $0xf8] sm:$0xf0] }
  0xe3   :  { %v547_v33 = vpop.f32.mrf.mxu1 }
  0xe4   :  { %v548_v37 = vadd.f32 %v547_v33, %v458_v32  ;;  %v1802_v32 = vor.u32 %v1961_v28, %v1799_v29  ;;  %v2037_v28 = vunpack.c.l.bf16 %v2068_v26  ;;  %v2038_v29 = vunpack.c.h.bf16 %v2068_v26 }
  0xe5   :  { %497 = vmatmul.bf16.gmra.mxu0 %v1774_v30  ;;  %1198 = vmatpush.bf16.msra.mxu3 %v1990_v36 }
  0xe6   :  { %586 = vmatmul.bf16.gmra.mxu1 %v1778_v31  ;;  %v814_v43 = vadd.f32 %v782_v38, %v548_v37  ;;  %v1798_v31 = vor.u32 %v1962_v27, %v1797_v25  ;;  %v2025_v37 = vunpack.c.l.bf16 %v2065_v35  ;;  %v2026_v38 = vunpack.c.h.bf16 %v2065_v35 }
  0xea   :  { %v460_v40 = vpop.f32.mrf.mxu0 }
  0xeb   :  { %v549_v41 = vpop.f32.mrf.mxu1 }
  0xec   :  { %v550_v42 = vadd.f32 %v549_v41, %v460_v40  ;;  %v788_v41 = vmul.f32 %v2025_v37, %v2357_v19 }
  0xee   :  { %v815_v44 = vadd.f32 %v783_v39, %v550_v42  ;;  %v1989_v39 = vld [vmem:[%s2958_s5 + $0x10] sm:$0xff]  ;;  %v789_v42 = vmul.f32 %v2026_v38, %v2357_v19 }
  0xef   :  { %1199 = vmatpush.bf16.msra.mxu3 %v1989_v39 }
  0xf0   :  { %v909_v49 = vpack.c.bf16 %v815_v44, %v814_v43 }
  0xf2   :  { %1017 = vmatmul.bf16.gmra.mxu2 %v909_v49  ;;  %v463_v52 = vpop.f32.mrf.mxu0  ;;  %v1987_v49 = vld [vmem:[%s2958_s5] sm:$0xff] }
  0xf3   :  { %v552_v53 = vpop.f32.mrf.mxu1  ;;  %1200 = vmatpush.bf16.msra.mxu3 %v1988_v45 }
  0xf4   :  { %v553_v57 = vadd.f32 %v552_v53, %v463_v52  ;;  %v2066_v53 = vld [vmem:[%s2955_s2 + $0x40] sm:$0xff]  }
  0xf5   :  { %502 = vmatmul.bf16.gmra.mxu0 %v1782_v50  ;;  %v2029_v54 = vunpack.c.l.bf16 %v2066_v53  ;;  %v2030_v55 = vunpack.c.h.bf16 %v2066_v53 }
  0xf6   :  { %591 = vmatmul.bf16.gmra.mxu1 %v1786_v51  ;;  %v816_v63 = vadd.f32 %v784_v58, %v553_v57 }
  0xf7   :  { %1201 = vmatpush.bf16.msra.mxu3 %v1987_v49  ;;  %v790_v57 = vmul.f32 %v2029_v54, %v2357_v19  ;;  %v791_v58 = vmul.f32 %v2030_v55, %v2357_v19 }
  0xfa   :  { %v465_v60 = vpop.f32.mrf.mxu0 }
  0xfb   :  { %v554_v61 = vpop.f32.mrf.mxu1 }
  0xfc   :  { %v555_v62 = vadd.f32 %v554_v61, %v465_v60 }
  0xfe   :  { %v817_v0 = vadd.f32 %v785_v59, %v555_v62 }
 0x100   :  { %v910_v5 = vpack.c.bf16 %v817_v0, %v816_v63 }
 0x102   :  { %1022 = vmatmul.bf16.gmra.mxu2 %v910_v5  ;;  %v468_v8 = vpop.f32.mrf.mxu0  ;;  %v2033_v5 = vunpack.c.l.bf16 %v2067_v3 }
 0x103   :  { %v557_v9 = vpop.f32.mrf.mxu1 }
 0x104   :  { %v558_v15 = vadd.f32 %v557_v9, %v468_v8  ;;  %v792_v9 = vmul.f32 %v2033_v5, %v2357_v19 }
 0x105   :  { %507 = vmatmul.bf16.gmra.mxu0 %v1790_v6  ;;  %v2034_v6 = vunpack.c.h.bf16 %v2067_v3 }
 0x106   :  { %596 = vmatmul.bf16.gmra.mxu1 %v1794_v7  ;;  %v818_v23 = vadd.f32 %v786_v16, %v558_v15  ;;  %v2431_v7 = vld [vmem:[%s2957_s4] ss:$0 sm:$0xff] }
 0x107   :  { %v793_v10 = vmul.f32 %v2034_v6, %v2357_v19 }
 0x10a   :  { %v470_v18 = vpop.f32.mrf.mxu0 }
 0x10b   :  { %v559_v20 = vpop.f32.mrf.mxu1 }
 0x10c   :  { %v560_v22 = vadd.f32 %v559_v20, %v470_v18 }
 0x10e   :  { %v819_v24 = vadd.f32 %v787_v17, %v560_v22 }
 0x110   :  { %v911_v30 = vpack.c.bf16 %v819_v24, %v818_v23 }
 0x112   :  { %1027 = vmatmul.bf16.gmra.mxu2 %v911_v30  ;;  %v473_v33 = vpop.f32.mrf.mxu0 }
 0x113   :  { %v562_v34 = vpop.f32.mrf.mxu1 }
 0x114   :  { %v563_v40 = vadd.f32 %v562_v34, %v473_v33 }
 0x115   :  { %512 = vmatmul.bf16.gmra.mxu0 %v1798_v31  ;;  %v794_v31 = vmul.f32 %v2037_v28, %v2357_v19 }
 0x116   :  { %601 = vmatmul.bf16.gmra.mxu1 %v1802_v32  ;;  %v820_v47 = vadd.f32 %v788_v41, %v563_v40  ;;  %v795_v32 = vmul.f32 %v2038_v29, %v2357_v19 }
 0x11a   :  { %v475_v43 = vpop.f32.mrf.mxu0 }
 0x11b   :  { %v564_v44 = vpop.f32.mrf.mxu1 }
 0x11c   :  { %v565_v46 = vadd.f32 %v564_v44, %v475_v43 }
 0x11e   :  { %v821_v48 = vadd.f32 %v789_v42, %v565_v46 }
 0x120   :  { %v912_v50 = vpack.c.bf16 %v821_v48, %v820_v47  ;;  %v2069_v47 = vld [vmem:[%s2955_s2 + $0x58] sm:$0xff]  }
 0x121   :  { %v2041_v49 = vunpack.c.l.bf16 %v2069_v47 }
 0x122   :  { %1032 = vmatmul.bf16.gmra.mxu2 %v912_v50  ;;  %v478_v51 = vpop.f32.mrf.mxu0  ;;  %v2042_v50 = vunpack.c.h.bf16 %v2069_v47 }
 0x123   :  { %v567_v52 = vpop.f32.mrf.mxu1 }
 0x124   :  { %v568_v56 = vadd.f32 %v567_v52, %v478_v51  ;;  %v796_v52 = vmul.f32 %v2041_v49, %v2357_v19  ;;  %v797_v53 = vmul.f32 %v2042_v50, %v2357_v19 }
 0x126   :  { %v822_v62 = vadd.f32 %v790_v57, %v568_v56 }
 0x12a   :  { %v480_v59 = vpop.f32.mrf.mxu0 }
 0x12b   :  { %v569_v60 = vpop.f32.mrf.mxu1 }
 0x12c   :  { %v570_v61 = vadd.f32 %v569_v60, %v480_v59 }
 0x12e   :  { %v823_v63 = vadd.f32 %v791_v58, %v570_v61 }
 0x130   :  { %v913_v0 = vpack.c.bf16 %v823_v63, %v822_v62 }
 0x132   :  { %1037 = vmatmul.bf16.gmra.mxu2 %v913_v0  ;;  %v483_v1 = vpop.f32.mrf.mxu0 }
 0x133   :  { %v572_v2 = vpop.f32.mrf.mxu1 }
 0x134   :  { %v573_v8 = vadd.f32 %v572_v2, %v483_v1 }
 0x135   :  { %v998_v4 = vpop.f32.mrf.mxu2 }
 0x136   :  { %v999_v13 = vadd.f32 %v2431_v7, %v998_v4  ;;  %v824_v16 = vadd.f32 %v792_v9, %v573_v8  ;;  %v2070_v4 = vld [vmem:[%s2955_s2 + $0x60] sm:$0xff]  }
 0x137   :  { %v2045_v6 = vunpack.c.l.bf16 %v2070_v4  ;;  %v2046_v8 = vunpack.c.h.bf16 %v2070_v4 }
 0x138   :  { %v1078_v20 = vmax.f32 %v999_v13, 0.0 }
 0x13a   :  { %v485_v11 = vpop.f32.mrf.mxu0 }
 0x13b   :  { %v574_v12 = vpop.f32.mrf.mxu1 }
 0x13c   :  { %v575_v14 = vadd.f32 %v574_v12, %v485_v11  ;;  %v799_v11 = vmul.f32 %v2046_v8, %v2357_v19 }
 0x13d   :  { %v1000_v15 = vpop.f32.mrf.mxu2 }
 0x13e   :  { %v825_v17 = vadd.f32 %v793_v10, %v575_v14  ;;  %v1001_v18 = vadd.f32 %v2431_v7, %v1000_v15  ;;  %v798_v10 = vmul.f32 %v2045_v6, %v2357_v19 }
 0x140   :  { %v1079_v21 = vmax.f32 %v1001_v18, 0.0  ;;  %v914_v22 = vpack.c.bf16 %v825_v17, %v824_v16 }
 0x142   :  { %1042 = vmatmul.bf16.gmra.mxu2 %v914_v22  ;;  %v1110_v23 = vpack.c.bf16 %v1079_v21, %v1078_v20  ;;  %v488_v24 = vpop.f32.mrf.mxu0 }
 0x143   :  { %v577_v25 = vpop.f32.mrf.mxu1 }
 0x144   :  { %1202 = vmatmul.bf16.vlgmr.msra.gmra.mxu3 %v1110_v23  ;;  %v578_v30 = vadd.f32 %v577_v25, %v488_v24 }
 0x145   :  { %v1003_v27 = vpop.f32.mrf.mxu2 }
 0x146   :  { %v1004_v35 = vadd.f32 %v2431_v7, %v1003_v27  ;;  %v826_v38 = vadd.f32 %v794_v31, %v578_v30  ;;  %v2071_v27 = vld [vmem:[%s2955_s2 + $0x68] sm:$0xff]  }
 0x147   :  { %v2049_v29 = vunpack.c.l.bf16 %v2071_v27  ;;  %v2050_v30 = vunpack.c.h.bf16 %v2071_v27 }
 0x148   :  { %v1080_v41 = vmax.f32 %v1004_v35, 0.0 }
 0x14a   :  { %v490_v33 = vpop.f32.mrf.mxu0 }
 0x14b   :  { %v579_v34 = vpop.f32.mrf.mxu1 }
 0x14c   :  { %v580_v36 = vadd.f32 %v579_v34, %v490_v33  ;;  %v801_v33 = vmul.f32 %v2050_v30, %v2357_v19 }
 0x14d   :  { %v1005_v37 = vpop.f32.mrf.mxu2 }
 0x14e   :  { %v827_v39 = vadd.f32 %v795_v32, %v580_v36  ;;  %v1006_v40 = vadd.f32 %v2431_v7, %v1005_v37  ;;  %v800_v32 = vmul.f32 %v2049_v29, %v2357_v19 }
 0x150   :  { %v1081_v42 = vmax.f32 %v1006_v40, 0.0  ;;  %v915_v43 = vpack.c.bf16 %v827_v39, %v826_v38 }
 0x152   :  { %1047 = vmatmul.bf16.gmra.mxu2 %v915_v43  ;;  %v1111_v44 = vpack.c.bf16 %v1081_v42, %v1080_v41  ;;  %v493_v45 = vpop.f32.mrf.mxu0 }
 0x153   :  { %v582_v46 = vpop.f32.mrf.mxu1 }
 0x154   :  { %1207 = vmatmul.bf16.gmra.mxu3 %v1111_v44  ;;  %v583_v51 = vadd.f32 %v582_v46, %v493_v45 }
 0x155   :  { %v1008_v48 = vpop.f32.mrf.mxu2 }
 0x156   :  { %v1009_v56 = vadd.f32 %v2431_v7, %v1008_v48  ;;  %v828_v59 = vadd.f32 %v796_v52, %v583_v51  ;;  %v2072_v48 = vld [vmem:[%s2955_s2 + $0x70] sm:$0xff]  }
 0x157   :  { %v2053_v50 = vunpack.c.l.bf16 %v2072_v48  ;;  %v2054_v51 = vunpack.c.h.bf16 %v2072_v48 }
 0x158   :  { %v1082_v62 = vmax.f32 %v1009_v56, 0.0 }
 0x15a   :  { %v495_v54 = vpop.f32.mrf.mxu0 }
 0x15b   :  { %v584_v55 = vpop.f32.mrf.mxu1 }
 0x15c   :  { %v585_v57 = vadd.f32 %v584_v55, %v495_v54  ;;  %v803_v54 = vmul.f32 %v2054_v51, %v2357_v19 }
 0x15d   :  { %v1010_v58 = vpop.f32.mrf.mxu2 }
 0x15e   :  { %v829_v60 = vadd.f32 %v797_v53, %v585_v57  ;;  %v1011_v61 = vadd.f32 %v2431_v7, %v1010_v58  ;;  %v802_v53 = vmul.f32 %v2053_v50, %v2357_v19 }
 0x160   :  { %v1083_v63 = vmax.f32 %v1011_v61, 0.0  ;;  %v916_v0 = vpack.c.bf16 %v829_v60, %v828_v59 }
 0x162   :  { %1052 = vmatmul.bf16.gmra.mxu2 %v916_v0  ;;  %v1112_v1 = vpack.c.bf16 %v1083_v63, %v1082_v62  ;;  %v498_v2 = vpop.f32.mrf.mxu0 }
 0x163   :  { %v587_v3 = vpop.f32.mrf.mxu1 }
 0x164   :  { %1212 = vmatmul.bf16.gmra.mxu3 %v1112_v1  ;;  %v588_v9 = vadd.f32 %v587_v3, %v498_v2 }
 0x165   :  { %v1013_v5 = vpop.f32.mrf.mxu2 }
 0x166   :  { %v1014_v14 = vadd.f32 %v2431_v7, %v1013_v5  ;;  %v830_v17 = vadd.f32 %v798_v10, %v588_v9  ;;  %v2073_v5 = vld [vmem:[%s2955_s2 + $0x78] sm:$0xff]  }
 0x167   :  { %v2057_v8 = vunpack.c.l.bf16 %v2073_v5  ;;  %v2058_v9 = vunpack.c.h.bf16 %v2073_v5 }
 0x168   :  { %v1084_v21 = vmax.f32 %v1014_v14, 0.0 }
 0x16a   :  { %v500_v12 = vpop.f32.mrf.mxu0 }
 0x16b   :  { %v589_v13 = vpop.f32.mrf.mxu1 }
 0x16c   :  { %v590_v15 = vadd.f32 %v589_v13, %v500_v12  ;;  %v805_v12 = vmul.f32 %v2058_v9, %v2357_v19 }
 0x16d   :  { %v1015_v16 = vpop.f32.mrf.mxu2 }
 0x16e   :  { %v831_v18 = vadd.f32 %v799_v11, %v590_v15  ;;  %v1016_v20 = vadd.f32 %v2431_v7, %v1015_v16  ;;  %v804_v11 = vmul.f32 %v2057_v8, %v2357_v19 }
 0x170   :  { %v1085_v22 = vmax.f32 %v1016_v20, 0.0  ;;  %v917_v23 = vpack.c.bf16 %v831_v18, %v830_v17 }
 0x172   :  { %1057 = vmatmul.bf16.gmra.mxu2 %v917_v23  ;;  %v1113_v24 = vpack.c.bf16 %v1085_v22, %v1084_v21  ;;  %v503_v25 = vpop.f32.mrf.mxu0 }
 0x173   :  { %v592_v26 = vpop.f32.mrf.mxu1 }
 0x174   :  { %1217 = vmatmul.bf16.gmra.mxu3 %v1113_v24  ;;  %v593_v31 = vadd.f32 %v592_v26, %v503_v25 }
 0x175   :  { %v1018_v28 = vpop.f32.mrf.mxu2 }
 0x176   :  { %v1019_v36 = vadd.f32 %v2431_v7, %v1018_v28  ;;  %v832_v39 = vadd.f32 %v800_v32, %v593_v31 }
 0x178   :  { %v1086_v42 = vmax.f32 %v1019_v36, 0.0  ;;  %v1283_v36 = vlaneseq }
 0x17a   :  { %v505_v34 = vpop.f32.mrf.mxu0 }
 0x17b   :  { %v594_v35 = vpop.f32.mrf.mxu1 }
 0x17c   :  { %v595_v37 = vadd.f32 %v594_v35, %v505_v34 }
 0x17d   :  { %v1020_v38 = vpop.f32.mrf.mxu2 }
 0x17e   :  { %v833_v40 = vadd.f32 %v801_v33, %v595_v37  ;;  %v1021_v41 = vadd.f32 %v2431_v7, %v1020_v38 }
 0x180   :  { %v1087_v43 = vmax.f32 %v1021_v41, 0.0  ;;  %v918_v44 = vpack.c.bf16 %v833_v40, %v832_v39  ;;  %v2483_v40 = vand.u32 127, %v1283_v36  ;;  %v2488_v41 = vld [vmem:[%s2959_s6] ss:$0 sm:$0xff] }
 0x182   :  { %1062 = vmatmul.bf16.gmra.mxu2 %v918_v44  ;;  %v1114_v45 = vpack.c.bf16 %v1087_v43, %v1086_v42  ;;  %v508_v46 = vpop.f32.mrf.mxu0  ;;  %vm1285_vm0 = vcmp.lt.s32.totalorder %v2483_v40, 8 }
 0x183   :  { %v597_v47 = vpop.f32.mrf.mxu1 }
 0x184   :  { %1222 = vmatmul.bf16.gmra.mxu3 %v1114_v45  ;;  %v598_v52 = vadd.f32 %v597_v47, %v508_v46 }
 0x185   :  { %v1023_v49 = vpop.f32.mrf.mxu2 }
 0x186   :  { %v1024_v57 = vadd.f32 %v2431_v7, %v1023_v49  ;;  %v834_v60 = vadd.f32 %v802_v53, %v598_v52 }
 0x188   :  { %v1088_v63 = vmax.f32 %v1024_v57, 0.0 }
 0x18a   :  { %v510_v55 = vpop.f32.mrf.mxu0 }
 0x18b   :  { %v599_v56 = vpop.f32.mrf.mxu1 }
 0x18c   :  { %v600_v58 = vadd.f32 %v599_v56, %v510_v55 }
 0x18d   :  { %v1025_v59 = vpop.f32.mrf.mxu2 }
 0x18e   :  { %v835_v61 = vadd.f32 %v803_v54, %v600_v58  ;;  %v1026_v62 = vadd.f32 %v2431_v7, %v1025_v59 }
 0x190   :  { %v1089_v0 = vmax.f32 %v1026_v62, 0.0  ;;  %v919_v1 = vpack.c.bf16 %v835_v61, %v834_v60 }
 0x192   :  { %1067 = vmatmul.bf16.gmra.mxu2 %v919_v1  ;;  %v1115_v2 = vpack.c.bf16 %v1089_v0, %v1088_v63  ;;  %v513_v3 = vpop.f32.mrf.mxu0 }
 0x193   :  { %v602_v4 = vpop.f32.mrf.mxu1 }
 0x194   :  { %1227 = vmatmul.bf16.gmra.mxu3 %v1115_v2  ;;  %v603_v10 = vadd.f32 %v602_v4, %v513_v3 }
 0x195   :  { %v1028_v6 = vpop.f32.mrf.mxu2 }
 0x196   :  { %v1029_v15 = vadd.f32 %v2431_v7, %v1028_v6  ;;  %v836_v18 = vadd.f32 %v804_v11, %v603_v10 }
 0x198   :  { %v1090_v22 = vmax.f32 %v1029_v15, 0.0 }
 0x19a   :  { %v515_v13 = vpop.f32.mrf.mxu0 }
 0x19b   :  { %v604_v14 = vpop.f32.mrf.mxu1 }
 0x19c   :  { %v605_v16 = vadd.f32 %v604_v14, %v515_v13 }
 0x19d   :  { %v1030_v17 = vpop.f32.mrf.mxu2 }
 0x19e   :  { %v837_v20 = vadd.f32 %v805_v12, %v605_v16  ;;  %v1031_v21 = vadd.f32 %v2431_v7, %v1030_v17 }
 0x1a0   :  { %v1091_v23 = vmax.f32 %v1031_v21, 0.0  ;;  %v920_v24 = vpack.c.bf16 %v837_v20, %v836_v18 }
 0x1a2   :  { %1072 = vmatmul.bf16.gmra.mxu2 %v920_v24  ;;  %v1116_v25 = vpack.c.bf16 %v1091_v23, %v1090_v22 }
 0x1a4   :  { %1232 = vmatmul.bf16.gmra.mxu3 %v1116_v25 }
 0x1a5   :  { %v1033_v26 = vpop.f32.mrf.mxu2 }
 0x1a6   :  { %v1034_v27 = vadd.f32 %v2431_v7, %v1033_v26 }
 0x1a8   :  { %v1092_v29 = vmax.f32 %v1034_v27, 0.0 }
 0x1ad   :  { %v1035_v19 = vpop.f32.mrf.mxu2 }
 0x1ae   :  { %v1036_v28 = vadd.f32 %v2431_v7, %v1035_v19 }
 0x1b0   :  { %v1093_v30 = vmax.f32 %v1036_v28, 0.0 }
 0x1b2   :  { %v1117_v31 = vpack.c.bf16 %v1093_v30, %v1092_v29 }
 0x1b4   :  { %1237 = vmatmul.bf16.gmra.mxu3 %v1117_v31 }
 0x1b5   :  { %v1038_v32 = vpop.f32.mrf.mxu2 }
 0x1b6   :  { %v1039_v33 = vadd.f32 %v2431_v7, %v1038_v32 }
 0x1b8   :  { %v1094_v37 = vmax.f32 %v1039_v33, 0.0 }
 0x1bd   :  { %v1040_v34 = vpop.f32.mrf.mxu2 }
 0x1be   :  { %v1041_v35 = vadd.f32 %v2431_v7, %v1040_v34 }
 0x1c0   :  { %v1095_v38 = vmax.f32 %v1041_v35, 0.0 }
 0x1c2   :  { %v1118_v39 = vpack.c.bf16 %v1095_v38, %v1094_v37 }
 0x1c4   :  { %1242 = vmatmul.bf16.gmra.mxu3 %v1118_v39 }
 0x1c5   :  { %v1043_v42 = vpop.f32.mrf.mxu2 }
 0x1c6   :  { %v1044_v46 = vadd.f32 %v2431_v7, %v1043_v42 }
 0x1c7   :  { %v1203_v43 = vpop.f32.mrf.mxu3 }
 0x1c8   :  { %v1204_v44 = vadd.f32 %v2488_v41, %v1203_v43  ;;  %v1096_v50 = vmax.f32 %v1044_v46, 0.0 }
 0x1ca   :  { %v2494_v45 = vsel %vm1285_vm0, %v1204_v44, -1e+30 }
 0x1cb   :  { %1318 = vmax.xlane.f32.xlu0 %v2494_v45 }
 0x1cd   :  { %v1045_v47 = vpop.f32.mrf.mxu2 }
 0x1ce   :  { %v1046_v48 = vadd.f32 %v2431_v7, %v1045_v47 }
 0x1cf   :  { %v1205_v49 = vpop.f32.mrf.mxu3 }
 0x1d0   :  { %v1097_v51 = vmax.f32 %v1046_v48, 0.0  ;;  %v1206_v52 = vadd.f32 %v2488_v41, %v1205_v49 }
 0x1d2   :  { %v2502_v53 = vsel %vm1285_vm0, %v1206_v52, -1e+30  ;;  %v1119_v54 = vpack.c.bf16 %v1097_v51, %v1096_v50 }
 0x1d3   :  { %1320 = vmax.xlane.f32.xlu0 %v2502_v53 }
 0x1d4   :  { %1247 = vmatmul.bf16.gmra.mxu3 %v1119_v54 }
 0x1d5   :  { %v1048_v55 = vpop.f32.mrf.mxu2 }
 0x1d6   :  { %v1049_v59 = vadd.f32 %v2431_v7, %v1048_v55 }
 0x1d7   :  { %v1208_v56 = vpop.f32.mrf.mxu3 }
 0x1d8   :  { %v1209_v57 = vadd.f32 %v2488_v41, %v1208_v56  ;;  %v1098_v63 = vmax.f32 %v1049_v59, 0.0 }
 0x1da   :  { %v2508_v58 = vsel %vm1285_vm0, %v1209_v57, -1e+30 }
 0x1db   :  { %1322 = vmax.xlane.f32.xlu1 %v2508_v58 }
 0x1dd   :  { %v1050_v60 = vpop.f32.mrf.mxu2 }
 0x1de   :  { %v1051_v61 = vadd.f32 %v2431_v7, %v1050_v60 }
 0x1df   :  { %v1210_v62 = vpop.f32.mrf.mxu3 }
 0x1e0   :  { %v1099_v0 = vmax.f32 %v1051_v61, 0.0  ;;  %v1211_v1 = vadd.f32 %v2488_v41, %v1210_v62 }
 0x1e2   :  { %v2516_v2 = vsel %vm1285_vm0, %v1211_v1, -1e+30  ;;  %v1120_v3 = vpack.c.bf16 %v1099_v0, %v1098_v63 }
 0x1e3   :  { %1324 = vmax.xlane.f32.xlu1 %v2516_v2 }
 0x1e4   :  { %1252 = vmatmul.bf16.gmra.mxu3 %v1120_v3 }
 0x1e5   :  { %v1053_v4 = vpop.f32.mrf.mxu2 }
 0x1e6   :  { %v1054_v9 = vadd.f32 %v2431_v7, %v1053_v4 }
 0x1e7   :  { %v1213_v5 = vpop.f32.mrf.mxu3 }
 0x1e8   :  { %v1214_v6 = vadd.f32 %v2488_v41, %v1213_v5  ;;  %v1100_v13 = vmax.f32 %v1054_v9, 0.0 }
 0x1ea   :  { %v2522_v8 = vsel %vm1285_vm0, %v1214_v6, -1e+30 }
 0x1eb   :  { %1326 = vmax.xlane.f32.xlu2 %v2522_v8 }
 0x1ed   :  { %v1055_v10 = vpop.f32.mrf.mxu2 }
 0x1ee   :  { %v1056_v11 = vadd.f32 %v2431_v7, %v1055_v10 }
 0x1ef   :  { %v1215_v12 = vpop.f32.mrf.mxu3 }
 0x1f0   :  { %v1101_v14 = vmax.f32 %v1056_v11, 0.0  ;;  %v1216_v15 = vadd.f32 %v2488_v41, %v1215_v12 }
 0x1f2   :  { %v2530_v16 = vsel %vm1285_vm0, %v1216_v15, -1e+30  ;;  %v1121_v17 = vpack.c.bf16 %v1101_v14, %v1100_v13 }
 0x1f3   :  { %1328 = vmax.xlane.f32.xlu2 %v2530_v16 }
 0x1f4   :  { %1257 = vmatmul.bf16.gmra.mxu3 %v1121_v17 }
 0x1f5   :  { %v1058_v18 = vpop.f32.mrf.mxu2 }
 0x1f6   :  { %v1059_v23 = vadd.f32 %v2431_v7, %v1058_v18 }
 0x1f7   :  { %v1218_v20 = vpop.f32.mrf.mxu3 }
 0x1f8   :  { %v1219_v21 = vadd.f32 %v2488_v41, %v1218_v20  ;;  %v1102_v27 = vmax.f32 %v1059_v23, 0.0 }
 0x1fa   :  { %v2536_v22 = vsel %vm1285_vm0, %v1219_v21, -1e+30 }
 0x1fb   :  { %1330 = vmax.xlane.f32.xlu0 %v2536_v22 }
 0x1fd   :  { %v1060_v24 = vpop.f32.mrf.mxu2 }
 0x1fe   :  { %v1061_v25 = vadd.f32 %v2431_v7, %v1060_v24 }
 0x1ff   :  { %v1220_v26 = vpop.f32.mrf.mxu3 }
 0x200   :  { %v1103_v19 = vmax.f32 %v1061_v25, 0.0  ;;  %v1221_v28 = vadd.f32 %v2488_v41, %v1220_v26 }
 0x202   :  { %v1122_v29 = vpack.c.bf16 %v1103_v19, %v1102_v27  ;;  %v2544_v30 = vsel %vm1285_vm0, %v1221_v28, -1e+30 }
 0x203   :  { %1332 = vmax.xlane.f32.xlu1 %v2544_v30 }
 0x204   :  { %1262 = vmatmul.bf16.gmra.mxu3 %v1122_v29 }
 0x205   :  { %v1063_v31 = vpop.f32.mrf.mxu2 }
 0x206   :  { %v1064_v35 = vadd.f32 %v2431_v7, %v1063_v31 }
 0x207   :  { %v1223_v32 = vpop.f32.mrf.mxu3 }
 0x208   :  { %v1224_v33 = vadd.f32 %v2488_v41, %v1223_v32  ;;  %v1104_v39 = vmax.f32 %v1064_v35, 0.0 }
 0x20a   :  { %v2550_v34 = vsel %vm1285_vm0, %v1224_v33, -1e+30 }
 0x20b   :  { %1334 = vmax.xlane.f32.xlu2 %v2550_v34 }
 0x20d   :  { %v1065_v36 = vpop.f32.mrf.mxu2 }
 0x20e   :  { %v1066_v37 = vadd.f32 %v2431_v7, %v1065_v36 }
 0x20f   :  { %v1225_v38 = vpop.f32.mrf.mxu3 }
 0x210   :  { %v1105_v42 = vmax.f32 %v1066_v37, 0.0  ;;  %v1226_v43 = vadd.f32 %v2488_v41, %v1225_v38 }
 0x212   :  { %v1123_v44 = vpack.c.bf16 %v1105_v42, %v1104_v39  ;;  %v2558_v46 = vsel %vm1285_vm0, %v1226_v43, -1e+30 }
 0x213   :  { %1336 = vmax.xlane.f32.xlu0 %v2558_v46 }
 0x214   :  { %1267 = vmatmul.bf16.gmra.mxu3 %v1123_v44 }
 0x215   :  { %v1068_v47 = vpop.f32.mrf.mxu2 }
 0x216   :  { %v1069_v51 = vadd.f32 %v2431_v7, %v1068_v47 }
 0x217   :  { %v1228_v48 = vpop.f32.mrf.mxu3 }
 0x218   :  { %v1229_v49 = vadd.f32 %v2488_v41, %v1228_v48  ;;  %v1106_v56 = vmax.f32 %v1069_v51, 0.0 }
 0x21a   :  { %v2564_v50 = vsel %vm1285_vm0, %v1229_v49, -1e+30 }
 0x21b   :  { %1338 = vmax.xlane.f32.xlu1 %v2564_v50 }
 0x21d   :  { %v1070_v52 = vpop.f32.mrf.mxu2 }
 0x21e   :  { %v1071_v54 = vadd.f32 %v2431_v7, %v1070_v52 }
 0x21f   :  { %v1230_v55 = vpop.f32.mrf.mxu3 }
 0x220   :  { %v1107_v57 = vmax.f32 %v1071_v54, 0.0  ;;  %v1231_v59 = vadd.f32 %v2488_v41, %v1230_v55 }
 0x222   :  { %v1124_v60 = vpack.c.bf16 %v1107_v57, %v1106_v56  ;;  %v2572_v61 = vsel %vm1285_vm0, %v1231_v59, -1e+30 }
 0x223   :  { %1340 = vmax.xlane.f32.xlu2 %v2572_v61 }
 0x224   :  { %1272 = vmatmul.bf16.gmra.mxu3 %v1124_v60 }
 0x225   :  { %v1073_v62 = vpop.f32.mrf.mxu2 }
 0x226   :  { %v1074_v3 = vadd.f32 %v2431_v7, %v1073_v62 }
 0x227   :  { %v1233_v63 = vpop.f32.mrf.mxu3 }
 0x228   :  { %v1234_v0 = vadd.f32 %v2488_v41, %v1233_v63  ;;  %v1108_v9 = vmax.f32 %v1074_v3, 0.0 }
 0x22a   :  { %v2578_v1 = vsel %vm1285_vm0, %v1234_v0, -1e+30 }
 0x22b   :  { %1342 = vmax.xlane.f32.xlu0 %v2578_v1 }
 0x22d   :  { %v1075_v4 = vpop.f32.mrf.mxu2 }
 0x22e   :  { %v1076_v5 = vadd.f32 %v2431_v7, %v1075_v4 }
 0x22f   :  { %v1235_v6 = vpop.f32.mrf.mxu3 }
 0x230   :  { %v1109_v10 = vmax.f32 %v1076_v5, 0.0  ;;  %v1236_v11 = vadd.f32 %v2488_v41, %v1235_v6 }
 0x232   :  { %v1125_v12 = vpack.c.bf16 %v1109_v10, %v1108_v9  ;;  %v2586_v13 = vsel %vm1285_vm0, %v1236_v11, -1e+30 }
 0x233   :  { %1344 = vmax.xlane.f32.xlu1 %v2586_v13 }
 0x234   :  { %1277 = vmatmul.bf16.gmra.mxu3 %v1125_v12 }
 0x237   :  { %v1238_v14 = vpop.f32.mrf.mxu3 }
 0x238   :  { %v1239_v15 = vadd.f32 %v2488_v41, %v1238_v14 }
 0x23a   :  { %v2592_v17 = vsel %vm1285_vm0, %v1239_v15, -1e+30 }
 0x23b   :  { %1346 = vmax.xlane.f32.xlu2 %v2592_v17 }
 0x23e   :  { %v1319_v7 = vpop.xlane.xlu0 %1318 }
 0x23f   :  { %v2596_v18 = vsub.f32 %v2494_v45, %v1319_v7  ;;  %v1240_v20 = vpop.f32.mrf.mxu3 }
 0x240   :  { %v1241_v21 = vadd.f32 %v2488_v41, %v1240_v20 }
 0x241   :  { %v1414_v23 = vmul.f32 1.442695, %v2596_v18 }
 0x242   :  { %v2602_v24 = vsel %vm1285_vm0, %v1241_v21, -1e+30 }
 0x243   :  { %2079 = vpow2.f32 %v1414_v23  ;;  %1348 = vmax.xlane.f32.xlu0 %v2602_v24 }
 0x246   :  { %v1321_v25 = vpop.xlane.xlu0 %1320 }
 0x247   :  { %v2606_v26 = vsub.f32 %v2502_v53, %v1321_v25  ;;  %v1243_v27 = vpop.f32.mrf.mxu3 }
 0x248   :  { %v1244_v45 = vadd.f32 %v2488_v41, %v1243_v27 }
 0x249   :  { %v2080_v19 = vpop.eup %2079  ;;  %v1416_v28 = vmul.f32 1.442695, %v2606_v26 }
 0x24a   :  { %1478 = vadd.xlane.f32.xlu2 %v2080_v19  ;;  %v2612_v29 = vsel %vm1285_vm0, %v1244_v45, -1e+30 }
 0x24b   :  { %2081 = vpow2.f32 %v1416_v28  ;;  %1350 = vmax.xlane.f32.xlu1 %v2612_v29 }
 0x24e   :  { %v1323_v31 = vpop.xlane.xlu1 %1322 }
 0x24f   :  { %v2616_v32 = vsub.f32 %v2508_v58, %v1323_v31  ;;  %v1245_v53 = vpop.f32.mrf.mxu3 }
 0x250   :  { %v1246_v33 = vadd.f32 %v2488_v41, %v1245_v53 }
 0x251   :  { %v2082_v35 = vpop.eup %2081  ;;  %v1418_v36 = vmul.f32 1.442695, %v2616_v32 }
 0x252   :  { %1480 = vadd.xlane.f32.xlu0 %v2082_v35  ;;  %v2622_v37 = vsel %vm1285_vm0, %v1246_v33, -1e+30 }
 0x253   :  { %2083 = vpow2.f32 %v1418_v36  ;;  %1352 = vmax.xlane.f32.xlu2 %v2622_v37 }
 0x256   :  { %v1325_v38 = vpop.xlane.xlu1 %1324 }
 0x257   :  { %v2626_v39 = vsub.f32 %v2516_v2, %v1325_v38  ;;  %v1248_v58 = vpop.f32.mrf.mxu3 }
 0x258   :  { %v1249_v42 = vadd.f32 %v2488_v41, %v1248_v58 }
 0x259   :  { %v2084_v43 = vpop.eup %2083  ;;  %v1420_v44 = vmul.f32 1.442695, %v2626_v39 }
 0x25a   :  { %1482 = vadd.xlane.f32.xlu1 %v2084_v43  ;;  %v2632_v47 = vsel %vm1285_vm0, %v1249_v42, -1e+30 }
 0x25b   :  { %2085 = vpow2.f32 %v1420_v44  ;;  %1354 = vmax.xlane.f32.xlu0 %v2632_v47 }
 0x25e   :  { %v1327_v48 = vpop.xlane.xlu2 %1326 }
 0x25f   :  { %v2636_v49 = vsub.f32 %v2522_v8, %v1327_v48  ;;  %v1250_v2 = vpop.f32.mrf.mxu3 }
 0x260   :  { %v1251_v51 = vadd.f32 %v2488_v41, %v1250_v2 }
 0x261   :  { %v2086_v52 = vpop.eup %2085  ;;  %v1422_v54 = vmul.f32 1.442695, %v2636_v49 }
 0x262   :  { %1484 = vadd.xlane.f32.xlu2 %v2086_v52  ;;  %v2642_v55 = vsel %vm1285_vm0, %v1251_v51, -1e+30 }
 0x263   :  { %2087 = vpow2.f32 %v1422_v54  ;;  %1356 = vmax.xlane.f32.xlu1 %v2642_v55 }
 0x266   :  { %v1329_v56 = vpop.xlane.xlu2 %1328 }
 0x267   :  { %v2646_v57 = vsub.f32 %v2530_v16, %v1329_v56  ;;  %v1253_v8 = vpop.f32.mrf.mxu3 }
 0x268   :  { %v1254_v59 = vadd.f32 %v2488_v41, %v1253_v8 }
 0x269   :  { %v2088_v60 = vpop.eup %2087  ;;  %v1424_v62 = vmul.f32 1.442695, %v2646_v57 }
 0x26a   :  { %1486 = vadd.xlane.f32.xlu0 %v2088_v60  ;;  %v2652_v63 = vsel %vm1285_vm0, %v1254_v59, -1e+30 }
 0x26b   :  { %2089 = vpow2.f32 %v1424_v62  ;;  %1358 = vmax.xlane.f32.xlu2 %v2652_v63 }
 0x26e   :  { %v1331_v0 = vpop.xlane.xlu0 %1330 }
 0x26f   :  { %v2656_v3 = vsub.f32 %v2536_v22, %v1331_v0  ;;  %v1255_v16 = vpop.f32.mrf.mxu3 }
 0x270   :  { %v1256_v4 = vadd.f32 %v2488_v41, %v1255_v16 }
 0x271   :  { %v2090_v5 = vpop.eup %2089  ;;  %v1426_v6 = vmul.f32 1.442695, %v2656_v3 }
 0x272   :  { %1488 = vadd.xlane.f32.xlu1 %v2090_v5  ;;  %v2662_v9 = vsel %vm1285_vm0, %v1256_v4, -1e+30 }
 0x273   :  { %2091 = vpow2.f32 %v1426_v6  ;;  %1360 = vmax.xlane.f32.xlu0 %v2662_v9 }
 0x276   :  { %v1333_v10 = vpop.xlane.xlu1 %1332 }
 0x277   :  { %v2666_v11 = vsub.f32 %v2544_v30, %v1333_v10  ;;  %v1258_v22 = vpop.f32.mrf.mxu3 }
 0x278   :  { %v1259_v12 = vadd.f32 %v2488_v41, %v1258_v22 }
 0x279   :  { %v2092_v14 = vpop.eup %2091  ;;  %v1428_v15 = vmul.f32 1.442695, %v2666_v11 }
 0x27a   :  { %1490 = vadd.xlane.f32.xlu2 %v2092_v14  ;;  %v2672_v7 = vsel %vm1285_vm0, %v1259_v12, -1e+30 }
 0x27b   :  { %2093 = vpow2.f32 %v1428_v15  ;;  %1362 = vmax.xlane.f32.xlu1 %v2672_v7 }
 0x27e   :  { %v1335_v20 = vpop.xlane.xlu2 %1334 }
 0x27f   :  { %v2676_v21 = vsub.f32 %v2550_v34, %v1335_v20  ;;  %v1260_v30 = vpop.f32.mrf.mxu3 }
 0x280   :  { %v1261_v23 = vadd.f32 %v2488_v41, %v1260_v30 }
 0x281   :  { %v2094_v25 = vpop.eup %2093  ;;  %v1430_v27 = vmul.f32 1.442695, %v2676_v21 }
 0x282   :  { %1492 = vadd.xlane.f32.xlu0 %v2094_v25  ;;  %v2682_v45 = vsel %vm1285_vm0, %v1261_v23, -1e+30 }
 0x283   :  { %2095 = vpow2.f32 %v1430_v27  ;;  %1364 = vmax.xlane.f32.xlu2 %v2682_v45 }
 0x286   :  { %v1337_v19 = vpop.xlane.xlu0 %1336 }
 0x287   :  { %v2686_v28 = vsub.f32 %v2558_v46, %v1337_v19  ;;  %v1263_v34 = vpop.f32.mrf.mxu3 }
 0x288   :  { %v1264_v31 = vadd.f32 %v2488_v41, %v1263_v34 }
 0x289   :  { %v2096_v53 = vpop.eup %2095  ;;  %v1432_v33 = vmul.f32 1.442695, %v2686_v28 }
 0x28a   :  { %1494 = vadd.xlane.f32.xlu1 %v2096_v53  ;;  %v2692_v35 = vsel %vm1285_vm0, %v1264_v31, -1e+30 }
 0x28b   :  { %2097 = vpow2.f32 %v1432_v33  ;;  %1366 = vmax.xlane.f32.xlu0 %v2692_v35 }
 0x28e   :  { %v1339_v36 = vpop.xlane.xlu1 %1338 }
 0x28f   :  { %v2696_v38 = vsub.f32 %v2564_v50, %v1339_v36  ;;  %v1265_v46 = vpop.f32.mrf.mxu3 }
 0x290   :  { %v1266_v58 = vadd.f32 %v2488_v41, %v1265_v46 }
 0x291   :  { %v2098_v42 = vpop.eup %2097  ;;  %v1434_v43 = vmul.f32 1.442695, %v2696_v38 }
 0x292   :  { %1496 = vadd.xlane.f32.xlu2 %v2098_v42  ;;  %v2702_v44 = vsel %vm1285_vm0, %v1266_v58, -1e+30 }
 0x293   :  { %2099 = vpow2.f32 %v1434_v43  ;;  %1368 = vmax.xlane.f32.xlu1 %v2702_v44 }
 0x296   :  { %v1341_v16 = vpop.xlane.xlu2 %1340 }
 0x297   :  { %v1268_v48 = vpop.f32.mrf.mxu3 }
 0x298   :  { %v1269_v2 = vadd.f32 %v2488_v41, %v1268_v48 }
 0x299   :  { %v2100_v51 = vpop.eup %2099 }
 0x29a   :  { %1498 = vadd.xlane.f32.xlu0 %v2100_v51  ;;  %v2708_v50 = vsel %vm1285_vm0, %v1269_v2, -1e+30 }
 0x29b   :  { %1370 = vmax.xlane.f32.xlu2 %v2708_v50 }
 0x29e   :  { %v1343_v60 = vpop.xlane.xlu0 %1342 }
 0x29f   :  { %v1270_v52 = vpop.f32.mrf.mxu3  ;;  %v2724_v0 = vsub.f32 %v2578_v1, %v1343_v60 }
 0x2a0   :  { %v1271_v54 = vadd.f32 %v2488_v41, %v1270_v52 }
 0x2a1   :  { %v1438_v5 = vmul.f32 1.442695, %v2724_v0 }
 0x2a2   :  { %v2714_v56 = vsel %vm1285_vm0, %v1271_v54, -1e+30 }
 0x2a3   :  { %1372 = vmax.xlane.f32.xlu0 %v2714_v56  ;;  %2101 = vpow2.f32 %v1438_v5 }
 0x2a6   :  { %v1345_v10 = vpop.xlane.xlu1 %1344 }
 0x2a7   :  { %v1273_v8 = vpop.f32.mrf.mxu3  ;;  %v2734_v12 = vsub.f32 %v2586_v13, %v1345_v10  ;;  %v2748_v13 = vsub.f32 %v2572_v61, %v1341_v16 }
 0x2a8   :  { %v1274_v59 = vadd.f32 %v2488_v41, %v1273_v8 }
 0x2a9   :  { %v1440_v30 = vmul.f32 1.442695, %v2734_v12  ;;  %v2102_v27 = vpop.eup %2101  ;;  %v1436_v33 = vmul.f32 1.442695, %v2748_v13 }
 0x2aa   :  { %v2720_v62 = vsel %vm1285_vm0, %v1274_v59, -1e+30 }
 0x2ab   :  { %1374 = vmax.xlane.f32.xlu1 %v2720_v62 }
 0x2ae   :  { %v1347_v14 = vpop.xlane.xlu2 %1346 }
 0x2af   :  { %v1275_v4 = vpop.f32.mrf.mxu3 }
 0x2b0   :  { %v1276_v6 = vadd.f32 %v2488_v41, %v1275_v4 }
 0x2b2   :  { %v2730_v22 = vsel %vm1285_vm0, %v1276_v6, -1e+30 }
 0x2b3   :  { %1376 = vmax.xlane.f32.xlu2 %v2730_v22 }
 0x2b6   :  { %v1349_v1 = vpop.xlane.xlu0 %1348 }
 0x2b7   :  { %v2737_v15 = vsub.f32 %v2602_v24, %v1349_v1  ;;  %v1278_v20 = vpop.f32.mrf.mxu3 }
 0x2b8   :  { %v1279_v23 = vadd.f32 %v2488_v41, %v1278_v20 }
 0x2b9   :  { %v1444_v25 = vmul.f32 1.442695, %v2737_v15 }
 0x2ba   :  { %v2744_v19 = vsel %vm1285_vm0, %v1279_v23, -1e+30 }
 0x2bb   :  { %2103 = vpow2.f32 %v1444_v25  ;;  %1378 = vmax.xlane.f32.xlu0 %v2744_v19  ;;  %1502 = vadd.xlane.f32.xlu2 %v2102_v27 }
 0x2bc   :  { %2105 = vpow2.f32 %v1440_v30 }
 0x2bd   :  { %v1479_v24 = vpop.xlane.xlu2 %1478 }
 0x2be   :  { %2107 = vlog2.f32 %v1479_v24  ;;  %v1351_v34 = vpop.xlane.xlu1 %1350 }
 0x2bf   :  { %v2751_v31 = vsub.f32 %v2612_v29, %v1351_v34  ;;  %v1280_v53 = vpop.f32.mrf.mxu3  ;;  %v2762_v29 = vsub.f32 %v2592_v17, %v1347_v14 }
 0x2c0   :  { %v1281_v36 = vadd.f32 %v2488_v41, %v1280_v53 }
 0x2c1   :  { %v2104_v46 = vpop.eup %2103  ;;  %v1446_v58 = vmul.f32 1.442695, %v2751_v31  ;;  %v1442_v51 = vmul.f32 1.442695, %v2762_v29 }
 0x2c2   :  { %v2106_v42 = vpop.eup %2105  ;;  %v2758_v61 = vsel %vm1285_vm0, %v1281_v36, -1e+30 }
 0x2c3   :  { %2109 = vpow2.f32 %v1446_v58  ;;  %1380 = vmax.xlane.f32.xlu1 %v2758_v61  ;;  %1504 = vadd.xlane.f32.xlu0 %v2106_v42 }
 0x2c4   :  { %v2108_v43 = vpop.eup %2107  ;;  %2111 = vpow2.f32 %v1436_v33  ;;  %1508 = vadd.xlane.f32.xlu2 %v2104_v46 }
 0x2c5   :  { %v1543_v48 = vmul.f32 0.6931472, %v2108_v43  ;;  %v1481_v41 = vpop.xlane.xlu0 %1480 }
 0x2c6   :  { %2113 = vlog2.f32 %v1481_v41  ;;  %v1353_v52 = vpop.xlane.xlu2 %1352 }
 0x2c7   :  { %v1606_v2 = vsub.f32 %v2596_v18, %v1543_v48  ;;  %2115 = vpow2.f32 %v1442_v51  ;;  %v2770_v17 = vsub.f32 %v2622_v37, %v1353_v52 }
 0x2c9   :  { %v2110_v40 = vpop.eup %2109  ;;  %1638 = vst [vmem:[%s2960_s7] sm:$0xff] %v1606_v2  ;;  %v1448_v5 = vmul.f32 1.442695, %v2770_v17 }
 0x2ca   :  { %v2112_v54 = vpop.eup %2111 }
 0x2cb   :  { %1500 = vadd.xlane.f32.xlu1 %v2112_v54  ;;  %1510 = vadd.xlane.f32.xlu0 %v2110_v40 }
 0x2cc   :  { %v2114_v8 = vpop.eup %2113 }
 0x2cd   :  { %v1545_v59 = vmul.f32 0.6931472, %v2114_v8  ;;  %v1483_v60 = vpop.xlane.xlu1 %1482  ;;  %v2116_v10 = vpop.eup %2115 }
 0x2ce   :  { %2117 = vlog2.f32 %v1483_v60  ;;  %v1355_v18 = vpop.xlane.xlu0 %1354 }
 0x2cf   :  { %v1607_v16 = vsub.f32 %v2606_v26, %v1545_v59  ;;  %v2774_v4 = vsub.f32 %v2632_v47, %v1355_v18 }
 0x2d1   :  { %1639 = vst [vmem:[%s2960_s7 + $0x8] sm:$0xff] %v1607_v16  ;;  %v1450_v6 = vmul.f32 1.442695, %v2774_v4 }
 0x2d3   :  { %2119 = vpow2.f32 %v1450_v6  ;;  %1506 = vadd.xlane.f32.xlu1 %v2116_v10 }
 0x2d4   :  { %v2118_v37 = vpop.eup %2117  ;;  %2121 = vpow2.f32 %v1448_v5 }
 0x2d5   :  { %v1547_v14 = vmul.f32 0.6931472, %v2118_v37  ;;  %v1485_v1 = vpop.xlane.xlu2 %1484 }
 0x2d6   :  { %2123 = vlog2.f32 %v1485_v1  ;;  %v1357_v26 = vpop.xlane.xlu1 %1356 }
 0x2d7   :  { %v1608_v47 = vsub.f32 %v2616_v32, %v1547_v14  ;;  %v2783_v20 = vsub.f32 %v2642_v55, %v1357_v26 }
 0x2d9   :  { %v2120_v30 = vpop.eup %2119  ;;  %1640 = vst [vmem:[%s2960_s7 + $0x10] sm:$0xff] %v1608_v47  ;;  %v1452_v23 = vmul.f32 1.442695, %v2783_v20 }
 0x2da   :  { %v2122_v25 = vpop.eup %2121  ;;  %1514 = vadd.xlane.f32.xlu2 %v2120_v30 }
 0x2db   :  { %2125 = vpow2.f32 %v1452_v23  ;;  %1512 = vadd.xlane.f32.xlu1 %v2122_v25 }
 0x2dc   :  { %v2124_v27 = vpop.eup %2123 }
 0x2dd   :  { %v1549_v24 = vmul.f32 0.6931472, %v2124_v27  ;;  %v1487_v34 = vpop.xlane.xlu0 %1486 }
 0x2de   :  { %2127 = vlog2.f32 %v1487_v34  ;;  %v1359_v53 = vpop.xlane.xlu2 %1358 }
 0x2df   :  { %v1609_v32 = vsub.f32 %v2626_v39, %v1549_v24  ;;  %v2791_v55 = vsub.f32 %v2652_v63, %v1359_v53 }
 0x2e1   :  { %v2126_v33 = vpop.eup %2125  ;;  %1641 = vst [vmem:[%s2960_s7 + $0x18] sm:$0xff] %v1609_v32  ;;  %v1454_v36 = vmul.f32 1.442695, %v2791_v55 }
 0x2e2   :  { %1516 = vadd.xlane.f32.xlu0 %v2126_v33 }
 0x2e3   :  { %2129 = vpow2.f32 %v1454_v36 }
 0x2e4   :  { %v2128_v46 = vpop.eup %2127 }
 0x2e5   :  { %v1551_v58 = vmul.f32 0.6931472, %v2128_v46  ;;  %v1489_v42 = vpop.xlane.xlu1 %1488 }
 0x2e6   :  { %2131 = vlog2.f32 %v1489_v42  ;;  %v1361_v43 = vpop.xlane.xlu0 %1360 }
 0x2e7   :  { %v1610_v48 = vsub.f32 %v2636_v49, %v1551_v58  ;;  %v2799_v39 = vsub.f32 %v2662_v9, %v1361_v43 }
 0x2e9   :  { %v2130_v63 = vpop.eup %2129  ;;  %1642 = vst [vmem:[%s2960_s7 + $0x20] sm:$0xff] %v1610_v48  ;;  %v1456_v41 = vmul.f32 1.442695, %v2799_v39 }
 0x2ea   :  { %1518 = vadd.xlane.f32.xlu1 %v2130_v63 }
 0x2eb   :  { %2133 = vpow2.f32 %v1456_v41 }
 0x2ec   :  { %v2132_v2 = vpop.eup %2131 }
 0x2ed   :  { %v1553_v51 = vmul.f32 0.6931472, %v2132_v2  ;;  %v1491_v40 = vpop.xlane.xlu2 %1490 }
 0x2ee   :  { %2135 = vlog2.f32 %v1491_v40  ;;  %v1363_v52 = vpop.xlane.xlu1 %1362 }
 0x2ef   :  { %v1611_v54 = vsub.f32 %v2646_v57, %v1553_v51  ;;  %v2807_v49 = vsub.f32 %v2672_v7, %v1363_v52 }
 0x2f1   :  { %v2134_v9 = vpop.eup %2133  ;;  %1643 = vst [vmem:[%s2960_s7 + $0x28] sm:$0xff] %v1611_v54  ;;  %v1458_v8 = vmul.f32 1.442695, %v2807_v49 }
 0x2f2   :  { %1520 = vadd.xlane.f32.xlu2 %v2134_v9 }
 0x2f3   :  { %2137 = vpow2.f32 %v1458_v8 }
 0x2f4   :  { %v2136_v59 = vpop.eup %2135 }
 0x2f5   :  { %v1555_v60 = vmul.f32 0.6931472, %v2136_v59  ;;  %v1493_v18 = vpop.xlane.xlu0 %1492 }
 0x2f6   :  { %2139 = vlog2.f32 %v1493_v18  ;;  %v1365_v16 = vpop.xlane.xlu2 %1364 }
 0x2f7   :  { %v1612_v5 = vsub.f32 %v2656_v3, %v1555_v60  ;;  %v2815_v57 = vsub.f32 %v2682_v45, %v1365_v16 }
 0x2f9   :  { %v2138_v7 = vpop.eup %2137  ;;  %1644 = vst [vmem:[%s2960_s7 + $0x30] sm:$0xff] %v1612_v5  ;;  %v1460_v6 = vmul.f32 1.442695, %v2815_v57 }
 0x2fa   :  { %1522 = vadd.xlane.f32.xlu0 %v2138_v7 }
 0x2fb   :  { %2141 = vpow2.f32 %v1460_v6 }
 0x2fc   :  { %v2140_v10 = vpop.eup %2139 }
 0x2fd   :  { %v1557_v37 = vmul.f32 0.6931472, %v2140_v10  ;;  %v1495_v14 = vpop.xlane.xlu1 %1494 }
 0x2fe   :  { %2143 = vlog2.f32 %v1495_v14  ;;  %v1367_v1 = vpop.xlane.xlu0 %1366 }
 0x2ff   :  { %v1613_v26 = vsub.f32 %v2666_v11, %v1557_v37  ;;  %v2823_v3 = vsub.f32 %v2692_v35, %v1367_v1 }
 0x301   :  { %v2142_v45 = vpop.eup %2141  ;;  %1645 = vst [vmem:[%s2960_s7 + $0x38] sm:$0xff] %v1613_v26  ;;  %v1462_v47 = vmul.f32 1.442695, %v2823_v3 }
 0x302   :  { %1524 = vadd.xlane.f32.xlu1 %v2142_v45 }
 0x303   :  { %2145 = vpow2.f32 %v1462_v47 }
 0x304   :  { %v2144_v30 = vpop.eup %2143 }
 0x305   :  { %v1559_v23 = vmul.f32 0.6931472, %v2144_v30  ;;  %v1497_v25 = vpop.xlane.xlu2 %1496 }
 0x306   :  { %2147 = vlog2.f32 %v1497_v25  ;;  %v1369_v27 = vpop.xlane.xlu1 %1368 }
 0x307   :  { %v1614_v24 = vsub.f32 %v2676_v21, %v1559_v23  ;;  %v2831_v11 = vsub.f32 %v2702_v44, %v1369_v27 }
 0x309   :  { %v2146_v35 = vpop.eup %2145  ;;  %1646 = vst [vmem:[%s2960_s7 + $0x40] sm:$0xff] %v1614_v24  ;;  %v1464_v34 = vmul.f32 1.442695, %v2831_v11 }
 0x30a   :  { %1526 = vadd.xlane.f32.xlu2 %v2146_v35 }
 0x30b   :  { %2149 = vpow2.f32 %v1464_v34 }
 0x30c   :  { %v2148_v53 = vpop.eup %2147 }
 0x30d   :  { %v1561_v32 = vmul.f32 0.6931472, %v2148_v53  ;;  %v1499_v33 = vpop.xlane.xlu0 %1498 }
 0x30e   :  { %2151 = vlog2.f32 %v1499_v33  ;;  %v1371_v36 = vpop.xlane.xlu2 %1370 }
 0x30f   :  { %v1615_v46 = vsub.f32 %v2686_v28, %v1561_v32  ;;  %v2839_v21 = vsub.f32 %v2708_v50, %v1371_v36 }
 0x311   :  { %v2150_v44 = vpop.eup %2149  ;;  %1647 = vst [vmem:[%s2960_s7 + $0x48] sm:$0xff] %v1615_v46  ;;  %v1466_v58 = vmul.f32 1.442695, %v2839_v21 }
 0x312   :  { %1528 = vadd.xlane.f32.xlu0 %v2150_v44 }
 0x313   :  { %2153 = vpow2.f32 %v1466_v58 }
 0x314   :  { %v2152_v42 = vpop.eup %2151 }
 0x315   :  { %v1563_v43 = vmul.f32 0.6931472, %v2152_v42 }
 0x316   :  { %v1373_v48 = vpop.xlane.xlu0 %1372 }
 0x317   :  { %v1616_v63 = vsub.f32 %v2696_v38, %v1563_v43  ;;  %v2847_v41 = vsub.f32 %v2714_v56, %v1373_v48 }
 0x319   :  { %v2154_v28 = vpop.eup %2153  ;;  %1648 = vst [vmem:[%s2960_s7 + $0x50] sm:$0xff] %v1616_v63  ;;  %v1468_v50 = vmul.f32 1.442695, %v2847_v41 }
 0x31a   :  { %1530 = vadd.xlane.f32.xlu1 %v2154_v28 }
 0x31b   :  { %2155 = vpow2.f32 %v1468_v50 }
 0x31e   :  { %v1375_v2 = vpop.xlane.xlu1 %1374 }
 0x31f   :  { %v2854_v51 = vsub.f32 %v2720_v62, %v1375_v2 }
 0x321   :  { %v2156_v40 = vpop.eup %2155  ;;  %v1470_v52 = vmul.f32 1.442695, %v2854_v51 }
 0x322   :  { %1532 = vadd.xlane.f32.xlu2 %v2156_v40 }
 0x323   :  { %2157 = vpow2.f32 %v1470_v52 }
 0x326   :  { %v1377_v38 = vpop.xlane.xlu2 %1376 }
 0x327   :  { %v2858_v56 = vsub.f32 %v2730_v22, %v1377_v38 }
 0x329   :  { %v2158_v54 = vpop.eup %2157  ;;  %v1472_v9 = vmul.f32 1.442695, %v2858_v56 }
 0x32a   :  { %1534 = vadd.xlane.f32.xlu0 %v2158_v54 }
 0x32b   :  { %2159 = vpow2.f32 %v1472_v9 }
 0x32e   :  { %v1503_v8 = vpop.xlane.xlu2 %1502  ;;  %v1379_v59 = vpop.xlane.xlu0 %1378 }
 0x32f   :  { %2161 = vlog2.f32 %v1503_v8  ;;  %v2862_v62 = vsub.f32 %v2744_v19, %v1379_v59 }
 0x331   :  { %v2160_v60 = vpop.eup %2159  ;;  %v1474_v18 = vmul.f32 1.442695, %v2862_v62 }
 0x332   :  { %1536 = vadd.xlane.f32.xlu1 %v2160_v60 }
 0x333   :  { %2163 = vpow2.f32 %v1474_v18 }
 0x335   :  { %v2162_v16 = vpop.eup %2161 }
 0x336   :  { %v1567_v5 = vmul.f32 0.6931472, %v2162_v16  ;;  %v1381_v22 = vpop.xlane.xlu1 %1380  ;;  %v1505_v7 = vpop.xlane.xlu0 %1504 }
 0x337   :  { %v2866_v6 = vsub.f32 %v2758_v61, %v1381_v22  ;;  %v1509_v10 = vpop.xlane.xlu2 %1508  ;;  %2165 = vlog2.f32 %v1505_v7 }
 0x338   :  { %v1618_v37 = vsub.f32 %v2724_v0, %v1567_v5  ;;  %2167 = vlog2.f32 %v1509_v10 }
 0x339   :  { %v2164_v14 = vpop.eup %2163  ;;  %v1476_v19 = vmul.f32 1.442695, %v2866_v6 }
 0x33a   :  { %1650 = vst [vmem:[%s2960_s7 + $0x60] sm:$0xff] %v1618_v37  ;;  %1538 = vadd.xlane.f32.xlu2 %v2164_v14 }
 0x33b   :  { %2169 = vpow2.f32 %v1476_v19 }
 0x33d   :  { %v2166_v1 = vpop.eup %2165 }
 0x33e   :  { %v2168_v26 = vpop.eup %2167  ;;  %v1569_v45 = vmul.f32 0.6931472, %v2166_v1  ;;  %v1501_v47 = vpop.xlane.xlu1 %1500 }
 0x33f   :  { %v1511_v61 = vpop.xlane.xlu0 %1510  ;;  %v1573_v30 = vmul.f32 0.6931472, %v2168_v26  ;;  %2171 = vlog2.f32 %v1501_v47 }
 0x340   :  { %v1619_v23 = vsub.f32 %v2734_v12, %v1569_v45  ;;  %2173 = vlog2.f32 %v1511_v61 }
 0x341   :  { %v2170_v0 = vpop.eup %2169  ;;  %v1621_v25 = vsub.f32 %v2737_v15, %v1573_v30 }
 0x342   :  { %1651 = vst [vmem:[%s2960_s7 + $0x68] sm:$0xff] %v1619_v23  ;;  %1540 = vadd.xlane.f32.xlu0 %v2170_v0 }
 0x343   :  { %1653 = vst [vmem:[%s2960_s7 + $0x78] sm:$0xff] %v1621_v25 }
 0x345   :  { %v2172_v27 = vpop.eup %2171 }
 0x346   :  { %v2174_v24 = vpop.eup %2173  ;;  %v1565_v35 = vmul.f32 0.6931472, %v2172_v27  ;;  %v1507_v34 = vpop.xlane.xlu1 %1506 }
 0x347   :  { %v1575_v53 = vmul.f32 0.6931472, %v2174_v24  ;;  %2175 = vlog2.f32 %v1507_v34 }
 0x348   :  { %v1617_v12 = vsub.f32 %v2748_v13, %v1565_v35 }
 0x349   :  { %v1622_v32 = vsub.f32 %v2751_v31, %v1575_v53 }
 0x34a   :  { %1649 = vst [vmem:[%s2960_s7 + $0x58] sm:$0xff] %v1617_v12 }
 0x34b   :  { %1654 = vst [vmem:[%s2960_s7 + $0x80] sm:$0xff] %v1622_v32 }
 0x34d   :  { %v2176_v15 = vpop.eup %2175  ;;  %v1515_v33 = vpop.xlane.xlu2 %1514 }
 0x34e   :  { %v1571_v36 = vmul.f32 0.6931472, %v2176_v15  ;;  %2177 = vlog2.f32 %v1515_v33  ;;  %v1513_v46 = vpop.xlane.xlu1 %1512 }
 0x34f   :  { %2179 = vlog2.f32 %v1513_v46 }
 0x350   :  { %v1620_v44 = vsub.f32 %v2762_v29, %v1571_v36 }
 0x352   :  { %1652 = vst [vmem:[%s2960_s7 + $0x70] sm:$0xff] %v1620_v44 }
 0x354   :  { %v2178_v13 = vpop.eup %2177 }
 0x355   :  { %v2180_v31 = vpop.eup %2179  ;;  %v1579_v58 = vmul.f32 0.6931472, %v2178_v13  ;;  %v1517_v42 = vpop.xlane.xlu0 %1516 }
 0x356   :  { %v1577_v43 = vmul.f32 0.6931472, %v2180_v31  ;;  %2181 = vlog2.f32 %v1517_v42 }
 0x357   :  { %v1624_v48 = vsub.f32 %v2774_v4, %v1579_v58 }
 0x358   :  { %v1623_v63 = vsub.f32 %v2770_v17, %v1577_v43 }
 0x359   :  { %1656 = vst [vmem:[%s2960_s7 + $0x90] sm:$0xff] %v1624_v48 }
 0x35a   :  { %1655 = vst [vmem:[%s2960_s7 + $0x88] sm:$0xff] %v1623_v63 }
 0x35c   :  { %v2182_v29 = vpop.eup %2181 }
 0x35d   :  { %v1581_v28 = vmul.f32 0.6931472, %v2182_v29  ;;  %v1519_v50 = vpop.xlane.xlu1 %1518 }
 0x35e   :  { %2183 = vlog2.f32 %v1519_v50 }
 0x35f   :  { %v1625_v2 = vsub.f32 %v2783_v20, %v1581_v28 }
 0x361   :  { %1657 = vst [vmem:[%s2960_s7 + $0x98] sm:$0xff] %v1625_v2 }
 0x364   :  { %v2184_v4 = vpop.eup %2183 }
 0x365   :  { %v1583_v17 = vmul.f32 0.6931472, %v2184_v4  ;;  %v1521_v40 = vpop.xlane.xlu2 %1520 }
 0x366   :  { %2185 = vlog2.f32 %v1521_v40 }
 0x367   :  { %v1626_v52 = vsub.f32 %v2791_v55, %v1583_v17 }
 0x369   :  { %1658 = vst [vmem:[%s2960_s7 + $0xa0] sm:$0xff] %v1626_v52 }
 0x36c   :  { %v2186_v38 = vpop.eup %2185 }
 0x36d   :  { %v1585_v54 = vmul.f32 0.6931472, %v2186_v38  ;;  %v1523_v9 = vpop.xlane.xlu0 %1522 }
 0x36e   :  { %2187 = vlog2.f32 %v1523_v9 }
 0x36f   :  { %v1627_v20 = vsub.f32 %v2799_v39, %v1585_v54 }
 0x371   :  { %1659 = vst [vmem:[%s2960_s7 + $0xa8] sm:$0xff] %v1627_v20 }
 0x374   :  { %v2188_v8 = vpop.eup %2187 }
 0x375   :  { %v1587_v59 = vmul.f32 0.6931472, %v2188_v8  ;;  %v1525_v60 = vpop.xlane.xlu1 %1524 }
 0x376   :  { %2189 = vlog2.f32 %v1525_v60 }
 0x377   :  { %v1628_v55 = vsub.f32 %v2807_v49, %v1587_v59 }
 0x379   :  { %1660 = vst [vmem:[%s2960_s7 + $0xb0] sm:$0xff] %v1628_v55 }
 0x37c   :  { %v2190_v18 = vpop.eup %2189 }
 0x37d   :  { %v1589_v16 = vmul.f32 0.6931472, %v2190_v18  ;;  %v1527_v5 = vpop.xlane.xlu2 %1526 }
 0x37e   :  { %2191 = vlog2.f32 %v1527_v5 }
 0x37f   :  { %v1629_v39 = vsub.f32 %v2815_v57, %v1589_v16 }
 0x381   :  { %1661 = vst [vmem:[%s2960_s7 + $0xb8] sm:$0xff] %v1629_v39 }
 0x384   :  { %v2192_v22 = vpop.eup %2191 }
 0x385   :  { %v1591_v7 = vmul.f32 0.6931472, %v2192_v22  ;;  %v1529_v10 = vpop.xlane.xlu0 %1528 }
 0x386   :  { %2193 = vlog2.f32 %v1529_v10 }
 0x387   :  { %v1630_v49 = vsub.f32 %v2823_v3, %v1591_v7 }
 0x389   :  { %1662 = vst [vmem:[%s2960_s7 + $0xc0] sm:$0xff] %v1630_v49 }
 0x38c   :  { %v2194_v37 = vpop.eup %2193 }
 0x38d   :  { %v1593_v14 = vmul.f32 0.6931472, %v2194_v37  ;;  %v1531_v19 = vpop.xlane.xlu1 %1530 }
 0x38e   :  { %2195 = vlog2.f32 %v1531_v19 }
 0x38f   :  { %v1631_v57 = vsub.f32 %v2831_v11, %v1593_v14 }
 0x391   :  { %1663 = vst [vmem:[%s2960_s7 + $0xc8] sm:$0xff] %v1631_v57 }
 0x394   :  { %v2196_v1 = vpop.eup %2195 }
 0x395   :  { %v1595_v26 = vmul.f32 0.6931472, %v2196_v1  ;;  %v1533_v45 = vpop.xlane.xlu2 %1532 }
 0x396   :  { %2197 = vlog2.f32 %v1533_v45 }
 0x397   :  { %v1632_v3 = vsub.f32 %v2839_v21, %v1595_v26 }
 0x399   :  { %1664 = vst [vmem:[%s2960_s7 + $0xd0] sm:$0xff] %v1632_v3 }
 0x39c   :  { %v2198_v47 = vpop.eup %2197 }
 0x39d   :  { %v1597_v61 = vmul.f32 0.6931472, %v2198_v47  ;;  %v1535_v30 = vpop.xlane.xlu0 %1534 }
 0x39e   :  { %2199 = vlog2.f32 %v1535_v30 }
 0x39f   :  { %v1633_v11 = vsub.f32 %v2847_v41, %v1597_v61 }
 0x3a1   :  { %1665 = vst [vmem:[%s2960_s7 + $0xd8] sm:$0xff] %v1633_v11 }
 0x3a4   :  { %v2200_v23 = vpop.eup %2199 }
 0x3a5   :  { %v1599_v0 = vmul.f32 0.6931472, %v2200_v23  ;;  %v1537_v25 = vpop.xlane.xlu1 %1536 }
 0x3a6   :  { %2201 = vlog2.f32 %v1537_v25 }
 0x3a7   :  { %v1634_v21 = vsub.f32 %v2854_v51, %v1599_v0 }
 0x3a9   :  { %1666 = vst [vmem:[%s2960_s7 + $0xe0] sm:$0xff] %v1634_v21 }
 0x3ac   :  { %v2202_v27 = vpop.eup %2201 }
 0x3ad   :  { %v1601_v24 = vmul.f32 0.6931472, %v2202_v27  ;;  %v1539_v35 = vpop.xlane.xlu2 %1538 }
 0x3ae   :  { %2203 = vlog2.f32 %v1539_v35 }
 0x3af   :  { %v1635_v41 = vsub.f32 %v2858_v56, %v1601_v24 }
 0x3b1   :  { %1667 = vst [vmem:[%s2960_s7 + $0xe8] sm:$0xff] %v1635_v41 }
 0x3b4   :  { %v2204_v34 = vpop.eup %2203 }
 0x3b5   :  { %v1603_v53 = vmul.f32 0.6931472, %v2204_v34  ;;  %v1541_v12 = vpop.xlane.xlu0 %1540 }
 0x3b6   :  { %2205 = vlog2.f32 %v1541_v12 }
 0x3b7   :  { %v1636_v51 = vsub.f32 %v2862_v62, %v1603_v53 }
 0x3b9   :  { %1668 = vst [vmem:[%s2960_s7 + $0xf0] sm:$0xff] %v1636_v51 }
 0x3bc   :  { %v2206_v32 = vpop.eup %2205 }
 0x3bd   :  { %v1605_v15 = vmul.f32 0.6931472, %v2206_v32 }
 0x3bf   :  { %v1637_v33 = vsub.f32 %v2866_v6, %v1605_v15 }
 0x3c1   :  { %1669 = vst [vmem:[%s2960_s7 + $0xf8] sm:$0xff] %v1637_v33 }
 0x3c2   :  { %1674 = vsyncpa [#allocation6], 1 }

</bundles_post_ra>
